<compile_context>
chip_gen: v7x
topology: tpu7x:2x2x1
jax: 0.10.0
libtpu: 0.0.40
codegen_flags: <defaults>
</compile_context>

<pallas_src>
import functools

import jax
import jax.numpy as jnp
import numpy as np
from jax import lax
from jax.experimental import pallas as pl
from jax.experimental.pallas import tpu as pltpu


def _full_spec(shape):
    """BlockSpec mapping the whole array as a single VMEM block (grid=(1,))."""
    nd = len(shape)
    return pl.BlockSpec(tuple(shape), lambda i, _nd=nd: (0,) * _nd)


# ----------------------------------------------------------------------------
# Pallas kernel: full bidirectional multi-layer LSTM stack, one invocation.
# ----------------------------------------------------------------------------
def _make_lstm_stack_kernel(n_layers, seq_len):
    S = seq_len

    def kernel(*refs):
        # inputs
        x_ref = refs[0]                              # [S, B, E]   bf16
        w_refs = refs[1:1 + 4 * n_layers]            # per layer: wih_cat, whh_f, whh_b, b_cat
        # outputs
        hcat_ref = refs[1 + 4 * n_layers]            # [L, B, 2H]  f32
        ccat_ref = refs[2 + 4 * n_layers]            # [L, B, 2H]  f32
        # scratch
        gx_ref = refs[3 + 4 * n_layers]              # [S, B, 8H]  f32 (gates_x, fwd|bwd)
        buf_f_ref = refs[4 + 4 * n_layers]           # [S, B, H]   f32 (fwd per-step h)
        buf_b_ref = refs[5 + 4 * n_layers]           # [S, B, H]   f32 (bwd per-step h)

        B = x_ref.shape[1]
        H = buf_f_ref.shape[-1]

        for l in range(n_layers):                    # static Python loop over layers
            wih = w_refs[4 * l][...]                 # [D_in, 8H] bf16, cols = [fwd | bwd]
            whh_f = w_refs[4 * l + 1][...]           # [H, 4H]    bf16
            whh_b = w_refs[4 * l + 2][...]           # [H, 4H]    bf16
            b = w_refs[4 * l + 3][...]               # [1, 8H]    f32  (b_ih + b_hh, fwd|bwd)

            # --- Hoisted input projection: one big MXU matmul for the whole
            # sequence and BOTH directions; bias folded in once (not per step).
            if l == 0:
                xin = x_ref[...].reshape(S * B, x_ref.shape[-1])
                gx = jnp.dot(xin, wih, preferred_element_type=jnp.float32)
            else:
                xf = buf_f_ref[...].reshape(S * B, H).astype(jnp.bfloat16)
                xb = buf_b_ref[...].reshape(S * B, H).astype(jnp.bfloat16)
                gx = (jnp.dot(xf, wih[:H, :], preferred_element_type=jnp.float32)
                      + jnp.dot(xb, wih[H:, :], preferred_element_type=jnp.float32))
            gx_ref[...] = (gx + b).reshape(S, B, 8 * H)

            last_layer = (l == n_layers - 1)

            def lstm_cell(g, c_prev):
                # PyTorch gate order: i, f, g, o
                i_g = jax.nn.sigmoid(g[:, 0 * H:1 * H])
                f_g = jax.nn.sigmoid(g[:, 1 * H:2 * H])
                g_g = jnp.tanh(g[:, 2 * H:3 * H])
                o_g = jax.nn.sigmoid(g[:, 3 * H:4 * H])
                c_new = f_g * c_prev + i_g * g_g
                h_new = o_g * jnp.tanh(c_new)
                return h_new, c_new

            def step(i, carry):
                hf, cf, hb, cb = carry
                tb = S - 1 - i
                # only the recurrent h @ W_hh remains in the serial chain
                g_f = gx_ref[i][:, :4 * H] + jnp.dot(
                    hf.astype(jnp.bfloat16), whh_f,
                    preferred_element_type=jnp.float32)
                g_b = gx_ref[tb][:, 4 * H:] + jnp.dot(
                    hb.astype(jnp.bfloat16), whh_b,
                    preferred_element_type=jnp.float32)
                hf_new, cf_new = lstm_cell(g_f, cf)
                hb_new, cb_new = lstm_cell(g_b, cb)
                if not last_layer:
                    # per-timestep outputs are only needed as next-layer input;
                    # the module discards the top layer's `outputs`.
                    buf_f_ref[i] = hf_new
                    buf_b_ref[tb] = hb_new
                return hf_new, cf_new, hb_new, cb_new

            z = jnp.zeros((B, H), jnp.float32)
            hf, cf, hb, cb = lax.fori_loop(0, S, step, (z, z, z, z), unroll=True)

            # Final states laid out exactly like PyTorch's
            # hidden.view(-1,2,B,H).permute(0,2,1,3).reshape(L,B,2H): [fwd | bwd]
            hcat_ref[l] = jnp.concatenate([hf, hb], axis=-1)
            ccat_ref[l] = jnp.concatenate([cf, cb], axis=-1)

    return kernel


def lstm_stack(x_bf16, lstm_params, *, n_layers, hid_dim):
    """x_bf16: [S, B, E] bf16 -> (hidden_cat, cell_cat) each [n_layers, B, 2H] f32."""
    S, B, _ = x_bf16.shape
    H = hid_dim
    flat_w = []
    for l in range(n_layers):
        flat_w.extend(lstm_params[l])

    kernel = _make_lstm_stack_kernel(n_layers, S)
    out3 = (n_layers, B, 2 * H)
    return pl.pallas_call(
        kernel,
        grid=(1,),
        in_specs=[_full_spec(x_bf16.shape)] + [_full_spec(w.shape) for w in flat_w],
        out_specs=(_full_spec(out3), _full_spec(out3)),
        out_shape=(jax.ShapeDtypeStruct(out3, jnp.float32),
                   jax.ShapeDtypeStruct(out3, jnp.float32)),
        scratch_shapes=[
            pltpu.VMEM((S, B, 8 * H), jnp.float32),   # precomputed gates_x (fwd|bwd)
            pltpu.VMEM((S, B, H), jnp.float32),       # fwd per-step hidden
            pltpu.VMEM((S, B, H), jnp.float32),       # bwd per-step hidden
        ],
        compiler_params=pltpu.CompilerParams(dimension_semantics=("arbitrary",)),
    )(x_bf16, *flat_w)


# ----------------------------------------------------------------------------
# Pallas kernel: fused fc_hid + fc_cel  (y = x @ W + b, W stored [in, out])
# ----------------------------------------------------------------------------
def _fc_pair_kernel(h_ref, c_ref, wh_ref, bh_ref, wc_ref, bc_ref, oh_ref, oc_ref):
    L, B, H2 = h_ref.shape
    h = h_ref[...].reshape(L * B, H2)
    c = c_ref[...].reshape(L * B, H2)
    oh = jnp.dot(h, wh_ref[...], preferred_element_type=jnp.float32) + bh_ref[...]
    oc = jnp.dot(c, wc_ref[...], preferred_element_type=jnp.float32) + bc_ref[...]
    H = oh.shape[-1]
    oh_ref[...] = oh.reshape(L, B, H)
    oc_ref[...] = oc.reshape(L, B, H)


def fc_pair(hcat, ccat, wh, bh, wc, bc):
    L, B, _ = hcat.shape
    H = wh.shape[1]
    out3 = (L, B, H)
    return pl.pallas_call(
        _fc_pair_kernel,
        grid=(1,),
        in_specs=[_full_spec(a.shape) for a in (hcat, ccat, wh, bh, wc, bc)],
        out_specs=(_full_spec(out3), _full_spec(out3)),
        out_shape=(jax.ShapeDtypeStruct(out3, jnp.float32),
                   jax.ShapeDtypeStruct(out3, jnp.float32)),
        compiler_params=pltpu.CompilerParams(dimension_semantics=("arbitrary",)),
    )(hcat, ccat, wh, bh, wc, bc)


# ----------------------------------------------------------------------------
# Full module forward (matches LSTM_Bi_Enc.forward semantics, eval mode)
# ----------------------------------------------------------------------------
def lstm_bi_enc_forward(tokens, params, *, n_layers, hid_dim):
    # embedding lookup (glue)
    emb = jnp.take(params["embedding"], tokens, axis=0)          # [B, S, E]
    x = jnp.transpose(emb, (1, 0, 2)).astype(jnp.bfloat16)       # [S, B, E] time-major
    # TODO(synk): inter-layer dropout omitted (dropout / eval semantics).
    hcat, ccat = lstm_stack(x, params["lstm"], n_layers=n_layers, hid_dim=hid_dim)
    return fc_pair(hcat, ccat,
                   params["fc_hid_w"], params["fc_hid_b"],
                   params["fc_cel_w"], params["fc_cel_b"])


# ----------------------------------------------------------------------------
# Deterministic parameter init (shapes per the module's __init__), pre-fused
# into the layout the kernel consumes.
# ----------------------------------------------------------------------------
def init_params(key, *, vocab, emb_dim, hid_dim, n_layers):
    H = hid_dim
    keys = jax.random.split(key, 64)
    ki = iter(range(64))
    k_lstm = 1.0 / jnp.sqrt(H)

    def u(k, shape, scale):
        return jax.random.uniform(k, shape, jnp.float32, -scale, scale)

    params = {"embedding": jax.random.normal(keys[next(ki)],
                                             (vocab, emb_dim), jnp.float32) * 0.1}
    lstm = []
    for l in range(n_layers):
        d_in = emb_dim if l == 0 else 2 * H
        wih, whh, bias = [], [], []
        for _d in range(2):                      # 0 = forward, 1 = reverse
            wih.append(u(keys[next(ki)], (d_in, 4 * H), k_lstm))   # = W_ih^T
            whh.append(u(keys[next(ki)], (H, 4 * H), k_lstm))      # = W_hh^T
            b_ih = u(keys[next(ki)], (1, 4 * H), k_lstm)
            b_hh = u(keys[next(ki)], (1, 4 * H), k_lstm)
            bias.append(b_ih + b_hh)             # exact bias fold
        # fused per-layer layout for the kernel:
        #   wih_cat [d_in, 8H] (fwd | bwd cols) bf16, whh_f/whh_b [H,4H] bf16,
        #   b_cat [1, 8H] f32
        lstm.append((
            jnp.concatenate(wih, axis=1).astype(jnp.bfloat16),
            whh[0].astype(jnp.bfloat16),
            whh[1].astype(jnp.bfloat16),
            jnp.concatenate(bias, axis=1),
        ))
    params["lstm"] = lstm

    k_fc = 1.0 / jnp.sqrt(2 * H)
    params["fc_hid_w"] = u(keys[next(ki)], (2 * H, H), k_fc)       # stored [in, out]
    params["fc_hid_b"] = u(keys[next(ki)], (1, H), k_fc)
    params["fc_cel_w"] = u(keys[next(ki)], (2 * H, H), k_fc)
    params["fc_cel_b"] = u(keys[next(ki)], (1, H), k_fc)
    return params


# ----------------------------------------------------------------------------
# Pure-JAX f32 reference (PyTorch nn.LSTM semantics) for correctness check.
# ----------------------------------------------------------------------------
def _reference_forward(tokens, params, *, n_layers, hid_dim):
    H = hid_dim
    B, S = tokens.shape
    emb = jnp.take(params["embedding"], tokens, axis=0)
    x = jnp.transpose(emb, (1, 0, 2)).astype(jnp.float32)        # [S, B, E]
    hs, cs = [], []
    for l in range(n_layers):
        wih_cat, whh_f, whh_b, b_cat = params["lstm"][l]
        wih_cat = wih_cat.astype(jnp.float32)
        whh = [whh_f.astype(jnp.float32), whh_b.astype(jnp.float32)]
        wih = [wih_cat[:, :4 * H], wih_cat[:, 4 * H:]]
        bias = [b_cat[:, :4 * H], b_cat[:, 4 * H:]]
        outs, hfin, cfin = [], [], []
        for d in range(2):
            h = jnp.zeros((B, H), jnp.float32)
            c = jnp.zeros((B, H), jnp.float32)
            seq_out = [None] * S
            order = range(S - 1, -1, -1) if d == 1 else range(S)
            for t in order:
                g = x[t] @ wih[d] + h @ whh[d] + bias[d]
                i_g = jax.nn.sigmoid(g[:, :H])
                f_g = jax.nn.sigmoid(g[:, H:2 * H])
                g_g = jnp.tanh(g[:, 2 * H:3 * H])
                o_g = jax.nn.sigmoid(g[:, 3 * H:])
                c = f_g * c + i_g * g_g
                h = o_g * jnp.tanh(c)
                seq_out[t] = h
            outs.append(jnp.stack(seq_out, axis=0))
            hfin.append(h)
            cfin.append(c)
        x = jnp.concatenate(outs, axis=-1)
        hs.append(jnp.concatenate(hfin, axis=-1))
        cs.append(jnp.concatenate(cfin, axis=-1))
    hcat = jnp.stack(hs, axis=0)
    ccat = jnp.stack(cs, axis=0)
    hid = hcat @ params["fc_hid_w"] + params["fc_hid_b"]
    cel = ccat @ params["fc_cel_w"] + params["fc_cel_b"]
    return hid, cel


if __name__ == "__main__":
    VOCAB, EMB_DIM, HID_DIM, N_LAYERS = 50, 32, 32, 2
    B, S = 2, 8

    key = jax.random.PRNGKey(0)
    k_tok, k_par = jax.random.split(key)
    tokens = jax.random.randint(k_tok, (B, S), 0, VOCAB, dtype=jnp.int32)
    params = init_params(k_par, vocab=VOCAB, emb_dim=EMB_DIM,
                         hid_dim=HID_DIM, n_layers=N_LAYERS)

    fwd = jax.jit(functools.partial(lstm_bi_enc_forward,
                                    n_layers=N_LAYERS, hid_dim=HID_DIM))
    hidden, cell = fwd(tokens, params)
    jax.block_until_ready((hidden, cell))

    assert hidden.shape == (N_LAYERS, B, HID_DIM)
    assert cell.shape == (N_LAYERS, B, HID_DIM)
    assert bool(jnp.all(jnp.isfinite(hidden))) and bool(jnp.all(jnp.isfinite(cell)))

    # numerical check vs. f32 reference (bf16 MXU operands => loose tolerance)
    hid_ref, cel_ref = _reference_forward(tokens, params,
                                          n_layers=N_LAYERS, hid_dim=HID_DIM)
    np.testing.assert_allclose(np.asarray(hidden), np.asarray(hid_ref),
                               rtol=5e-2, atol=3e-2)
    np.testing.assert_allclose(np.asarray(cell), np.asarray(cel_ref),
                               rtol=5e-2, atol=3e-2)
    print("KERNEL_OK")
</pallas_src>

<mosaic_0001>
module attributes {stable_mosaic.version = 11 : i64} {
  func.func @_fc_pair_kernel(%arg0: i32, %arg1: memref<2x2x64xf32, #tpu.memory_space<vmem>>, %arg2: memref<2x2x64xf32, #tpu.memory_space<vmem>>, %arg3: memref<64x32xf32, #tpu.memory_space<vmem>>, %arg4: memref<1x32xf32, #tpu.memory_space<vmem>>, %arg5: memref<64x32xf32, #tpu.memory_space<vmem>>, %arg6: memref<1x32xf32, #tpu.memory_space<vmem>>, %arg7: memref<2x2x32xf32, #tpu.memory_space<vmem>>, %arg8: memref<2x2x32xf32, #tpu.memory_space<vmem>>) attributes {dimension_semantics = [#tpu.dimension_semantics<arbitrary>], iteration_bounds = array<i64: 1>, scalar_prefetch = 0 : i64, scratch_operands = 0 : i64, tpu.core_type = #tpu.core_type<tc>, window_params = [{pipeline_mode = #tpu.pipeline_mode<synchronous>, transform_indices = @transform_0, window_bounds = array<i64: 2, 2, 64>}, {pipeline_mode = #tpu.pipeline_mode<synchronous>, transform_indices = @transform_1, window_bounds = array<i64: 2, 2, 64>}, {pipeline_mode = #tpu.pipeline_mode<synchronous>, transform_indices = @transform_2, window_bounds = array<i64: 64, 32>}, {pipeline_mode = #tpu.pipeline_mode<synchronous>, transform_indices = @transform_3, window_bounds = array<i64: 1, 32>}, {pipeline_mode = #tpu.pipeline_mode<synchronous>, transform_indices = @transform_4, window_bounds = array<i64: 64, 32>}, {pipeline_mode = #tpu.pipeline_mode<synchronous>, transform_indices = @transform_5, window_bounds = array<i64: 1, 32>}, {pipeline_mode = #tpu.pipeline_mode<synchronous>, transform_indices = @transform_6, window_bounds = array<i64: 2, 2, 32>}, {pipeline_mode = #tpu.pipeline_mode<synchronous>, transform_indices = @transform_7, window_bounds = array<i64: 2, 2, 32>}]} {
    %c0 = arith.constant 0 : index
    %c0_0 = arith.constant 0 : index
    %c0_1 = arith.constant 0 : index
    %0 = vector.load %arg1[%c0, %c0_0, %c0_1] : memref<2x2x64xf32, #tpu.memory_space<vmem>>, vector<2x2x64xf32>
    %1 = vector.shape_cast %0 : vector<2x2x64xf32> to vector<4x64xf32>
    %c0_2 = arith.constant 0 : index
    %c0_3 = arith.constant 0 : index
    %c0_4 = arith.constant 0 : index
    %2 = vector.load %arg2[%c0_2, %c0_3, %c0_4] : memref<2x2x64xf32, #tpu.memory_space<vmem>>, vector<2x2x64xf32>
    %3 = vector.shape_cast %2 : vector<2x2x64xf32> to vector<4x64xf32>
    %c0_5 = arith.constant 0 : index
    %c0_6 = arith.constant 0 : index
    %4 = vector.load %arg3[%c0_5, %c0_6] : memref<64x32xf32, #tpu.memory_space<vmem>>, vector<64x32xf32>
    %cst = arith.constant dense<0.000000e+00> : vector<4x32xf32>
    %5 = tpu.matmul %1, %4, %cst {dimension_numbers = #tpu.dot_dimension_numbers<[1], [0], [0], [1], [0, 0, 1, 1], [], []>} : vector<4x64xf32>, vector<64x32xf32>, vector<4x32xf32> -> vector<4x32xf32>
    %c0_7 = arith.constant 0 : index
    %c0_8 = arith.constant 0 : index
    %6 = vector.load %arg4[%c0_7, %c0_8] : memref<1x32xf32, #tpu.memory_space<vmem>>, vector<1x32xf32>
    %7 = vector.broadcast %6 : vector<1x32xf32> to vector<4x32xf32>
    %8 = arith.addf %5, %7 : vector<4x32xf32>
    %c0_9 = arith.constant 0 : index
    %c0_10 = arith.constant 0 : index
    %9 = vector.load %arg5[%c0_9, %c0_10] : memref<64x32xf32, #tpu.memory_space<vmem>>, vector<64x32xf32>
    %cst_11 = arith.constant dense<0.000000e+00> : vector<4x32xf32>
    %10 = tpu.matmul %3, %9, %cst_11 {dimension_numbers = #tpu.dot_dimension_numbers<[1], [0], [0], [1], [0, 0, 1, 1], [], []>} : vector<4x64xf32>, vector<64x32xf32>, vector<4x32xf32> -> vector<4x32xf32>
    %c0_12 = arith.constant 0 : index
    %c0_13 = arith.constant 0 : index
    %11 = vector.load %arg6[%c0_12, %c0_13] : memref<1x32xf32, #tpu.memory_space<vmem>>, vector<1x32xf32>
    %12 = vector.broadcast %11 : vector<1x32xf32> to vector<4x32xf32>
    %13 = arith.addf %10, %12 : vector<4x32xf32>
    %14 = vector.shape_cast %8 : vector<4x32xf32> to vector<2x2x32xf32>
    %c0_14 = arith.constant 0 : index
    %c0_15 = arith.constant 0 : index
    %c0_16 = arith.constant 0 : index
    %15 = vector.load %arg7[%c0_14, %c0_15, %c0_16] : memref<2x2x32xf32, #tpu.memory_space<vmem>>, vector<2x2x32xf32>
    tpu.vector_store %arg7[%c0_14, %c0_15, %c0_16], %14 {strides = array<i32>} : memref<2x2x32xf32, #tpu.memory_space<vmem>>, vector<2x2x32xf32>,
    %16 = vector.shape_cast %13 : vector<4x32xf32> to vector<2x2x32xf32>
    %c0_17 = arith.constant 0 : index
    %c0_18 = arith.constant 0 : index
    %c0_19 = arith.constant 0 : index
    %17 = vector.load %arg8[%c0_17, %c0_18, %c0_19] : memref<2x2x32xf32, #tpu.memory_space<vmem>>, vector<2x2x32xf32>
    tpu.vector_store %arg8[%c0_17, %c0_18, %c0_19], %16 {strides = array<i32>} : memref<2x2x32xf32, #tpu.memory_space<vmem>>, vector<2x2x32xf32>,
    return
  }
  func.func @transform_0(%arg0: i32) -> (i32, i32, i32) {
    %c0_i32 = arith.constant 0 : i32
    %c0_i32_0 = arith.constant 0 : i32
    %c0_i32_1 = arith.constant 0 : i32
    %c0_i32_2 = arith.constant 0 : i32
    return %c0_i32, %c0_i32_0, %c0_i32_1 : i32, i32, i32
  }
  func.func @transform_1(%arg0: i32) -> (i32, i32, i32) {
    %c0_i32 = arith.constant 0 : i32
    %c0_i32_0 = arith.constant 0 : i32
    %c0_i32_1 = arith.constant 0 : i32
    %c0_i32_2 = arith.constant 0 : i32
    return %c0_i32, %c0_i32_0, %c0_i32_1 : i32, i32, i32
  }
  func.func @transform_2(%arg0: i32) -> (i32, i32) {
    %c0_i32 = arith.constant 0 : i32
    %c0_i32_0 = arith.constant 0 : i32
    %c0_i32_1 = arith.constant 0 : i32
    return %c0_i32, %c0_i32_0 : i32, i32
  }
  func.func @transform_3(%arg0: i32) -> (i32, i32) {
    %c0_i32 = arith.constant 0 : i32
    %c0_i32_0 = arith.constant 0 : i32
    %c0_i32_1 = arith.constant 0 : i32
    return %c0_i32, %c0_i32_0 : i32, i32
  }
  func.func @transform_4(%arg0: i32) -> (i32, i32) {
    %c0_i32 = arith.constant 0 : i32
    %c0_i32_0 = arith.constant 0 : i32
    %c0_i32_1 = arith.constant 0 : i32
    return %c0_i32, %c0_i32_0 : i32, i32
  }
  func.func @transform_5(%arg0: i32) -> (i32, i32) {
    %c0_i32 = arith.constant 0 : i32
    %c0_i32_0 = arith.constant 0 : i32
    %c0_i32_1 = arith.constant 0 : i32
    return %c0_i32, %c0_i32_0 : i32, i32
  }
  func.func @transform_6(%arg0: i32) -> (i32, i32, i32) {
    %c0_i32 = arith.constant 0 : i32
    %c0_i32_0 = arith.constant 0 : i32
    %c0_i32_1 = arith.constant 0 : i32
    %c0_i32_2 = arith.constant 0 : i32
    return %c0_i32, %c0_i32_0, %c0_i32_1 : i32, i32, i32
  }
  func.func @transform_7(%arg0: i32) -> (i32, i32, i32) {
    %c0_i32 = arith.constant 0 : i32
    %c0_i32_0 = arith.constant 0 : i32
    %c0_i32_1 = arith.constant 0 : i32
    %c0_i32_2 = arith.constant 0 : i32
    return %c0_i32, %c0_i32_0, %c0_i32_1 : i32, i32, i32
  }
}

module attributes {stable_mosaic.version = 11 : i64} {
  func.func @kernel(%arg0: i32, %arg1: memref<8x2x32xbf16, #tpu.memory_space<vmem>>, %arg2: memref<32x256xbf16, #tpu.memory_space<vmem>>, %arg3: memref<32x128xbf16, #tpu.memory_space<vmem>>, %arg4: memref<32x128xbf16, #tpu.memory_space<vmem>>, %arg5: memref<1x256xf32, #tpu.memory_space<vmem>>, %arg6: memref<64x256xbf16, #tpu.memory_space<vmem>>, %arg7: memref<32x128xbf16, #tpu.memory_space<vmem>>, %arg8: memref<32x128xbf16, #tpu.memory_space<vmem>>, %arg9: memref<1x256xf32, #tpu.memory_space<vmem>>, %arg10: memref<2x2x64xf32, #tpu.memory_space<vmem>>, %arg11: memref<2x2x64xf32, #tpu.memory_space<vmem>>, %arg12: memref<8x2x256xf32, #tpu.memory_space<vmem>>, %arg13: memref<8x2x32xf32, #tpu.memory_space<vmem>>, %arg14: memref<8x2x32xf32, #tpu.memory_space<vmem>>) attributes {dimension_semantics = [#tpu.dimension_semantics<arbitrary>], iteration_bounds = array<i64: 1>, scalar_prefetch = 0 : i64, scratch_operands = 3 : i64, tpu.core_type = #tpu.core_type<tc>, window_params = [{pipeline_mode = #tpu.pipeline_mode<synchronous>, transform_indices = @transform_0, window_bounds = array<i64: 8, 2, 32>}, {pipeline_mode = #tpu.pipeline_mode<synchronous>, transform_indices = @transform_1, window_bounds = array<i64: 32, 256>}, {pipeline_mode = #tpu.pipeline_mode<synchronous>, transform_indices = @transform_2, window_bounds = array<i64: 32, 128>}, {pipeline_mode = #tpu.pipeline_mode<synchronous>, transform_indices = @transform_3, window_bounds = array<i64: 32, 128>}, {pipeline_mode = #tpu.pipeline_mode<synchronous>, transform_indices = @transform_4, window_bounds = array<i64: 1, 256>}, {pipeline_mode = #tpu.pipeline_mode<synchronous>, transform_indices = @transform_5, window_bounds = array<i64: 64, 256>}, {pipeline_mode = #tpu.pipeline_mode<synchronous>, transform_indices = @transform_6, window_bounds = array<i64: 32, 128>}, {pipeline_mode = #tpu.pipeline_mode<synchronous>, transform_indices = @transform_7, window_bounds = array<i64: 32, 128>}, {pipeline_mode = #tpu.pipeline_mode<synchronous>, transform_indices = @transform_8, window_bounds = array<i64: 1, 256>}, {pipeline_mode = #tpu.pipeline_mode<synchronous>, transform_indices = @transform_9, window_bounds = array<i64: 2, 2, 64>}, {pipeline_mode = #tpu.pipeline_mode<synchronous>, transform_indices = @transform_10, window_bounds = array<i64: 2, 2, 64>}]} {
    %c0 = arith.constant 0 : index
    %c0_0 = arith.constant 0 : index
    %0 = vector.load %arg2[%c0, %c0_0] : memref<32x256xbf16, #tpu.memory_space<vmem>>, vector<32x256xbf16>
    %c0_1 = arith.constant 0 : index
    %c0_2 = arith.constant 0 : index
    %1 = vector.load %arg3[%c0_1, %c0_2] : memref<32x128xbf16, #tpu.memory_space<vmem>>, vector<32x128xbf16>
    %c0_3 = arith.constant 0 : index
    %c0_4 = arith.constant 0 : index
    %2 = vector.load %arg4[%c0_3, %c0_4] : memref<32x128xbf16, #tpu.memory_space<vmem>>, vector<32x128xbf16>
    %c0_5 = arith.constant 0 : index
    %c0_6 = arith.constant 0 : index
    %3 = vector.load %arg5[%c0_5, %c0_6] : memref<1x256xf32, #tpu.memory_space<vmem>>, vector<1x256xf32>
    %c0_7 = arith.constant 0 : index
    %c0_8 = arith.constant 0 : index
    %c0_9 = arith.constant 0 : index
    %4 = vector.load %arg1[%c0_7, %c0_8, %c0_9] : memref<8x2x32xbf16, #tpu.memory_space<vmem>>, vector<8x2x32xbf16>
    %5 = vector.shape_cast %4 : vector<8x2x32xbf16> to vector<16x32xbf16>
    %cst = arith.constant dense<0.000000e+00> : vector<16x256xf32>
    %6 = tpu.matmul %5, %0, %cst {dimension_numbers = #tpu.dot_dimension_numbers<[1], [0], [0], [1], [0, 0, 1, 1], [], []>} : vector<16x32xbf16>, vector<32x256xbf16>, vector<16x256xf32> -> vector<16x256xf32>
    %7 = vector.broadcast %3 : vector<1x256xf32> to vector<16x256xf32>
    %8 = arith.addf %6, %7 : vector<16x256xf32>
    %9 = vector.shape_cast %8 : vector<16x256xf32> to vector<8x2x256xf32>
    %c0_10 = arith.constant 0 : index
    %c0_11 = arith.constant 0 : index
    %c0_12 = arith.constant 0 : index
    %10 = vector.load %arg12[%c0_10, %c0_11, %c0_12] : memref<8x2x256xf32, #tpu.memory_space<vmem>>, vector<8x2x256xf32>
    tpu.vector_store %arg12[%c0_10, %c0_11, %c0_12], %9 {strides = array<i32>} : memref<8x2x256xf32, #tpu.memory_space<vmem>>, vector<8x2x256xf32>,
    %cst_13 = arith.constant 0.000000e+00 : f32
    %11 = vector.broadcast %cst_13 : f32 to vector<2x32xf32>
    %c0_i32 = arith.constant 0 : i32
    %c7_i32 = arith.constant 7 : i32
    %12 = arith.subi %c7_i32, %c0_i32 : i32
    %13 = arith.index_cast %c0_i32 : i32 to index
    %c0_14 = arith.constant 0 : index
    %c0_15 = arith.constant 0 : index
    %14 = vector.load %arg12[%13, %c0_14, %c0_15] : memref<8x2x256xf32, #tpu.memory_space<vmem>>, vector<1x2x256xf32>
    %15 = vector.shape_cast %14 : vector<1x2x256xf32> to vector<2x256xf32>
    %16 = vector.extract_strided_slice %15 {offsets = [0, 0], sizes = [2, 128], strides = [1, 1]} : vector<2x256xf32> to vector<2x128xf32>
    %17 = arith.truncf %11 : vector<2x32xf32> to vector<2x32xbf16>
    %cst_16 = arith.constant dense<0.000000e+00> : vector<2x128xf32>
    %18 = tpu.matmul %17, %1, %cst_16 {dimension_numbers = #tpu.dot_dimension_numbers<[1], [0], [0], [1], [0, 0, 1, 1], [], []>} : vector<2x32xbf16>, vector<32x128xbf16>, vector<2x128xf32> -> vector<2x128xf32>
    %19 = arith.addf %16, %18 : vector<2x128xf32>
    %20 = arith.index_cast %12 : i32 to index
    %c0_17 = arith.constant 0 : index
    %c0_18 = arith.constant 0 : index
    %21 = vector.load %arg12[%20, %c0_17, %c0_18] : memref<8x2x256xf32, #tpu.memory_space<vmem>>, vector<1x2x256xf32>
    %22 = vector.shape_cast %21 : vector<1x2x256xf32> to vector<2x256xf32>
    %23 = vector.extract_strided_slice %22 {offsets = [0, 128], sizes = [2, 128], strides = [1, 1]} : vector<2x256xf32> to vector<2x128xf32>
    %24 = arith.truncf %11 : vector<2x32xf32> to vector<2x32xbf16>
    %cst_19 = arith.constant dense<0.000000e+00> : vector<2x128xf32>
    %25 = tpu.matmul %24, %2, %cst_19 {dimension_numbers = #tpu.dot_dimension_numbers<[1], [0], [0], [1], [0, 0, 1, 1], [], []>} : vector<2x32xbf16>, vector<32x128xbf16>, vector<2x128xf32> -> vector<2x128xf32>
    %26 = arith.addf %23, %25 : vector<2x128xf32>
    %27 = vector.extract_strided_slice %19 {offsets = [0, 0], sizes = [2, 32], strides = [1, 1]} : vector<2x128xf32> to vector<2x32xf32>
    %28 = arith.negf %27 : vector<2x32xf32>
    %29 = math.exp %28 : vector<2x32xf32>
    %cst_20 = arith.constant 1.000000e+00 : f32
    %30 = vector.broadcast %cst_20 : f32 to vector<2x32xf32>
    %31 = arith.addf %30, %29 : vector<2x32xf32>
    %32 = arith.divf %30, %31 : vector<2x32xf32>
    %33 = vector.extract_strided_slice %19 {offsets = [0, 32], sizes = [2, 32], strides = [1, 1]} : vector<2x128xf32> to vector<2x32xf32>
    %34 = arith.negf %33 : vector<2x32xf32>
    %35 = math.exp %34 : vector<2x32xf32>
    %cst_21 = arith.constant 1.000000e+00 : f32
    %36 = vector.broadcast %cst_21 : f32 to vector<2x32xf32>
    %37 = arith.addf %36, %35 : vector<2x32xf32>
    %38 = arith.divf %36, %37 : vector<2x32xf32>
    %39 = vector.extract_strided_slice %19 {offsets = [0, 64], sizes = [2, 32], strides = [1, 1]} : vector<2x128xf32> to vector<2x32xf32>
    %40 = math.tanh %39 : vector<2x32xf32>
    %41 = vector.extract_strided_slice %19 {offsets = [0, 96], sizes = [2, 32], strides = [1, 1]} : vector<2x128xf32> to vector<2x32xf32>
    %42 = arith.negf %41 : vector<2x32xf32>
    %43 = math.exp %42 : vector<2x32xf32>
    %cst_22 = arith.constant 1.000000e+00 : f32
    %44 = vector.broadcast %cst_22 : f32 to vector<2x32xf32>
    %45 = arith.addf %44, %43 : vector<2x32xf32>
    %46 = arith.divf %44, %45 : vector<2x32xf32>
    %47 = arith.mulf %38, %11 : vector<2x32xf32>
    %48 = arith.mulf %32, %40 : vector<2x32xf32>
    %49 = arith.addf %47, %48 : vector<2x32xf32>
    %50 = math.tanh %49 : vector<2x32xf32>
    %51 = arith.mulf %46, %50 : vector<2x32xf32>
    %52 = vector.extract_strided_slice %26 {offsets = [0, 0], sizes = [2, 32], strides = [1, 1]} : vector<2x128xf32> to vector<2x32xf32>
    %53 = arith.negf %52 : vector<2x32xf32>
    %54 = math.exp %53 : vector<2x32xf32>
    %cst_23 = arith.constant 1.000000e+00 : f32
    %55 = vector.broadcast %cst_23 : f32 to vector<2x32xf32>
    %56 = arith.addf %55, %54 : vector<2x32xf32>
    %57 = arith.divf %55, %56 : vector<2x32xf32>
    %58 = vector.extract_strided_slice %26 {offsets = [0, 32], sizes = [2, 32], strides = [1, 1]} : vector<2x128xf32> to vector<2x32xf32>
    %59 = arith.negf %58 : vector<2x32xf32>
    %60 = math.exp %59 : vector<2x32xf32>
    %cst_24 = arith.constant 1.000000e+00 : f32
    %61 = vector.broadcast %cst_24 : f32 to vector<2x32xf32>
    %62 = arith.addf %61, %60 : vector<2x32xf32>
    %63 = arith.divf %61, %62 : vector<2x32xf32>
    %64 = vector.extract_strided_slice %26 {offsets = [0, 64], sizes = [2, 32], strides = [1, 1]} : vector<2x128xf32> to vector<2x32xf32>
    %65 = math.tanh %64 : vector<2x32xf32>
    %66 = vector.extract_strided_slice %26 {offsets = [0, 96], sizes = [2, 32], strides = [1, 1]} : vector<2x128xf32> to vector<2x32xf32>
    %67 = arith.negf %66 : vector<2x32xf32>
    %68 = math.exp %67 : vector<2x32xf32>
    %cst_25 = arith.constant 1.000000e+00 : f32
    %69 = vector.broadcast %cst_25 : f32 to vector<2x32xf32>
    %70 = arith.addf %69, %68 : vector<2x32xf32>
    %71 = arith.divf %69, %70 : vector<2x32xf32>
    %72 = arith.mulf %63, %11 : vector<2x32xf32>
    %73 = arith.mulf %57, %65 : vector<2x32xf32>
    %74 = arith.addf %72, %73 : vector<2x32xf32>
    %75 = math.tanh %74 : vector<2x32xf32>
    %76 = arith.mulf %71, %75 : vector<2x32xf32>
    %77 = arith.index_cast %c0_i32 : i32 to index
    %c0_26 = arith.constant 0 : index
    %c0_27 = arith.constant 0 : index
    %78 = vector.load %arg13[%77, %c0_26, %c0_27] : memref<8x2x32xf32, #tpu.memory_space<vmem>>, vector<1x2x32xf32>
    %79 = vector.shape_cast %78 : vector<1x2x32xf32> to vector<2x32xf32>
    %80 = vector.shape_cast %51 : vector<2x32xf32> to vector<1x2x32xf32>
    tpu.vector_store %arg13[%77, %c0_26, %c0_27], %80 {strides = array<i32>} : memref<8x2x32xf32, #tpu.memory_space<vmem>>, vector<1x2x32xf32>,
    %81 = arith.index_cast %12 : i32 to index
    %c0_28 = arith.constant 0 : index
    %c0_29 = arith.constant 0 : index
    %82 = vector.load %arg14[%81, %c0_28, %c0_29] : memref<8x2x32xf32, #tpu.memory_space<vmem>>, vector<1x2x32xf32>
    %83 = vector.shape_cast %82 : vector<1x2x32xf32> to vector<2x32xf32>
    %84 = vector.shape_cast %76 : vector<2x32xf32> to vector<1x2x32xf32>
    tpu.vector_store %arg14[%81, %c0_28, %c0_29], %84 {strides = array<i32>} : memref<8x2x32xf32, #tpu.memory_space<vmem>>, vector<1x2x32xf32>,
    %c1_i32 = arith.constant 1 : i32
    %c7_i32_30 = arith.constant 7 : i32
    %85 = arith.subi %c7_i32_30, %c1_i32 : i32
    %86 = arith.index_cast %c1_i32 : i32 to index
    %c0_31 = arith.constant 0 : index
    %c0_32 = arith.constant 0 : index
    %87 = vector.load %arg12[%86, %c0_31, %c0_32] : memref<8x2x256xf32, #tpu.memory_space<vmem>>, vector<1x2x256xf32>
    %88 = vector.shape_cast %87 : vector<1x2x256xf32> to vector<2x256xf32>
    %89 = vector.extract_strided_slice %88 {offsets = [0, 0], sizes = [2, 128], strides = [1, 1]} : vector<2x256xf32> to vector<2x128xf32>
    %90 = arith.truncf %51 : vector<2x32xf32> to vector<2x32xbf16>
    %cst_33 = arith.constant dense<0.000000e+00> : vector<2x128xf32>
    %91 = tpu.matmul %90, %1, %cst_33 {dimension_numbers = #tpu.dot_dimension_numbers<[1], [0], [0], [1], [0, 0, 1, 1], [], []>} : vector<2x32xbf16>, vector<32x128xbf16>, vector<2x128xf32> -> vector<2x128xf32>
    %92 = arith.addf %89, %91 : vector<2x128xf32>
    %93 = arith.index_cast %85 : i32 to index
    %c0_34 = arith.constant 0 : index
    %c0_35 = arith.constant 0 : index
    %94 = vector.load %arg12[%93, %c0_34, %c0_35] : memref<8x2x256xf32, #tpu.memory_space<vmem>>, vector<1x2x256xf32>
    %95 = vector.shape_cast %94 : vector<1x2x256xf32> to vector<2x256xf32>
    %96 = vector.extract_strided_slice %95 {offsets = [0, 128], sizes = [2, 128], strides = [1, 1]} : vector<2x256xf32> to vector<2x128xf32>
    %97 = arith.truncf %76 : vector<2x32xf32> to vector<2x32xbf16>
    %cst_36 = arith.constant dense<0.000000e+00> : vector<2x128xf32>
    %98 = tpu.matmul %97, %2, %cst_36 {dimension_numbers = #tpu.dot_dimension_numbers<[1], [0], [0], [1], [0, 0, 1, 1], [], []>} : vector<2x32xbf16>, vector<32x128xbf16>, vector<2x128xf32> -> vector<2x128xf32>
    %99 = arith.addf %96, %98 : vector<2x128xf32>
    %100 = vector.extract_strided_slice %92 {offsets = [0, 0], sizes = [2, 32], strides = [1, 1]} : vector<2x128xf32> to vector<2x32xf32>
    %101 = arith.negf %100 : vector<2x32xf32>
    %102 = math.exp %101 : vector<2x32xf32>
    %cst_37 = arith.constant 1.000000e+00 : f32
    %103 = vector.broadcast %cst_37 : f32 to vector<2x32xf32>
    %104 = arith.addf %103, %102 : vector<2x32xf32>
    %105 = arith.divf %103, %104 : vector<2x32xf32>
    %106 = vector.extract_strided_slice %92 {offsets = [0, 32], sizes = [2, 32], strides = [1, 1]} : vector<2x128xf32> to vector<2x32xf32>
    %107 = arith.negf %106 : vector<2x32xf32>
    %108 = math.exp %107 : vector<2x32xf32>
    %cst_38 = arith.constant 1.000000e+00 : f32
    %109 = vector.broadcast %cst_38 : f32 to vector<2x32xf32>
    %110 = arith.addf %109, %108 : vector<2x32xf32>
    %111 = arith.divf %109, %110 : vector<2x32xf32>
    %112 = vector.extract_strided_slice %92 {offsets = [0, 64], sizes = [2, 32], strides = [1, 1]} : vector<2x128xf32> to vector<2x32xf32>
    %113 = math.tanh %112 : vector<2x32xf32>
    %114 = vector.extract_strided_slice %92 {offsets = [0, 96], sizes = [2, 32], strides = [1, 1]} : vector<2x128xf32> to vector<2x32xf32>
    %115 = arith.negf %114 : vector<2x32xf32>
    %116 = math.exp %115 : vector<2x32xf32>
    %cst_39 = arith.constant 1.000000e+00 : f32
    %117 = vector.broadcast %cst_39 : f32 to vector<2x32xf32>
    %118 = arith.addf %117, %116 : vector<2x32xf32>
    %119 = arith.divf %117, %118 : vector<2x32xf32>
    %120 = arith.mulf %111, %49 : vector<2x32xf32>
    %121 = arith.mulf %105, %113 : vector<2x32xf32>
    %122 = arith.addf %120, %121 : vector<2x32xf32>
    %123 = math.tanh %122 : vector<2x32xf32>
    %124 = arith.mulf %119, %123 : vector<2x32xf32>
    %125 = vector.extract_strided_slice %99 {offsets = [0, 0], sizes = [2, 32], strides = [1, 1]} : vector<2x128xf32> to vector<2x32xf32>
    %126 = arith.negf %125 : vector<2x32xf32>
    %127 = math.exp %126 : vector<2x32xf32>
    %cst_40 = arith.constant 1.000000e+00 : f32
    %128 = vector.broadcast %cst_40 : f32 to vector<2x32xf32>
    %129 = arith.addf %128, %127 : vector<2x32xf32>
    %130 = arith.divf %128, %129 : vector<2x32xf32>
    %131 = vector.extract_strided_slice %99 {offsets = [0, 32], sizes = [2, 32], strides = [1, 1]} : vector<2x128xf32> to vector<2x32xf32>
    %132 = arith.negf %131 : vector<2x32xf32>
    %133 = math.exp %132 : vector<2x32xf32>
    %cst_41 = arith.constant 1.000000e+00 : f32
    %134 = vector.broadcast %cst_41 : f32 to vector<2x32xf32>
    %135 = arith.addf %134, %133 : vector<2x32xf32>
    %136 = arith.divf %134, %135 : vector<2x32xf32>
    %137 = vector.extract_strided_slice %99 {offsets = [0, 64], sizes = [2, 32], strides = [1, 1]} : vector<2x128xf32> to vector<2x32xf32>
    %138 = math.tanh %137 : vector<2x32xf32>
    %139 = vector.extract_strided_slice %99 {offsets = [0, 96], sizes = [2, 32], strides = [1, 1]} : vector<2x128xf32> to vector<2x32xf32>
    %140 = arith.negf %139 : vector<2x32xf32>
    %141 = math.exp %140 : vector<2x32xf32>
    %cst_42 = arith.constant 1.000000e+00 : f32
    %142 = vector.broadcast %cst_42 : f32 to vector<2x32xf32>
    %143 = arith.addf %142, %141 : vector<2x32xf32>
    %144 = arith.divf %142, %143 : vector<2x32xf32>
    %145 = arith.mulf %136, %74 : vector<2x32xf32>
    %146 = arith.mulf %130, %138 : vector<2x32xf32>
    %147 = arith.addf %145, %146 : vector<2x32xf32>
    %148 = math.tanh %147 : vector<2x32xf32>
    %149 = arith.mulf %144, %148 : vector<2x32xf32>
    %150 = arith.index_cast %c1_i32 : i32 to index
    %c0_43 = arith.constant 0 : index
    %c0_44 = arith.constant 0 : index
    %151 = vector.load %arg13[%150, %c0_43, %c0_44] : memref<8x2x32xf32, #tpu.memory_space<vmem>>, vector<1x2x32xf32>
    %152 = vector.shape_cast %151 : vector<1x2x32xf32> to vector<2x32xf32>
    %153 = vector.shape_cast %124 : vector<2x32xf32> to vector<1x2x32xf32>
    tpu.vector_store %arg13[%150, %c0_43, %c0_44], %153 {strides = array<i32>} : memref<8x2x32xf32, #tpu.memory_space<vmem>>, vector<1x2x32xf32>,
    %154 = arith.index_cast %85 : i32 to index
    %c0_45 = arith.constant 0 : index
    %c0_46 = arith.constant 0 : index
    %155 = vector.load %arg14[%154, %c0_45, %c0_46] : memref<8x2x32xf32, #tpu.memory_space<vmem>>, vector<1x2x32xf32>
    %156 = vector.shape_cast %155 : vector<1x2x32xf32> to vector<2x32xf32>
    %157 = vector.shape_cast %149 : vector<2x32xf32> to vector<1x2x32xf32>
    tpu.vector_store %arg14[%154, %c0_45, %c0_46], %157 {strides = array<i32>} : memref<8x2x32xf32, #tpu.memory_space<vmem>>, vector<1x2x32xf32>,
    %c2_i32 = arith.constant 2 : i32
    %c7_i32_47 = arith.constant 7 : i32
    %158 = arith.subi %c7_i32_47, %c2_i32 : i32
    %159 = arith.index_cast %c2_i32 : i32 to index
    %c0_48 = arith.constant 0 : index
    %c0_49 = arith.constant 0 : index
    %160 = vector.load %arg12[%159, %c0_48, %c0_49] : memref<8x2x256xf32, #tpu.memory_space<vmem>>, vector<1x2x256xf32>
    %161 = vector.shape_cast %160 : vector<1x2x256xf32> to vector<2x256xf32>
    %162 = vector.extract_strided_slice %161 {offsets = [0, 0], sizes = [2, 128], strides = [1, 1]} : vector<2x256xf32> to vector<2x128xf32>
    %163 = arith.truncf %124 : vector<2x32xf32> to vector<2x32xbf16>
    %cst_50 = arith.constant dense<0.000000e+00> : vector<2x128xf32>
    %164 = tpu.matmul %163, %1, %cst_50 {dimension_numbers = #tpu.dot_dimension_numbers<[1], [0], [0], [1], [0, 0, 1, 1], [], []>} : vector<2x32xbf16>, vector<32x128xbf16>, vector<2x128xf32> -> vector<2x128xf32>
    %165 = arith.addf %162, %164 : vector<2x128xf32>
    %166 = arith.index_cast %158 : i32 to index
    %c0_51 = arith.constant 0 : index
    %c0_52 = arith.constant 0 : index
    %167 = vector.load %arg12[%166, %c0_51, %c0_52] : memref<8x2x256xf32, #tpu.memory_space<vmem>>, vector<1x2x256xf32>
    %168 = vector.shape_cast %167 : vector<1x2x256xf32> to vector<2x256xf32>
    %169 = vector.extract_strided_slice %168 {offsets = [0, 128], sizes = [2, 128], strides = [1, 1]} : vector<2x256xf32> to vector<2x128xf32>
    %170 = arith.truncf %149 : vector<2x32xf32> to vector<2x32xbf16>
    %cst_53 = arith.constant dense<0.000000e+00> : vector<2x128xf32>
    %171 = tpu.matmul %170, %2, %cst_53 {dimension_numbers = #tpu.dot_dimension_numbers<[1], [0], [0], [1], [0, 0, 1, 1], [], []>} : vector<2x32xbf16>, vector<32x128xbf16>, vector<2x128xf32> -> vector<2x128xf32>
    %172 = arith.addf %169, %171 : vector<2x128xf32>
    %173 = vector.extract_strided_slice %165 {offsets = [0, 0], sizes = [2, 32], strides = [1, 1]} : vector<2x128xf32> to vector<2x32xf32>
    %174 = arith.negf %173 : vector<2x32xf32>
    %175 = math.exp %174 : vector<2x32xf32>
    %cst_54 = arith.constant 1.000000e+00 : f32
    %176 = vector.broadcast %cst_54 : f32 to vector<2x32xf32>
    %177 = arith.addf %176, %175 : vector<2x32xf32>
    %178 = arith.divf %176, %177 : vector<2x32xf32>
    %179 = vector.extract_strided_slice %165 {offsets = [0, 32], sizes = [2, 32], strides = [1, 1]} : vector<2x128xf32> to vector<2x32xf32>
    %180 = arith.negf %179 : vector<2x32xf32>
    %181 = math.exp %180 : vector<2x32xf32>
    %cst_55 = arith.constant 1.000000e+00 : f32
    %182 = vector.broadcast %cst_55 : f32 to vector<2x32xf32>
    %183 = arith.addf %182, %181 : vector<2x32xf32>
    %184 = arith.divf %182, %183 : vector<2x32xf32>
    %185 = vector.extract_strided_slice %165 {offsets = [0, 64], sizes = [2, 32], strides = [1, 1]} : vector<2x128xf32> to vector<2x32xf32>
    %186 = math.tanh %185 : vector<2x32xf32>
    %187 = vector.extract_strided_slice %165 {offsets = [0, 96], sizes = [2, 32], strides = [1, 1]} : vector<2x128xf32> to vector<2x32xf32>
    %188 = arith.negf %187 : vector<2x32xf32>
    %189 = math.exp %188 : vector<2x32xf32>
    %cst_56 = arith.constant 1.000000e+00 : f32
    %190 = vector.broadcast %cst_56 : f32 to vector<2x32xf32>
    %191 = arith.addf %190, %189 : vector<2x32xf32>
    %192 = arith.divf %190, %191 : vector<2x32xf32>
    %193 = arith.mulf %184, %122 : vector<2x32xf32>
    %194 = arith.mulf %178, %186 : vector<2x32xf32>
    %195 = arith.addf %193, %194 : vector<2x32xf32>
    %196 = math.tanh %195 : vector<2x32xf32>
    %197 = arith.mulf %192, %196 : vector<2x32xf32>
    %198 = vector.extract_strided_slice %172 {offsets = [0, 0], sizes = [2, 32], strides = [1, 1]} : vector<2x128xf32> to vector<2x32xf32>
    %199 = arith.negf %198 : vector<2x32xf32>
    %200 = math.exp %199 : vector<2x32xf32>
    %cst_57 = arith.constant 1.000000e+00 : f32
    %201 = vector.broadcast %cst_57 : f32 to vector<2x32xf32>
    %202 = arith.addf %201, %200 : vector<2x32xf32>
    %203 = arith.divf %201, %202 : vector<2x32xf32>
    %204 = vector.extract_strided_slice %172 {offsets = [0, 32], sizes = [2, 32], strides = [1, 1]} : vector<2x128xf32> to vector<2x32xf32>
    %205 = arith.negf %204 : vector<2x32xf32>
    %206 = math.exp %205 : vector<2x32xf32>
    %cst_58 = arith.constant 1.000000e+00 : f32
    %207 = vector.broadcast %cst_58 : f32 to vector<2x32xf32>
    %208 = arith.addf %207, %206 : vector<2x32xf32>
    %209 = arith.divf %207, %208 : vector<2x32xf32>
    %210 = vector.extract_strided_slice %172 {offsets = [0, 64], sizes = [2, 32], strides = [1, 1]} : vector<2x128xf32> to vector<2x32xf32>
    %211 = math.tanh %210 : vector<2x32xf32>
    %212 = vector.extract_strided_slice %172 {offsets = [0, 96], sizes = [2, 32], strides = [1, 1]} : vector<2x128xf32> to vector<2x32xf32>
    %213 = arith.negf %212 : vector<2x32xf32>
    %214 = math.exp %213 : vector<2x32xf32>
    %cst_59 = arith.constant 1.000000e+00 : f32
    %215 = vector.broadcast %cst_59 : f32 to vector<2x32xf32>
    %216 = arith.addf %215, %214 : vector<2x32xf32>
    %217 = arith.divf %215, %216 : vector<2x32xf32>
    %218 = arith.mulf %209, %147 : vector<2x32xf32>
    %219 = arith.mulf %203, %211 : vector<2x32xf32>
    %220 = arith.addf %218, %219 : vector<2x32xf32>
    %221 = math.tanh %220 : vector<2x32xf32>
    %222 = arith.mulf %217, %221 : vector<2x32xf32>
    %223 = arith.index_cast %c2_i32 : i32 to index
    %c0_60 = arith.constant 0 : index
    %c0_61 = arith.constant 0 : index
    %224 = vector.load %arg13[%223, %c0_60, %c0_61] : memref<8x2x32xf32, #tpu.memory_space<vmem>>, vector<1x2x32xf32>
    %225 = vector.shape_cast %224 : vector<1x2x32xf32> to vector<2x32xf32>
    %226 = vector.shape_cast %197 : vector<2x32xf32> to vector<1x2x32xf32>
    tpu.vector_store %arg13[%223, %c0_60, %c0_61], %226 {strides = array<i32>} : memref<8x2x32xf32, #tpu.memory_space<vmem>>, vector<1x2x32xf32>,
    %227 = arith.index_cast %158 : i32 to index
    %c0_62 = arith.constant 0 : index
    %c0_63 = arith.constant 0 : index
    %228 = vector.load %arg14[%227, %c0_62, %c0_63] : memref<8x2x32xf32, #tpu.memory_space<vmem>>, vector<1x2x32xf32>
    %229 = vector.shape_cast %228 : vector<1x2x32xf32> to vector<2x32xf32>
    %230 = vector.shape_cast %222 : vector<2x32xf32> to vector<1x2x32xf32>
    tpu.vector_store %arg14[%227, %c0_62, %c0_63], %230 {strides = array<i32>} : memref<8x2x32xf32, #tpu.memory_space<vmem>>, vector<1x2x32xf32>,
    %c3_i32 = arith.constant 3 : i32
    %c7_i32_64 = arith.constant 7 : i32
    %231 = arith.subi %c7_i32_64, %c3_i32 : i32
    %232 = arith.index_cast %c3_i32 : i32 to index
    %c0_65 = arith.constant 0 : index
    %c0_66 = arith.constant 0 : index
    %233 = vector.load %arg12[%232, %c0_65, %c0_66] : memref<8x2x256xf32, #tpu.memory_space<vmem>>, vector<1x2x256xf32>
    %234 = vector.shape_cast %233 : vector<1x2x256xf32> to vector<2x256xf32>
    %235 = vector.extract_strided_slice %234 {offsets = [0, 0], sizes = [2, 128], strides = [1, 1]} : vector<2x256xf32> to vector<2x128xf32>
    %236 = arith.truncf %197 : vector<2x32xf32> to vector<2x32xbf16>
    %cst_67 = arith.constant dense<0.000000e+00> : vector<2x128xf32>
    %237 = tpu.matmul %236, %1, %cst_67 {dimension_numbers = #tpu.dot_dimension_numbers<[1], [0], [0], [1], [0, 0, 1, 1], [], []>} : vector<2x32xbf16>, vector<32x128xbf16>, vector<2x128xf32> -> vector<2x128xf32>
    %238 = arith.addf %235, %237 : vector<2x128xf32>
    %239 = arith.index_cast %231 : i32 to index
    %c0_68 = arith.constant 0 : index
    %c0_69 = arith.constant 0 : index
    %240 = vector.load %arg12[%239, %c0_68, %c0_69] : memref<8x2x256xf32, #tpu.memory_space<vmem>>, vector<1x2x256xf32>
    %241 = vector.shape_cast %240 : vector<1x2x256xf32> to vector<2x256xf32>
    %242 = vector.extract_strided_slice %241 {offsets = [0, 128], sizes = [2, 128], strides = [1, 1]} : vector<2x256xf32> to vector<2x128xf32>
    %243 = arith.truncf %222 : vector<2x32xf32> to vector<2x32xbf16>
    %cst_70 = arith.constant dense<0.000000e+00> : vector<2x128xf32>
    %244 = tpu.matmul %243, %2, %cst_70 {dimension_numbers = #tpu.dot_dimension_numbers<[1], [0], [0], [1], [0, 0, 1, 1], [], []>} : vector<2x32xbf16>, vector<32x128xbf16>, vector<2x128xf32> -> vector<2x128xf32>
    %245 = arith.addf %242, %244 : vector<2x128xf32>
    %246 = vector.extract_strided_slice %238 {offsets = [0, 0], sizes = [2, 32], strides = [1, 1]} : vector<2x128xf32> to vector<2x32xf32>
    %247 = arith.negf %246 : vector<2x32xf32>
    %248 = math.exp %247 : vector<2x32xf32>
    %cst_71 = arith.constant 1.000000e+00 : f32
    %249 = vector.broadcast %cst_71 : f32 to vector<2x32xf32>
    %250 = arith.addf %249, %248 : vector<2x32xf32>
    %251 = arith.divf %249, %250 : vector<2x32xf32>
    %252 = vector.extract_strided_slice %238 {offsets = [0, 32], sizes = [2, 32], strides = [1, 1]} : vector<2x128xf32> to vector<2x32xf32>
    %253 = arith.negf %252 : vector<2x32xf32>
    %254 = math.exp %253 : vector<2x32xf32>
    %cst_72 = arith.constant 1.000000e+00 : f32
    %255 = vector.broadcast %cst_72 : f32 to vector<2x32xf32>
    %256 = arith.addf %255, %254 : vector<2x32xf32>
    %257 = arith.divf %255, %256 : vector<2x32xf32>
    %258 = vector.extract_strided_slice %238 {offsets = [0, 64], sizes = [2, 32], strides = [1, 1]} : vector<2x128xf32> to vector<2x32xf32>
    %259 = math.tanh %258 : vector<2x32xf32>
    %260 = vector.extract_strided_slice %238 {offsets = [0, 96], sizes = [2, 32], strides = [1, 1]} : vector<2x128xf32> to vector<2x32xf32>
    %261 = arith.negf %260 : vector<2x32xf32>
    %262 = math.exp %261 : vector<2x32xf32>
    %cst_73 = arith.constant 1.000000e+00 : f32
    %263 = vector.broadcast %cst_73 : f32 to vector<2x32xf32>
    %264 = arith.addf %263, %262 : vector<2x32xf32>
    %265 = arith.divf %263, %264 : vector<2x32xf32>
    %266 = arith.mulf %257, %195 : vector<2x32xf32>
    %267 = arith.mulf %251, %259 : vector<2x32xf32>
    %268 = arith.addf %266, %267 : vector<2x32xf32>
    %269 = math.tanh %268 : vector<2x32xf32>
    %270 = arith.mulf %265, %269 : vector<2x32xf32>
    %271 = vector.extract_strided_slice %245 {offsets = [0, 0], sizes = [2, 32], strides = [1, 1]} : vector<2x128xf32> to vector<2x32xf32>
    %272 = arith.negf %271 : vector<2x32xf32>
    %273 = math.exp %272 : vector<2x32xf32>
    %cst_74 = arith.constant 1.000000e+00 : f32
    %274 = vector.broadcast %cst_74 : f32 to vector<2x32xf32>
    %275 = arith.addf %274, %273 : vector<2x32xf32>
    %276 = arith.divf %274, %275 : vector<2x32xf32>
    %277 = vector.extract_strided_slice %245 {offsets = [0, 32], sizes = [2, 32], strides = [1, 1]} : vector<2x128xf32> to vector<2x32xf32>
    %278 = arith.negf %277 : vector<2x32xf32>
    %279 = math.exp %278 : vector<2x32xf32>
    %cst_75 = arith.constant 1.000000e+00 : f32
    %280 = vector.broadcast %cst_75 : f32 to vector<2x32xf32>
    %281 = arith.addf %280, %279 : vector<2x32xf32>
    %282 = arith.divf %280, %281 : vector<2x32xf32>
    %283 = vector.extract_strided_slice %245 {offsets = [0, 64], sizes = [2, 32], strides = [1, 1]} : vector<2x128xf32> to vector<2x32xf32>
    %284 = math.tanh %283 : vector<2x32xf32>
    %285 = vector.extract_strided_slice %245 {offsets = [0, 96], sizes = [2, 32], strides = [1, 1]} : vector<2x128xf32> to vector<2x32xf32>
    %286 = arith.negf %285 : vector<2x32xf32>
    %287 = math.exp %286 : vector<2x32xf32>
    %cst_76 = arith.constant 1.000000e+00 : f32
    %288 = vector.broadcast %cst_76 : f32 to vector<2x32xf32>
    %289 = arith.addf %288, %287 : vector<2x32xf32>
    %290 = arith.divf %288, %289 : vector<2x32xf32>
    %291 = arith.mulf %282, %220 : vector<2x32xf32>
    %292 = arith.mulf %276, %284 : vector<2x32xf32>
    %293 = arith.addf %291, %292 : vector<2x32xf32>
    %294 = math.tanh %293 : vector<2x32xf32>
    %295 = arith.mulf %290, %294 : vector<2x32xf32>
    %296 = arith.index_cast %c3_i32 : i32 to index
    %c0_77 = arith.constant 0 : index
    %c0_78 = arith.constant 0 : index
    %297 = vector.load %arg13[%296, %c0_77, %c0_78] : memref<8x2x32xf32, #tpu.memory_space<vmem>>, vector<1x2x32xf32>
    %298 = vector.shape_cast %297 : vector<1x2x32xf32> to vector<2x32xf32>
    %299 = vector.shape_cast %270 : vector<2x32xf32> to vector<1x2x32xf32>
    tpu.vector_store %arg13[%296, %c0_77, %c0_78], %299 {strides = array<i32>} : memref<8x2x32xf32, #tpu.memory_space<vmem>>, vector<1x2x32xf32>,
    %300 = arith.index_cast %231 : i32 to index
    %c0_79 = arith.constant 0 : index
    %c0_80 = arith.constant 0 : index
    %301 = vector.load %arg14[%300, %c0_79, %c0_80] : memref<8x2x32xf32, #tpu.memory_space<vmem>>, vector<1x2x32xf32>
    %302 = vector.shape_cast %301 : vector<1x2x32xf32> to vector<2x32xf32>
    %303 = vector.shape_cast %295 : vector<2x32xf32> to vector<1x2x32xf32>
    tpu.vector_store %arg14[%300, %c0_79, %c0_80], %303 {strides = array<i32>} : memref<8x2x32xf32, #tpu.memory_space<vmem>>, vector<1x2x32xf32>,
    %c4_i32 = arith.constant 4 : i32
    %c7_i32_81 = arith.constant 7 : i32
    %304 = arith.subi %c7_i32_81, %c4_i32 : i32
    %305 = arith.index_cast %c4_i32 : i32 to index
    %c0_82 = arith.constant 0 : index
    %c0_83 = arith.constant 0 : index
    %306 = vector.load %arg12[%305, %c0_82, %c0_83] : memref<8x2x256xf32, #tpu.memory_space<vmem>>, vector<1x2x256xf32>
    %307 = vector.shape_cast %306 : vector<1x2x256xf32> to vector<2x256xf32>
    %308 = vector.extract_strided_slice %307 {offsets = [0, 0], sizes = [2, 128], strides = [1, 1]} : vector<2x256xf32> to vector<2x128xf32>
    %309 = arith.truncf %270 : vector<2x32xf32> to vector<2x32xbf16>
    %cst_84 = arith.constant dense<0.000000e+00> : vector<2x128xf32>
    %310 = tpu.matmul %309, %1, %cst_84 {dimension_numbers = #tpu.dot_dimension_numbers<[1], [0], [0], [1], [0, 0, 1, 1], [], []>} : vector<2x32xbf16>, vector<32x128xbf16>, vector<2x128xf32> -> vector<2x128xf32>
    %311 = arith.addf %308, %310 : vector<2x128xf32>
    %312 = arith.index_cast %304 : i32 to index
    %c0_85 = arith.constant 0 : index
    %c0_86 = arith.constant 0 : index
    %313 = vector.load %arg12[%312, %c0_85, %c0_86] : memref<8x2x256xf32, #tpu.memory_space<vmem>>, vector<1x2x256xf32>
    %314 = vector.shape_cast %313 : vector<1x2x256xf32> to vector<2x256xf32>
    %315 = vector.extract_strided_slice %314 {offsets = [0, 128], sizes = [2, 128], strides = [1, 1]} : vector<2x256xf32> to vector<2x128xf32>
    %316 = arith.truncf %295 : vector<2x32xf32> to vector<2x32xbf16>
    %cst_87 = arith.constant dense<0.000000e+00> : vector<2x128xf32>
    %317 = tpu.matmul %316, %2, %cst_87 {dimension_numbers = #tpu.dot_dimension_numbers<[1], [0], [0], [1], [0, 0, 1, 1], [], []>} : vector<2x32xbf16>, vector<32x128xbf16>, vector<2x128xf32> -> vector<2x128xf32>
    %318 = arith.addf %315, %317 : vector<2x128xf32>
    %319 = vector.extract_strided_slice %311 {offsets = [0, 0], sizes = [2, 32], strides = [1, 1]} : vector<2x128xf32> to vector<2x32xf32>
    %320 = arith.negf %319 : vector<2x32xf32>
    %321 = math.exp %320 : vector<2x32xf32>
    %cst_88 = arith.constant 1.000000e+00 : f32
    %322 = vector.broadcast %cst_88 : f32 to vector<2x32xf32>
    %323 = arith.addf %322, %321 : vector<2x32xf32>
    %324 = arith.divf %322, %323 : vector<2x32xf32>
    %325 = vector.extract_strided_slice %311 {offsets = [0, 32], sizes = [2, 32], strides = [1, 1]} : vector<2x128xf32> to vector<2x32xf32>
    %326 = arith.negf %325 : vector<2x32xf32>
    %327 = math.exp %326 : vector<2x32xf32>
    %cst_89 = arith.constant 1.000000e+00 : f32
    %328 = vector.broadcast %cst_89 : f32 to vector<2x32xf32>
    %329 = arith.addf %328, %327 : vector<2x32xf32>
    %330 = arith.divf %328, %329 : vector<2x32xf32>
    %331 = vector.extract_strided_slice %311 {offsets = [0, 64], sizes = [2, 32], strides = [1, 1]} : vector<2x128xf32> to vector<2x32xf32>
    %332 = math.tanh %331 : vector<2x32xf32>
    %333 = vector.extract_strided_slice %311 {offsets = [0, 96], sizes = [2, 32], strides = [1, 1]} : vector<2x128xf32> to vector<2x32xf32>
    %334 = arith.negf %333 : vector<2x32xf32>
    %335 = math.exp %334 : vector<2x32xf32>
    %cst_90 = arith.constant 1.000000e+00 : f32
    %336 = vector.broadcast %cst_90 : f32 to vector<2x32xf32>
    %337 = arith.addf %336, %335 : vector<2x32xf32>
    %338 = arith.divf %336, %337 : vector<2x32xf32>
    %339 = arith.mulf %330, %268 : vector<2x32xf32>
    %340 = arith.mulf %324, %332 : vector<2x32xf32>
    %341 = arith.addf %339, %340 : vector<2x32xf32>
    %342 = math.tanh %341 : vector<2x32xf32>
    %343 = arith.mulf %338, %342 : vector<2x32xf32>
    %344 = vector.extract_strided_slice %318 {offsets = [0, 0], sizes = [2, 32], strides = [1, 1]} : vector<2x128xf32> to vector<2x32xf32>
    %345 = arith.negf %344 : vector<2x32xf32>
    %346 = math.exp %345 : vector<2x32xf32>
    %cst_91 = arith.constant 1.000000e+00 : f32
    %347 = vector.broadcast %cst_91 : f32 to vector<2x32xf32>
    %348 = arith.addf %347, %346 : vector<2x32xf32>
    %349 = arith.divf %347, %348 : vector<2x32xf32>
    %350 = vector.extract_strided_slice %318 {offsets = [0, 32], sizes = [2, 32], strides = [1, 1]} : vector<2x128xf32> to vector<2x32xf32>
    %351 = arith.negf %350 : vector<2x32xf32>
    %352 = math.exp %351 : vector<2x32xf32>
    %cst_92 = arith.constant 1.000000e+00 : f32
    %353 = vector.broadcast %cst_92 : f32 to vector<2x32xf32>
    %354 = arith.addf %353, %352 : vector<2x32xf32>
    %355 = arith.divf %353, %354 : vector<2x32xf32>
    %356 = vector.extract_strided_slice %318 {offsets = [0, 64], sizes = [2, 32], strides = [1, 1]} : vector<2x128xf32> to vector<2x32xf32>
    %357 = math.tanh %356 : vector<2x32xf32>
    %358 = vector.extract_strided_slice %318 {offsets = [0, 96], sizes = [2, 32], strides = [1, 1]} : vector<2x128xf32> to vector<2x32xf32>
    %359 = arith.negf %358 : vector<2x32xf32>
    %360 = math.exp %359 : vector<2x32xf32>
    %cst_93 = arith.constant 1.000000e+00 : f32
    %361 = vector.broadcast %cst_93 : f32 to vector<2x32xf32>
    %362 = arith.addf %361, %360 : vector<2x32xf32>
    %363 = arith.divf %361, %362 : vector<2x32xf32>
    %364 = arith.mulf %355, %293 : vector<2x32xf32>
    %365 = arith.mulf %349, %357 : vector<2x32xf32>
    %366 = arith.addf %364, %365 : vector<2x32xf32>
    %367 = math.tanh %366 : vector<2x32xf32>
    %368 = arith.mulf %363, %367 : vector<2x32xf32>
    %369 = arith.index_cast %c4_i32 : i32 to index
    %c0_94 = arith.constant 0 : index
    %c0_95 = arith.constant 0 : index
    %370 = vector.load %arg13[%369, %c0_94, %c0_95] : memref<8x2x32xf32, #tpu.memory_space<vmem>>, vector<1x2x32xf32>
    %371 = vector.shape_cast %370 : vector<1x2x32xf32> to vector<2x32xf32>
    %372 = vector.shape_cast %343 : vector<2x32xf32> to vector<1x2x32xf32>
    tpu.vector_store %arg13[%369, %c0_94, %c0_95], %372 {strides = array<i32>} : memref<8x2x32xf32, #tpu.memory_space<vmem>>, vector<1x2x32xf32>,
    %373 = arith.index_cast %304 : i32 to index
    %c0_96 = arith.constant 0 : index
    %c0_97 = arith.constant 0 : index
    %374 = vector.load %arg14[%373, %c0_96, %c0_97] : memref<8x2x32xf32, #tpu.memory_space<vmem>>, vector<1x2x32xf32>
    %375 = vector.shape_cast %374 : vector<1x2x32xf32> to vector<2x32xf32>
    %376 = vector.shape_cast %368 : vector<2x32xf32> to vector<1x2x32xf32>
    tpu.vector_store %arg14[%373, %c0_96, %c0_97], %376 {strides = array<i32>} : memref<8x2x32xf32, #tpu.memory_space<vmem>>, vector<1x2x32xf32>,
    %c5_i32 = arith.constant 5 : i32
    %c7_i32_98 = arith.constant 7 : i32
    %377 = arith.subi %c7_i32_98, %c5_i32 : i32
    %378 = arith.index_cast %c5_i32 : i32 to index
    %c0_99 = arith.constant 0 : index
    %c0_100 = arith.constant 0 : index
    %379 = vector.load %arg12[%378, %c0_99, %c0_100] : memref<8x2x256xf32, #tpu.memory_space<vmem>>, vector<1x2x256xf32>
    %380 = vector.shape_cast %379 : vector<1x2x256xf32> to vector<2x256xf32>
    %381 = vector.extract_strided_slice %380 {offsets = [0, 0], sizes = [2, 128], strides = [1, 1]} : vector<2x256xf32> to vector<2x128xf32>
    %382 = arith.truncf %343 : vector<2x32xf32> to vector<2x32xbf16>
    %cst_101 = arith.constant dense<0.000000e+00> : vector<2x128xf32>
    %383 = tpu.matmul %382, %1, %cst_101 {dimension_numbers = #tpu.dot_dimension_numbers<[1], [0], [0], [1], [0, 0, 1, 1], [], []>} : vector<2x32xbf16>, vector<32x128xbf16>, vector<2x128xf32> -> vector<2x128xf32>
    %384 = arith.addf %381, %383 : vector<2x128xf32>
    %385 = arith.index_cast %377 : i32 to index
    %c0_102 = arith.constant 0 : index
    %c0_103 = arith.constant 0 : index
    %386 = vector.load %arg12[%385, %c0_102, %c0_103] : memref<8x2x256xf32, #tpu.memory_space<vmem>>, vector<1x2x256xf32>
    %387 = vector.shape_cast %386 : vector<1x2x256xf32> to vector<2x256xf32>
    %388 = vector.extract_strided_slice %387 {offsets = [0, 128], sizes = [2, 128], strides = [1, 1]} : vector<2x256xf32> to vector<2x128xf32>
    %389 = arith.truncf %368 : vector<2x32xf32> to vector<2x32xbf16>
    %cst_104 = arith.constant dense<0.000000e+00> : vector<2x128xf32>
    %390 = tpu.matmul %389, %2, %cst_104 {dimension_numbers = #tpu.dot_dimension_numbers<[1], [0], [0], [1], [0, 0, 1, 1], [], []>} : vector<2x32xbf16>, vector<32x128xbf16>, vector<2x128xf32> -> vector<2x128xf32>
    %391 = arith.addf %388, %390 : vector<2x128xf32>
    %392 = vector.extract_strided_slice %384 {offsets = [0, 0], sizes = [2, 32], strides = [1, 1]} : vector<2x128xf32> to vector<2x32xf32>
    %393 = arith.negf %392 : vector<2x32xf32>
    %394 = math.exp %393 : vector<2x32xf32>
    %cst_105 = arith.constant 1.000000e+00 : f32
    %395 = vector.broadcast %cst_105 : f32 to vector<2x32xf32>
    %396 = arith.addf %395, %394 : vector<2x32xf32>
    %397 = arith.divf %395, %396 : vector<2x32xf32>
    %398 = vector.extract_strided_slice %384 {offsets = [0, 32], sizes = [2, 32], strides = [1, 1]} : vector<2x128xf32> to vector<2x32xf32>
    %399 = arith.negf %398 : vector<2x32xf32>
    %400 = math.exp %399 : vector<2x32xf32>
    %cst_106 = arith.constant 1.000000e+00 : f32
    %401 = vector.broadcast %cst_106 : f32 to vector<2x32xf32>
    %402 = arith.addf %401, %400 : vector<2x32xf32>
    %403 = arith.divf %401, %402 : vector<2x32xf32>
    %404 = vector.extract_strided_slice %384 {offsets = [0, 64], sizes = [2, 32], strides = [1, 1]} : vector<2x128xf32> to vector<2x32xf32>
    %405 = math.tanh %404 : vector<2x32xf32>
    %406 = vector.extract_strided_slice %384 {offsets = [0, 96], sizes = [2, 32], strides = [1, 1]} : vector<2x128xf32> to vector<2x32xf32>
    %407 = arith.negf %406 : vector<2x32xf32>
    %408 = math.exp %407 : vector<2x32xf32>
    %cst_107 = arith.constant 1.000000e+00 : f32
    %409 = vector.broadcast %cst_107 : f32 to vector<2x32xf32>
    %410 = arith.addf %409, %408 : vector<2x32xf32>
    %411 = arith.divf %409, %410 : vector<2x32xf32>
    %412 = arith.mulf %403, %341 : vector<2x32xf32>
    %413 = arith.mulf %397, %405 : vector<2x32xf32>
    %414 = arith.addf %412, %413 : vector<2x32xf32>
    %415 = math.tanh %414 : vector<2x32xf32>
    %416 = arith.mulf %411, %415 : vector<2x32xf32>
    %417 = vector.extract_strided_slice %391 {offsets = [0, 0], sizes = [2, 32], strides = [1, 1]} : vector<2x128xf32> to vector<2x32xf32>
    %418 = arith.negf %417 : vector<2x32xf32>
    %419 = math.exp %418 : vector<2x32xf32>
    %cst_108 = arith.constant 1.000000e+00 : f32
    %420 = vector.broadcast %cst_108 : f32 to vector<2x32xf32>
    %421 = arith.addf %420, %419 : vector<2x32xf32>
    %422 = arith.divf %420, %421 : vector<2x32xf32>
    %423 = vector.extract_strided_slice %391 {offsets = [0, 32], sizes = [2, 32], strides = [1, 1]} : vector<2x128xf32> to vector<2x32xf32>
    %424 = arith.negf %423 : vector<2x32xf32>
    %425 = math.exp %424 : vector<2x32xf32>
    %cst_109 = arith.constant 1.000000e+00 : f32
    %426 = vector.broadcast %cst_109 : f32 to vector<2x32xf32>
    %427 = arith.addf %426, %425 : vector<2x32xf32>
    %428 = arith.divf %426, %427 : vector<2x32xf32>
    %429 = vector.extract_strided_slice %391 {offsets = [0, 64], sizes = [2, 32], strides = [1, 1]} : vector<2x128xf32> to vector<2x32xf32>
    %430 = math.tanh %429 : vector<2x32xf32>
    %431 = vector.extract_strided_slice %391 {offsets = [0, 96], sizes = [2, 32], strides = [1, 1]} : vector<2x128xf32> to vector<2x32xf32>
    %432 = arith.negf %431 : vector<2x32xf32>
    %433 = math.exp %432 : vector<2x32xf32>
    %cst_110 = arith.constant 1.000000e+00 : f32
    %434 = vector.broadcast %cst_110 : f32 to vector<2x32xf32>
    %435 = arith.addf %434, %433 : vector<2x32xf32>
    %436 = arith.divf %434, %435 : vector<2x32xf32>
    %437 = arith.mulf %428, %366 : vector<2x32xf32>
    %438 = arith.mulf %422, %430 : vector<2x32xf32>
    %439 = arith.addf %437, %438 : vector<2x32xf32>
    %440 = math.tanh %439 : vector<2x32xf32>
    %441 = arith.mulf %436, %440 : vector<2x32xf32>
    %442 = arith.index_cast %c5_i32 : i32 to index
    %c0_111 = arith.constant 0 : index
    %c0_112 = arith.constant 0 : index
    %443 = vector.load %arg13[%442, %c0_111, %c0_112] : memref<8x2x32xf32, #tpu.memory_space<vmem>>, vector<1x2x32xf32>
    %444 = vector.shape_cast %443 : vector<1x2x32xf32> to vector<2x32xf32>
    %445 = vector.shape_cast %416 : vector<2x32xf32> to vector<1x2x32xf32>
    tpu.vector_store %arg13[%442, %c0_111, %c0_112], %445 {strides = array<i32>} : memref<8x2x32xf32, #tpu.memory_space<vmem>>, vector<1x2x32xf32>,
    %446 = arith.index_cast %377 : i32 to index
    %c0_113 = arith.constant 0 : index
    %c0_114 = arith.constant 0 : index
    %447 = vector.load %arg14[%446, %c0_113, %c0_114] : memref<8x2x32xf32, #tpu.memory_space<vmem>>, vector<1x2x32xf32>
    %448 = vector.shape_cast %447 : vector<1x2x32xf32> to vector<2x32xf32>
    %449 = vector.shape_cast %441 : vector<2x32xf32> to vector<1x2x32xf32>
    tpu.vector_store %arg14[%446, %c0_113, %c0_114], %449 {strides = array<i32>} : memref<8x2x32xf32, #tpu.memory_space<vmem>>, vector<1x2x32xf32>,
    %c6_i32 = arith.constant 6 : i32
    %c7_i32_115 = arith.constant 7 : i32
    %450 = arith.subi %c7_i32_115, %c6_i32 : i32
    %451 = arith.index_cast %c6_i32 : i32 to index
    %c0_116 = arith.constant 0 : index
    %c0_117 = arith.constant 0 : index
    %452 = vector.load %arg12[%451, %c0_116, %c0_117] : memref<8x2x256xf32, #tpu.memory_space<vmem>>, vector<1x2x256xf32>
    %453 = vector.shape_cast %452 : vector<1x2x256xf32> to vector<2x256xf32>
    %454 = vector.extract_strided_slice %453 {offsets = [0, 0], sizes = [2, 128], strides = [1, 1]} : vector<2x256xf32> to vector<2x128xf32>
    %455 = arith.truncf %416 : vector<2x32xf32> to vector<2x32xbf16>
    %cst_118 = arith.constant dense<0.000000e+00> : vector<2x128xf32>
    %456 = tpu.matmul %455, %1, %cst_118 {dimension_numbers = #tpu.dot_dimension_numbers<[1], [0], [0], [1], [0, 0, 1, 1], [], []>} : vector<2x32xbf16>, vector<32x128xbf16>, vector<2x128xf32> -> vector<2x128xf32>
    %457 = arith.addf %454, %456 : vector<2x128xf32>
    %458 = arith.index_cast %450 : i32 to index
    %c0_119 = arith.constant 0 : index
    %c0_120 = arith.constant 0 : index
    %459 = vector.load %arg12[%458, %c0_119, %c0_120] : memref<8x2x256xf32, #tpu.memory_space<vmem>>, vector<1x2x256xf32>
    %460 = vector.shape_cast %459 : vector<1x2x256xf32> to vector<2x256xf32>
    %461 = vector.extract_strided_slice %460 {offsets = [0, 128], sizes = [2, 128], strides = [1, 1]} : vector<2x256xf32> to vector<2x128xf32>
    %462 = arith.truncf %441 : vector<2x32xf32> to vector<2x32xbf16>
    %cst_121 = arith.constant dense<0.000000e+00> : vector<2x128xf32>
    %463 = tpu.matmul %462, %2, %cst_121 {dimension_numbers = #tpu.dot_dimension_numbers<[1], [0], [0], [1], [0, 0, 1, 1], [], []>} : vector<2x32xbf16>, vector<32x128xbf16>, vector<2x128xf32> -> vector<2x128xf32>
    %464 = arith.addf %461, %463 : vector<2x128xf32>
    %465 = vector.extract_strided_slice %457 {offsets = [0, 0], sizes = [2, 32], strides = [1, 1]} : vector<2x128xf32> to vector<2x32xf32>
    %466 = arith.negf %465 : vector<2x32xf32>
    %467 = math.exp %466 : vector<2x32xf32>
    %cst_122 = arith.constant 1.000000e+00 : f32
    %468 = vector.broadcast %cst_122 : f32 to vector<2x32xf32>
    %469 = arith.addf %468, %467 : vector<2x32xf32>
    %470 = arith.divf %468, %469 : vector<2x32xf32>
    %471 = vector.extract_strided_slice %457 {offsets = [0, 32], sizes = [2, 32], strides = [1, 1]} : vector<2x128xf32> to vector<2x32xf32>
    %472 = arith.negf %471 : vector<2x32xf32>
    %473 = math.exp %472 : vector<2x32xf32>
    %cst_123 = arith.constant 1.000000e+00 : f32
    %474 = vector.broadcast %cst_123 : f32 to vector<2x32xf32>
    %475 = arith.addf %474, %473 : vector<2x32xf32>
    %476 = arith.divf %474, %475 : vector<2x32xf32>
    %477 = vector.extract_strided_slice %457 {offsets = [0, 64], sizes = [2, 32], strides = [1, 1]} : vector<2x128xf32> to vector<2x32xf32>
    %478 = math.tanh %477 : vector<2x32xf32>
    %479 = vector.extract_strided_slice %457 {offsets = [0, 96], sizes = [2, 32], strides = [1, 1]} : vector<2x128xf32> to vector<2x32xf32>
    %480 = arith.negf %479 : vector<2x32xf32>
    %481 = math.exp %480 : vector<2x32xf32>
    %cst_124 = arith.constant 1.000000e+00 : f32
    %482 = vector.broadcast %cst_124 : f32 to vector<2x32xf32>
    %483 = arith.addf %482, %481 : vector<2x32xf32>
    %484 = arith.divf %482, %483 : vector<2x32xf32>
    %485 = arith.mulf %476, %414 : vector<2x32xf32>
    %486 = arith.mulf %470, %478 : vector<2x32xf32>
    %487 = arith.addf %485, %486 : vector<2x32xf32>
    %488 = math.tanh %487 : vector<2x32xf32>
    %489 = arith.mulf %484, %488 : vector<2x32xf32>
    %490 = vector.extract_strided_slice %464 {offsets = [0, 0], sizes = [2, 32], strides = [1, 1]} : vector<2x128xf32> to vector<2x32xf32>
    %491 = arith.negf %490 : vector<2x32xf32>
    %492 = math.exp %491 : vector<2x32xf32>
    %cst_125 = arith.constant 1.000000e+00 : f32
    %493 = vector.broadcast %cst_125 : f32 to vector<2x32xf32>
    %494 = arith.addf %493, %492 : vector<2x32xf32>
    %495 = arith.divf %493, %494 : vector<2x32xf32>
    %496 = vector.extract_strided_slice %464 {offsets = [0, 32], sizes = [2, 32], strides = [1, 1]} : vector<2x128xf32> to vector<2x32xf32>
    %497 = arith.negf %496 : vector<2x32xf32>
    %498 = math.exp %497 : vector<2x32xf32>
    %cst_126 = arith.constant 1.000000e+00 : f32
    %499 = vector.broadcast %cst_126 : f32 to vector<2x32xf32>
    %500 = arith.addf %499, %498 : vector<2x32xf32>
    %501 = arith.divf %499, %500 : vector<2x32xf32>
    %502 = vector.extract_strided_slice %464 {offsets = [0, 64], sizes = [2, 32], strides = [1, 1]} : vector<2x128xf32> to vector<2x32xf32>
    %503 = math.tanh %502 : vector<2x32xf32>
    %504 = vector.extract_strided_slice %464 {offsets = [0, 96], sizes = [2, 32], strides = [1, 1]} : vector<2x128xf32> to vector<2x32xf32>
    %505 = arith.negf %504 : vector<2x32xf32>
    %506 = math.exp %505 : vector<2x32xf32>
    %cst_127 = arith.constant 1.000000e+00 : f32
    %507 = vector.broadcast %cst_127 : f32 to vector<2x32xf32>
    %508 = arith.addf %507, %506 : vector<2x32xf32>
    %509 = arith.divf %507, %508 : vector<2x32xf32>
    %510 = arith.mulf %501, %439 : vector<2x32xf32>
    %511 = arith.mulf %495, %503 : vector<2x32xf32>
    %512 = arith.addf %510, %511 : vector<2x32xf32>
    %513 = math.tanh %512 : vector<2x32xf32>
    %514 = arith.mulf %509, %513 : vector<2x32xf32>
    %515 = arith.index_cast %c6_i32 : i32 to index
    %c0_128 = arith.constant 0 : index
    %c0_129 = arith.constant 0 : index
    %516 = vector.load %arg13[%515, %c0_128, %c0_129] : memref<8x2x32xf32, #tpu.memory_space<vmem>>, vector<1x2x32xf32>
    %517 = vector.shape_cast %516 : vector<1x2x32xf32> to vector<2x32xf32>
    %518 = vector.shape_cast %489 : vector<2x32xf32> to vector<1x2x32xf32>
    tpu.vector_store %arg13[%515, %c0_128, %c0_129], %518 {strides = array<i32>} : memref<8x2x32xf32, #tpu.memory_space<vmem>>, vector<1x2x32xf32>,
    %519 = arith.index_cast %450 : i32 to index
    %c0_130 = arith.constant 0 : index
    %c0_131 = arith.constant 0 : index
    %520 = vector.load %arg14[%519, %c0_130, %c0_131] : memref<8x2x32xf32, #tpu.memory_space<vmem>>, vector<1x2x32xf32>
    %521 = vector.shape_cast %520 : vector<1x2x32xf32> to vector<2x32xf32>
    %522 = vector.shape_cast %514 : vector<2x32xf32> to vector<1x2x32xf32>
    tpu.vector_store %arg14[%519, %c0_130, %c0_131], %522 {strides = array<i32>} : memref<8x2x32xf32, #tpu.memory_space<vmem>>, vector<1x2x32xf32>,
    %c7_i32_132 = arith.constant 7 : i32
    %c7_i32_133 = arith.constant 7 : i32
    %523 = arith.subi %c7_i32_133, %c7_i32_132 : i32
    %524 = arith.index_cast %c7_i32_132 : i32 to index
    %c0_134 = arith.constant 0 : index
    %c0_135 = arith.constant 0 : index
    %525 = vector.load %arg12[%524, %c0_134, %c0_135] : memref<8x2x256xf32, #tpu.memory_space<vmem>>, vector<1x2x256xf32>
    %526 = vector.shape_cast %525 : vector<1x2x256xf32> to vector<2x256xf32>
    %527 = vector.extract_strided_slice %526 {offsets = [0, 0], sizes = [2, 128], strides = [1, 1]} : vector<2x256xf32> to vector<2x128xf32>
    %528 = arith.truncf %489 : vector<2x32xf32> to vector<2x32xbf16>
    %cst_136 = arith.constant dense<0.000000e+00> : vector<2x128xf32>
    %529 = tpu.matmul %528, %1, %cst_136 {dimension_numbers = #tpu.dot_dimension_numbers<[1], [0], [0], [1], [0, 0, 1, 1], [], []>} : vector<2x32xbf16>, vector<32x128xbf16>, vector<2x128xf32> -> vector<2x128xf32>
    %530 = arith.addf %527, %529 : vector<2x128xf32>
    %531 = arith.index_cast %523 : i32 to index
    %c0_137 = arith.constant 0 : index
    %c0_138 = arith.constant 0 : index
    %532 = vector.load %arg12[%531, %c0_137, %c0_138] : memref<8x2x256xf32, #tpu.memory_space<vmem>>, vector<1x2x256xf32>
    %533 = vector.shape_cast %532 : vector<1x2x256xf32> to vector<2x256xf32>
    %534 = vector.extract_strided_slice %533 {offsets = [0, 128], sizes = [2, 128], strides = [1, 1]} : vector<2x256xf32> to vector<2x128xf32>
    %535 = arith.truncf %514 : vector<2x32xf32> to vector<2x32xbf16>
    %cst_139 = arith.constant dense<0.000000e+00> : vector<2x128xf32>
    %536 = tpu.matmul %535, %2, %cst_139 {dimension_numbers = #tpu.dot_dimension_numbers<[1], [0], [0], [1], [0, 0, 1, 1], [], []>} : vector<2x32xbf16>, vector<32x128xbf16>, vector<2x128xf32> -> vector<2x128xf32>
    %537 = arith.addf %534, %536 : vector<2x128xf32>
    %538 = vector.extract_strided_slice %530 {offsets = [0, 0], sizes = [2, 32], strides = [1, 1]} : vector<2x128xf32> to vector<2x32xf32>
    %539 = arith.negf %538 : vector<2x32xf32>
    %540 = math.exp %539 : vector<2x32xf32>
    %cst_140 = arith.constant 1.000000e+00 : f32
    %541 = vector.broadcast %cst_140 : f32 to vector<2x32xf32>
    %542 = arith.addf %541, %540 : vector<2x32xf32>
    %543 = arith.divf %541, %542 : vector<2x32xf32>
    %544 = vector.extract_strided_slice %530 {offsets = [0, 32], sizes = [2, 32], strides = [1, 1]} : vector<2x128xf32> to vector<2x32xf32>
    %545 = arith.negf %544 : vector<2x32xf32>
    %546 = math.exp %545 : vector<2x32xf32>
    %cst_141 = arith.constant 1.000000e+00 : f32
    %547 = vector.broadcast %cst_141 : f32 to vector<2x32xf32>
    %548 = arith.addf %547, %546 : vector<2x32xf32>
    %549 = arith.divf %547, %548 : vector<2x32xf32>
    %550 = vector.extract_strided_slice %530 {offsets = [0, 64], sizes = [2, 32], strides = [1, 1]} : vector<2x128xf32> to vector<2x32xf32>
    %551 = math.tanh %550 : vector<2x32xf32>
    %552 = vector.extract_strided_slice %530 {offsets = [0, 96], sizes = [2, 32], strides = [1, 1]} : vector<2x128xf32> to vector<2x32xf32>
    %553 = arith.negf %552 : vector<2x32xf32>
    %554 = math.exp %553 : vector<2x32xf32>
    %cst_142 = arith.constant 1.000000e+00 : f32
    %555 = vector.broadcast %cst_142 : f32 to vector<2x32xf32>
    %556 = arith.addf %555, %554 : vector<2x32xf32>
    %557 = arith.divf %555, %556 : vector<2x32xf32>
    %558 = arith.mulf %549, %487 : vector<2x32xf32>
    %559 = arith.mulf %543, %551 : vector<2x32xf32>
    %560 = arith.addf %558, %559 : vector<2x32xf32>
    %561 = math.tanh %560 : vector<2x32xf32>
    %562 = arith.mulf %557, %561 : vector<2x32xf32>
    %563 = vector.extract_strided_slice %537 {offsets = [0, 0], sizes = [2, 32], strides = [1, 1]} : vector<2x128xf32> to vector<2x32xf32>
    %564 = arith.negf %563 : vector<2x32xf32>
    %565 = math.exp %564 : vector<2x32xf32>
    %cst_143 = arith.constant 1.000000e+00 : f32
    %566 = vector.broadcast %cst_143 : f32 to vector<2x32xf32>
    %567 = arith.addf %566, %565 : vector<2x32xf32>
    %568 = arith.divf %566, %567 : vector<2x32xf32>
    %569 = vector.extract_strided_slice %537 {offsets = [0, 32], sizes = [2, 32], strides = [1, 1]} : vector<2x128xf32> to vector<2x32xf32>
    %570 = arith.negf %569 : vector<2x32xf32>
    %571 = math.exp %570 : vector<2x32xf32>
    %cst_144 = arith.constant 1.000000e+00 : f32
    %572 = vector.broadcast %cst_144 : f32 to vector<2x32xf32>
    %573 = arith.addf %572, %571 : vector<2x32xf32>
    %574 = arith.divf %572, %573 : vector<2x32xf32>
    %575 = vector.extract_strided_slice %537 {offsets = [0, 64], sizes = [2, 32], strides = [1, 1]} : vector<2x128xf32> to vector<2x32xf32>
    %576 = math.tanh %575 : vector<2x32xf32>
    %577 = vector.extract_strided_slice %537 {offsets = [0, 96], sizes = [2, 32], strides = [1, 1]} : vector<2x128xf32> to vector<2x32xf32>
    %578 = arith.negf %577 : vector<2x32xf32>
    %579 = math.exp %578 : vector<2x32xf32>
    %cst_145 = arith.constant 1.000000e+00 : f32
    %580 = vector.broadcast %cst_145 : f32 to vector<2x32xf32>
    %581 = arith.addf %580, %579 : vector<2x32xf32>
    %582 = arith.divf %580, %581 : vector<2x32xf32>
    %583 = arith.mulf %574, %512 : vector<2x32xf32>
    %584 = arith.mulf %568, %576 : vector<2x32xf32>
    %585 = arith.addf %583, %584 : vector<2x32xf32>
    %586 = math.tanh %585 : vector<2x32xf32>
    %587 = arith.mulf %582, %586 : vector<2x32xf32>
    %588 = arith.index_cast %c7_i32_132 : i32 to index
    %c0_146 = arith.constant 0 : index
    %c0_147 = arith.constant 0 : index
    %589 = vector.load %arg13[%588, %c0_146, %c0_147] : memref<8x2x32xf32, #tpu.memory_space<vmem>>, vector<1x2x32xf32>
    %590 = vector.shape_cast %589 : vector<1x2x32xf32> to vector<2x32xf32>
    %591 = vector.shape_cast %562 : vector<2x32xf32> to vector<1x2x32xf32>
    tpu.vector_store %arg13[%588, %c0_146, %c0_147], %591 {strides = array<i32>} : memref<8x2x32xf32, #tpu.memory_space<vmem>>, vector<1x2x32xf32>,
    %592 = arith.index_cast %523 : i32 to index
    %c0_148 = arith.constant 0 : index
    %c0_149 = arith.constant 0 : index
    %593 = vector.load %arg14[%592, %c0_148, %c0_149] : memref<8x2x32xf32, #tpu.memory_space<vmem>>, vector<1x2x32xf32>
    %594 = vector.shape_cast %593 : vector<1x2x32xf32> to vector<2x32xf32>
    %595 = vector.shape_cast %587 : vector<2x32xf32> to vector<1x2x32xf32>
    tpu.vector_store %arg14[%592, %c0_148, %c0_149], %595 {strides = array<i32>} : memref<8x2x32xf32, #tpu.memory_space<vmem>>, vector<1x2x32xf32>,
    %c8_i32 = arith.constant 8 : i32
    %596 = tpu.concatenate %562, %587 in 1 : vector<2x32xf32>, vector<2x32xf32> -> vector<2x64xf32>
    %c0_150 = arith.constant 0 : index
    %c0_151 = arith.constant 0 : index
    %c0_152 = arith.constant 0 : index
    %597 = vector.load %arg10[%c0_150, %c0_151, %c0_152] : memref<2x2x64xf32, #tpu.memory_space<vmem>>, vector<1x2x64xf32>
    %598 = vector.shape_cast %597 : vector<1x2x64xf32> to vector<2x64xf32>
    %599 = vector.shape_cast %596 : vector<2x64xf32> to vector<1x2x64xf32>
    tpu.vector_store %arg10[%c0_150, %c0_151, %c0_152], %599 {strides = array<i32>} : memref<2x2x64xf32, #tpu.memory_space<vmem>>, vector<1x2x64xf32>,
    %600 = tpu.concatenate %560, %585 in 1 : vector<2x32xf32>, vector<2x32xf32> -> vector<2x64xf32>
    %c0_153 = arith.constant 0 : index
    %c0_154 = arith.constant 0 : index
    %c0_155 = arith.constant 0 : index
    %601 = vector.load %arg11[%c0_153, %c0_154, %c0_155] : memref<2x2x64xf32, #tpu.memory_space<vmem>>, vector<1x2x64xf32>
    %602 = vector.shape_cast %601 : vector<1x2x64xf32> to vector<2x64xf32>
    %603 = vector.shape_cast %600 : vector<2x64xf32> to vector<1x2x64xf32>
    tpu.vector_store %arg11[%c0_153, %c0_154, %c0_155], %603 {strides = array<i32>} : memref<2x2x64xf32, #tpu.memory_space<vmem>>, vector<1x2x64xf32>,
    %c0_156 = arith.constant 0 : index
    %c0_157 = arith.constant 0 : index
    %604 = vector.load %arg6[%c0_156, %c0_157] : memref<64x256xbf16, #tpu.memory_space<vmem>>, vector<64x256xbf16>
    %c0_158 = arith.constant 0 : index
    %c0_159 = arith.constant 0 : index
    %605 = vector.load %arg7[%c0_158, %c0_159] : memref<32x128xbf16, #tpu.memory_space<vmem>>, vector<32x128xbf16>
    %c0_160 = arith.constant 0 : index
    %c0_161 = arith.constant 0 : index
    %606 = vector.load %arg8[%c0_160, %c0_161] : memref<32x128xbf16, #tpu.memory_space<vmem>>, vector<32x128xbf16>
    %c0_162 = arith.constant 0 : index
    %c0_163 = arith.constant 0 : index
    %607 = vector.load %arg9[%c0_162, %c0_163] : memref<1x256xf32, #tpu.memory_space<vmem>>, vector<1x256xf32>
    %c0_164 = arith.constant 0 : index
    %c0_165 = arith.constant 0 : index
    %c0_166 = arith.constant 0 : index
    %608 = vector.load %arg13[%c0_164, %c0_165, %c0_166] : memref<8x2x32xf32, #tpu.memory_space<vmem>>, vector<8x2x32xf32>
    %609 = vector.shape_cast %608 : vector<8x2x32xf32> to vector<16x32xf32>
    %610 = arith.truncf %609 : vector<16x32xf32> to vector<16x32xbf16>
    %c0_167 = arith.constant 0 : index
    %c0_168 = arith.constant 0 : index
    %c0_169 = arith.constant 0 : index
    %611 = vector.load %arg14[%c0_167, %c0_168, %c0_169] : memref<8x2x32xf32, #tpu.memory_space<vmem>>, vector<8x2x32xf32>
    %612 = vector.shape_cast %611 : vector<8x2x32xf32> to vector<16x32xf32>
    %613 = arith.truncf %612 : vector<16x32xf32> to vector<16x32xbf16>
    %614 = vector.extract_strided_slice %604 {offsets = [0, 0], sizes = [32, 256], strides = [1, 1]} : vector<64x256xbf16> to vector<32x256xbf16>
    %cst_170 = arith.constant dense<0.000000e+00> : vector<16x256xf32>
    %615 = tpu.matmul %610, %614, %cst_170 {dimension_numbers = #tpu.dot_dimension_numbers<[1], [0], [0], [1], [0, 0, 1, 1], [], []>} : vector<16x32xbf16>, vector<32x256xbf16>, vector<16x256xf32> -> vector<16x256xf32>
    %616 = vector.extract_strided_slice %604 {offsets = [32, 0], sizes = [32, 256], strides = [1, 1]} : vector<64x256xbf16> to vector<32x256xbf16>
    %cst_171 = arith.constant dense<0.000000e+00> : vector<16x256xf32>
    %617 = tpu.matmul %613, %616, %cst_171 {dimension_numbers = #tpu.dot_dimension_numbers<[1], [0], [0], [1], [0, 0, 1, 1], [], []>} : vector<16x32xbf16>, vector<32x256xbf16>, vector<16x256xf32> -> vector<16x256xf32>
    %618 = arith.addf %615, %617 : vector<16x256xf32>
    %619 = vector.broadcast %607 : vector<1x256xf32> to vector<16x256xf32>
    %620 = arith.addf %618, %619 : vector<16x256xf32>
    %621 = vector.shape_cast %620 : vector<16x256xf32> to vector<8x2x256xf32>
    %c0_172 = arith.constant 0 : index
    %c0_173 = arith.constant 0 : index
    %c0_174 = arith.constant 0 : index
    %622 = vector.load %arg12[%c0_172, %c0_173, %c0_174] : memref<8x2x256xf32, #tpu.memory_space<vmem>>, vector<8x2x256xf32>
    tpu.vector_store %arg12[%c0_172, %c0_173, %c0_174], %621 {strides = array<i32>} : memref<8x2x256xf32, #tpu.memory_space<vmem>>, vector<8x2x256xf32>,
    %cst_175 = arith.constant 0.000000e+00 : f32
    %623 = vector.broadcast %cst_175 : f32 to vector<2x32xf32>
    %c0_i32_176 = arith.constant 0 : i32
    %c7_i32_177 = arith.constant 7 : i32
    %624 = arith.subi %c7_i32_177, %c0_i32_176 : i32
    %625 = arith.index_cast %c0_i32_176 : i32 to index
    %c0_178 = arith.constant 0 : index
    %c0_179 = arith.constant 0 : index
    %626 = vector.load %arg12[%625, %c0_178, %c0_179] : memref<8x2x256xf32, #tpu.memory_space<vmem>>, vector<1x2x256xf32>
    %627 = vector.shape_cast %626 : vector<1x2x256xf32> to vector<2x256xf32>
    %628 = vector.extract_strided_slice %627 {offsets = [0, 0], sizes = [2, 128], strides = [1, 1]} : vector<2x256xf32> to vector<2x128xf32>
    %629 = arith.truncf %623 : vector<2x32xf32> to vector<2x32xbf16>
    %cst_180 = arith.constant dense<0.000000e+00> : vector<2x128xf32>
    %630 = tpu.matmul %629, %605, %cst_180 {dimension_numbers = #tpu.dot_dimension_numbers<[1], [0], [0], [1], [0, 0, 1, 1], [], []>} : vector<2x32xbf16>, vector<32x128xbf16>, vector<2x128xf32> -> vector<2x128xf32>
    %631 = arith.addf %628, %630 : vector<2x128xf32>
    %632 = arith.index_cast %624 : i32 to index
    %c0_181 = arith.constant 0 : index
    %c0_182 = arith.constant 0 : index
    %633 = vector.load %arg12[%632, %c0_181, %c0_182] : memref<8x2x256xf32, #tpu.memory_space<vmem>>, vector<1x2x256xf32>
    %634 = vector.shape_cast %633 : vector<1x2x256xf32> to vector<2x256xf32>
    %635 = vector.extract_strided_slice %634 {offsets = [0, 128], sizes = [2, 128], strides = [1, 1]} : vector<2x256xf32> to vector<2x128xf32>
    %636 = arith.truncf %623 : vector<2x32xf32> to vector<2x32xbf16>
    %cst_183 = arith.constant dense<0.000000e+00> : vector<2x128xf32>
    %637 = tpu.matmul %636, %606, %cst_183 {dimension_numbers = #tpu.dot_dimension_numbers<[1], [0], [0], [1], [0, 0, 1, 1], [], []>} : vector<2x32xbf16>, vector<32x128xbf16>, vector<2x128xf32> -> vector<2x128xf32>
    %638 = arith.addf %635, %637 : vector<2x128xf32>
    %639 = vector.extract_strided_slice %631 {offsets = [0, 0], sizes = [2, 32], strides = [1, 1]} : vector<2x128xf32> to vector<2x32xf32>
    %640 = arith.negf %639 : vector<2x32xf32>
    %641 = math.exp %640 : vector<2x32xf32>
    %cst_184 = arith.constant 1.000000e+00 : f32
    %642 = vector.broadcast %cst_184 : f32 to vector<2x32xf32>
    %643 = arith.addf %642, %641 : vector<2x32xf32>
    %644 = arith.divf %642, %643 : vector<2x32xf32>
    %645 = vector.extract_strided_slice %631 {offsets = [0, 32], sizes = [2, 32], strides = [1, 1]} : vector<2x128xf32> to vector<2x32xf32>
    %646 = arith.negf %645 : vector<2x32xf32>
    %647 = math.exp %646 : vector<2x32xf32>
    %cst_185 = arith.constant 1.000000e+00 : f32
    %648 = vector.broadcast %cst_185 : f32 to vector<2x32xf32>
    %649 = arith.addf %648, %647 : vector<2x32xf32>
    %650 = arith.divf %648, %649 : vector<2x32xf32>
    %651 = vector.extract_strided_slice %631 {offsets = [0, 64], sizes = [2, 32], strides = [1, 1]} : vector<2x128xf32> to vector<2x32xf32>
    %652 = math.tanh %651 : vector<2x32xf32>
    %653 = vector.extract_strided_slice %631 {offsets = [0, 96], sizes = [2, 32], strides = [1, 1]} : vector<2x128xf32> to vector<2x32xf32>
    %654 = arith.negf %653 : vector<2x32xf32>
    %655 = math.exp %654 : vector<2x32xf32>
    %cst_186 = arith.constant 1.000000e+00 : f32
    %656 = vector.broadcast %cst_186 : f32 to vector<2x32xf32>
    %657 = arith.addf %656, %655 : vector<2x32xf32>
    %658 = arith.divf %656, %657 : vector<2x32xf32>
    %659 = arith.mulf %650, %623 : vector<2x32xf32>
    %660 = arith.mulf %644, %652 : vector<2x32xf32>
    %661 = arith.addf %659, %660 : vector<2x32xf32>
    %662 = math.tanh %661 : vector<2x32xf32>
    %663 = arith.mulf %658, %662 : vector<2x32xf32>
    %664 = vector.extract_strided_slice %638 {offsets = [0, 0], sizes = [2, 32], strides = [1, 1]} : vector<2x128xf32> to vector<2x32xf32>
    %665 = arith.negf %664 : vector<2x32xf32>
    %666 = math.exp %665 : vector<2x32xf32>
    %cst_187 = arith.constant 1.000000e+00 : f32
    %667 = vector.broadcast %cst_187 : f32 to vector<2x32xf32>
    %668 = arith.addf %667, %666 : vector<2x32xf32>
    %669 = arith.divf %667, %668 : vector<2x32xf32>
    %670 = vector.extract_strided_slice %638 {offsets = [0, 32], sizes = [2, 32], strides = [1, 1]} : vector<2x128xf32> to vector<2x32xf32>
    %671 = arith.negf %670 : vector<2x32xf32>
    %672 = math.exp %671 : vector<2x32xf32>
    %cst_188 = arith.constant 1.000000e+00 : f32
    %673 = vector.broadcast %cst_188 : f32 to vector<2x32xf32>
    %674 = arith.addf %673, %672 : vector<2x32xf32>
    %675 = arith.divf %673, %674 : vector<2x32xf32>
    %676 = vector.extract_strided_slice %638 {offsets = [0, 64], sizes = [2, 32], strides = [1, 1]} : vector<2x128xf32> to vector<2x32xf32>
    %677 = math.tanh %676 : vector<2x32xf32>
    %678 = vector.extract_strided_slice %638 {offsets = [0, 96], sizes = [2, 32], strides = [1, 1]} : vector<2x128xf32> to vector<2x32xf32>
    %679 = arith.negf %678 : vector<2x32xf32>
    %680 = math.exp %679 : vector<2x32xf32>
    %cst_189 = arith.constant 1.000000e+00 : f32
    %681 = vector.broadcast %cst_189 : f32 to vector<2x32xf32>
    %682 = arith.addf %681, %680 : vector<2x32xf32>
    %683 = arith.divf %681, %682 : vector<2x32xf32>
    %684 = arith.mulf %675, %623 : vector<2x32xf32>
    %685 = arith.mulf %669, %677 : vector<2x32xf32>
    %686 = arith.addf %684, %685 : vector<2x32xf32>
    %687 = math.tanh %686 : vector<2x32xf32>
    %688 = arith.mulf %683, %687 : vector<2x32xf32>
    %c1_i32_190 = arith.constant 1 : i32
    %c7_i32_191 = arith.constant 7 : i32
    %689 = arith.subi %c7_i32_191, %c1_i32_190 : i32
    %690 = arith.index_cast %c1_i32_190 : i32 to index
    %c0_192 = arith.constant 0 : index
    %c0_193 = arith.constant 0 : index
    %691 = vector.load %arg12[%690, %c0_192, %c0_193] : memref<8x2x256xf32, #tpu.memory_space<vmem>>, vector<1x2x256xf32>
    %692 = vector.shape_cast %691 : vector<1x2x256xf32> to vector<2x256xf32>
    %693 = vector.extract_strided_slice %692 {offsets = [0, 0], sizes = [2, 128], strides = [1, 1]} : vector<2x256xf32> to vector<2x128xf32>
    %694 = arith.truncf %663 : vector<2x32xf32> to vector<2x32xbf16>
    %cst_194 = arith.constant dense<0.000000e+00> : vector<2x128xf32>
    %695 = tpu.matmul %694, %605, %cst_194 {dimension_numbers = #tpu.dot_dimension_numbers<[1], [0], [0], [1], [0, 0, 1, 1], [], []>} : vector<2x32xbf16>, vector<32x128xbf16>, vector<2x128xf32> -> vector<2x128xf32>
    %696 = arith.addf %693, %695 : vector<2x128xf32>
    %697 = arith.index_cast %689 : i32 to index
    %c0_195 = arith.constant 0 : index
    %c0_196 = arith.constant 0 : index
    %698 = vector.load %arg12[%697, %c0_195, %c0_196] : memref<8x2x256xf32, #tpu.memory_space<vmem>>, vector<1x2x256xf32>
    %699 = vector.shape_cast %698 : vector<1x2x256xf32> to vector<2x256xf32>
    %700 = vector.extract_strided_slice %699 {offsets = [0, 128], sizes = [2, 128], strides = [1, 1]} : vector<2x256xf32> to vector<2x128xf32>
    %701 = arith.truncf %688 : vector<2x32xf32> to vector<2x32xbf16>
    %cst_197 = arith.constant dense<0.000000e+00> : vector<2x128xf32>
    %702 = tpu.matmul %701, %606, %cst_197 {dimension_numbers = #tpu.dot_dimension_numbers<[1], [0], [0], [1], [0, 0, 1, 1], [], []>} : vector<2x32xbf16>, vector<32x128xbf16>, vector<2x128xf32> -> vector<2x128xf32>
    %703 = arith.addf %700, %702 : vector<2x128xf32>
    %704 = vector.extract_strided_slice %696 {offsets = [0, 0], sizes = [2, 32], strides = [1, 1]} : vector<2x128xf32> to vector<2x32xf32>
    %705 = arith.negf %704 : vector<2x32xf32>
    %706 = math.exp %705 : vector<2x32xf32>
    %cst_198 = arith.constant 1.000000e+00 : f32
    %707 = vector.broadcast %cst_198 : f32 to vector<2x32xf32>
    %708 = arith.addf %707, %706 : vector<2x32xf32>
    %709 = arith.divf %707, %708 : vector<2x32xf32>
    %710 = vector.extract_strided_slice %696 {offsets = [0, 32], sizes = [2, 32], strides = [1, 1]} : vector<2x128xf32> to vector<2x32xf32>
    %711 = arith.negf %710 : vector<2x32xf32>
    %712 = math.exp %711 : vector<2x32xf32>
    %cst_199 = arith.constant 1.000000e+00 : f32
    %713 = vector.broadcast %cst_199 : f32 to vector<2x32xf32>
    %714 = arith.addf %713, %712 : vector<2x32xf32>
    %715 = arith.divf %713, %714 : vector<2x32xf32>
    %716 = vector.extract_strided_slice %696 {offsets = [0, 64], sizes = [2, 32], strides = [1, 1]} : vector<2x128xf32> to vector<2x32xf32>
    %717 = math.tanh %716 : vector<2x32xf32>
    %718 = vector.extract_strided_slice %696 {offsets = [0, 96], sizes = [2, 32], strides = [1, 1]} : vector<2x128xf32> to vector<2x32xf32>
    %719 = arith.negf %718 : vector<2x32xf32>
    %720 = math.exp %719 : vector<2x32xf32>
    %cst_200 = arith.constant 1.000000e+00 : f32
    %721 = vector.broadcast %cst_200 : f32 to vector<2x32xf32>
    %722 = arith.addf %721, %720 : vector<2x32xf32>
    %723 = arith.divf %721, %722 : vector<2x32xf32>
    %724 = arith.mulf %715, %661 : vector<2x32xf32>
    %725 = arith.mulf %709, %717 : vector<2x32xf32>
    %726 = arith.addf %724, %725 : vector<2x32xf32>
    %727 = math.tanh %726 : vector<2x32xf32>
    %728 = arith.mulf %723, %727 : vector<2x32xf32>
    %729 = vector.extract_strided_slice %703 {offsets = [0, 0], sizes = [2, 32], strides = [1, 1]} : vector<2x128xf32> to vector<2x32xf32>
    %730 = arith.negf %729 : vector<2x32xf32>
    %731 = math.exp %730 : vector<2x32xf32>
    %cst_201 = arith.constant 1.000000e+00 : f32
    %732 = vector.broadcast %cst_201 : f32 to vector<2x32xf32>
    %733 = arith.addf %732, %731 : vector<2x32xf32>
    %734 = arith.divf %732, %733 : vector<2x32xf32>
    %735 = vector.extract_strided_slice %703 {offsets = [0, 32], sizes = [2, 32], strides = [1, 1]} : vector<2x128xf32> to vector<2x32xf32>
    %736 = arith.negf %735 : vector<2x32xf32>
    %737 = math.exp %736 : vector<2x32xf32>
    %cst_202 = arith.constant 1.000000e+00 : f32
    %738 = vector.broadcast %cst_202 : f32 to vector<2x32xf32>
    %739 = arith.addf %738, %737 : vector<2x32xf32>
    %740 = arith.divf %738, %739 : vector<2x32xf32>
    %741 = vector.extract_strided_slice %703 {offsets = [0, 64], sizes = [2, 32], strides = [1, 1]} : vector<2x128xf32> to vector<2x32xf32>
    %742 = math.tanh %741 : vector<2x32xf32>
    %743 = vector.extract_strided_slice %703 {offsets = [0, 96], sizes = [2, 32], strides = [1, 1]} : vector<2x128xf32> to vector<2x32xf32>
    %744 = arith.negf %743 : vector<2x32xf32>
    %745 = math.exp %744 : vector<2x32xf32>
    %cst_203 = arith.constant 1.000000e+00 : f32
    %746 = vector.broadcast %cst_203 : f32 to vector<2x32xf32>
    %747 = arith.addf %746, %745 : vector<2x32xf32>
    %748 = arith.divf %746, %747 : vector<2x32xf32>
    %749 = arith.mulf %740, %686 : vector<2x32xf32>
    %750 = arith.mulf %734, %742 : vector<2x32xf32>
    %751 = arith.addf %749, %750 : vector<2x32xf32>
    %752 = math.tanh %751 : vector<2x32xf32>
    %753 = arith.mulf %748, %752 : vector<2x32xf32>
    %c2_i32_204 = arith.constant 2 : i32
    %c7_i32_205 = arith.constant 7 : i32
    %754 = arith.subi %c7_i32_205, %c2_i32_204 : i32
    %755 = arith.index_cast %c2_i32_204 : i32 to index
    %c0_206 = arith.constant 0 : index
    %c0_207 = arith.constant 0 : index
    %756 = vector.load %arg12[%755, %c0_206, %c0_207] : memref<8x2x256xf32, #tpu.memory_space<vmem>>, vector<1x2x256xf32>
    %757 = vector.shape_cast %756 : vector<1x2x256xf32> to vector<2x256xf32>
    %758 = vector.extract_strided_slice %757 {offsets = [0, 0], sizes = [2, 128], strides = [1, 1]} : vector<2x256xf32> to vector<2x128xf32>
    %759 = arith.truncf %728 : vector<2x32xf32> to vector<2x32xbf16>
    %cst_208 = arith.constant dense<0.000000e+00> : vector<2x128xf32>
    %760 = tpu.matmul %759, %605, %cst_208 {dimension_numbers = #tpu.dot_dimension_numbers<[1], [0], [0], [1], [0, 0, 1, 1], [], []>} : vector<2x32xbf16>, vector<32x128xbf16>, vector<2x128xf32> -> vector<2x128xf32>
    %761 = arith.addf %758, %760 : vector<2x128xf32>
    %762 = arith.index_cast %754 : i32 to index
    %c0_209 = arith.constant 0 : index
    %c0_210 = arith.constant 0 : index
    %763 = vector.load %arg12[%762, %c0_209, %c0_210] : memref<8x2x256xf32, #tpu.memory_space<vmem>>, vector<1x2x256xf32>
    %764 = vector.shape_cast %763 : vector<1x2x256xf32> to vector<2x256xf32>
    %765 = vector.extract_strided_slice %764 {offsets = [0, 128], sizes = [2, 128], strides = [1, 1]} : vector<2x256xf32> to vector<2x128xf32>
    %766 = arith.truncf %753 : vector<2x32xf32> to vector<2x32xbf16>
    %cst_211 = arith.constant dense<0.000000e+00> : vector<2x128xf32>
    %767 = tpu.matmul %766, %606, %cst_211 {dimension_numbers = #tpu.dot_dimension_numbers<[1], [0], [0], [1], [0, 0, 1, 1], [], []>} : vector<2x32xbf16>, vector<32x128xbf16>, vector<2x128xf32> -> vector<2x128xf32>
    %768 = arith.addf %765, %767 : vector<2x128xf32>
    %769 = vector.extract_strided_slice %761 {offsets = [0, 0], sizes = [2, 32], strides = [1, 1]} : vector<2x128xf32> to vector<2x32xf32>
    %770 = arith.negf %769 : vector<2x32xf32>
    %771 = math.exp %770 : vector<2x32xf32>
    %cst_212 = arith.constant 1.000000e+00 : f32
    %772 = vector.broadcast %cst_212 : f32 to vector<2x32xf32>
    %773 = arith.addf %772, %771 : vector<2x32xf32>
    %774 = arith.divf %772, %773 : vector<2x32xf32>
    %775 = vector.extract_strided_slice %761 {offsets = [0, 32], sizes = [2, 32], strides = [1, 1]} : vector<2x128xf32> to vector<2x32xf32>
    %776 = arith.negf %775 : vector<2x32xf32>
    %777 = math.exp %776 : vector<2x32xf32>
    %cst_213 = arith.constant 1.000000e+00 : f32
    %778 = vector.broadcast %cst_213 : f32 to vector<2x32xf32>
    %779 = arith.addf %778, %777 : vector<2x32xf32>
    %780 = arith.divf %778, %779 : vector<2x32xf32>
    %781 = vector.extract_strided_slice %761 {offsets = [0, 64], sizes = [2, 32], strides = [1, 1]} : vector<2x128xf32> to vector<2x32xf32>
    %782 = math.tanh %781 : vector<2x32xf32>
    %783 = vector.extract_strided_slice %761 {offsets = [0, 96], sizes = [2, 32], strides = [1, 1]} : vector<2x128xf32> to vector<2x32xf32>
    %784 = arith.negf %783 : vector<2x32xf32>
    %785 = math.exp %784 : vector<2x32xf32>
    %cst_214 = arith.constant 1.000000e+00 : f32
    %786 = vector.broadcast %cst_214 : f32 to vector<2x32xf32>
    %787 = arith.addf %786, %785 : vector<2x32xf32>
    %788 = arith.divf %786, %787 : vector<2x32xf32>
    %789 = arith.mulf %780, %726 : vector<2x32xf32>
    %790 = arith.mulf %774, %782 : vector<2x32xf32>
    %791 = arith.addf %789, %790 : vector<2x32xf32>
    %792 = math.tanh %791 : vector<2x32xf32>
    %793 = arith.mulf %788, %792 : vector<2x32xf32>
    %794 = vector.extract_strided_slice %768 {offsets = [0, 0], sizes = [2, 32], strides = [1, 1]} : vector<2x128xf32> to vector<2x32xf32>
    %795 = arith.negf %794 : vector<2x32xf32>
    %796 = math.exp %795 : vector<2x32xf32>
    %cst_215 = arith.constant 1.000000e+00 : f32
    %797 = vector.broadcast %cst_215 : f32 to vector<2x32xf32>
    %798 = arith.addf %797, %796 : vector<2x32xf32>
    %799 = arith.divf %797, %798 : vector<2x32xf32>
    %800 = vector.extract_strided_slice %768 {offsets = [0, 32], sizes = [2, 32], strides = [1, 1]} : vector<2x128xf32> to vector<2x32xf32>
    %801 = arith.negf %800 : vector<2x32xf32>
    %802 = math.exp %801 : vector<2x32xf32>
    %cst_216 = arith.constant 1.000000e+00 : f32
    %803 = vector.broadcast %cst_216 : f32 to vector<2x32xf32>
    %804 = arith.addf %803, %802 : vector<2x32xf32>
    %805 = arith.divf %803, %804 : vector<2x32xf32>
    %806 = vector.extract_strided_slice %768 {offsets = [0, 64], sizes = [2, 32], strides = [1, 1]} : vector<2x128xf32> to vector<2x32xf32>
    %807 = math.tanh %806 : vector<2x32xf32>
    %808 = vector.extract_strided_slice %768 {offsets = [0, 96], sizes = [2, 32], strides = [1, 1]} : vector<2x128xf32> to vector<2x32xf32>
    %809 = arith.negf %808 : vector<2x32xf32>
    %810 = math.exp %809 : vector<2x32xf32>
    %cst_217 = arith.constant 1.000000e+00 : f32
    %811 = vector.broadcast %cst_217 : f32 to vector<2x32xf32>
    %812 = arith.addf %811, %810 : vector<2x32xf32>
    %813 = arith.divf %811, %812 : vector<2x32xf32>
    %814 = arith.mulf %805, %751 : vector<2x32xf32>
    %815 = arith.mulf %799, %807 : vector<2x32xf32>
    %816 = arith.addf %814, %815 : vector<2x32xf32>
    %817 = math.tanh %816 : vector<2x32xf32>
    %818 = arith.mulf %813, %817 : vector<2x32xf32>
    %c3_i32_218 = arith.constant 3 : i32
    %c7_i32_219 = arith.constant 7 : i32
    %819 = arith.subi %c7_i32_219, %c3_i32_218 : i32
    %820 = arith.index_cast %c3_i32_218 : i32 to index
    %c0_220 = arith.constant 0 : index
    %c0_221 = arith.constant 0 : index
    %821 = vector.load %arg12[%820, %c0_220, %c0_221] : memref<8x2x256xf32, #tpu.memory_space<vmem>>, vector<1x2x256xf32>
    %822 = vector.shape_cast %821 : vector<1x2x256xf32> to vector<2x256xf32>
    %823 = vector.extract_strided_slice %822 {offsets = [0, 0], sizes = [2, 128], strides = [1, 1]} : vector<2x256xf32> to vector<2x128xf32>
    %824 = arith.truncf %793 : vector<2x32xf32> to vector<2x32xbf16>
    %cst_222 = arith.constant dense<0.000000e+00> : vector<2x128xf32>
    %825 = tpu.matmul %824, %605, %cst_222 {dimension_numbers = #tpu.dot_dimension_numbers<[1], [0], [0], [1], [0, 0, 1, 1], [], []>} : vector<2x32xbf16>, vector<32x128xbf16>, vector<2x128xf32> -> vector<2x128xf32>
    %826 = arith.addf %823, %825 : vector<2x128xf32>
    %827 = arith.index_cast %819 : i32 to index
    %c0_223 = arith.constant 0 : index
    %c0_224 = arith.constant 0 : index
    %828 = vector.load %arg12[%827, %c0_223, %c0_224] : memref<8x2x256xf32, #tpu.memory_space<vmem>>, vector<1x2x256xf32>
    %829 = vector.shape_cast %828 : vector<1x2x256xf32> to vector<2x256xf32>
    %830 = vector.extract_strided_slice %829 {offsets = [0, 128], sizes = [2, 128], strides = [1, 1]} : vector<2x256xf32> to vector<2x128xf32>
    %831 = arith.truncf %818 : vector<2x32xf32> to vector<2x32xbf16>
    %cst_225 = arith.constant dense<0.000000e+00> : vector<2x128xf32>
    %832 = tpu.matmul %831, %606, %cst_225 {dimension_numbers = #tpu.dot_dimension_numbers<[1], [0], [0], [1], [0, 0, 1, 1], [], []>} : vector<2x32xbf16>, vector<32x128xbf16>, vector<2x128xf32> -> vector<2x128xf32>
    %833 = arith.addf %830, %832 : vector<2x128xf32>
    %834 = vector.extract_strided_slice %826 {offsets = [0, 0], sizes = [2, 32], strides = [1, 1]} : vector<2x128xf32> to vector<2x32xf32>
    %835 = arith.negf %834 : vector<2x32xf32>
    %836 = math.exp %835 : vector<2x32xf32>
    %cst_226 = arith.constant 1.000000e+00 : f32
    %837 = vector.broadcast %cst_226 : f32 to vector<2x32xf32>
    %838 = arith.addf %837, %836 : vector<2x32xf32>
    %839 = arith.divf %837, %838 : vector<2x32xf32>
    %840 = vector.extract_strided_slice %826 {offsets = [0, 32], sizes = [2, 32], strides = [1, 1]} : vector<2x128xf32> to vector<2x32xf32>
    %841 = arith.negf %840 : vector<2x32xf32>
    %842 = math.exp %841 : vector<2x32xf32>
    %cst_227 = arith.constant 1.000000e+00 : f32
    %843 = vector.broadcast %cst_227 : f32 to vector<2x32xf32>
    %844 = arith.addf %843, %842 : vector<2x32xf32>
    %845 = arith.divf %843, %844 : vector<2x32xf32>
    %846 = vector.extract_strided_slice %826 {offsets = [0, 64], sizes = [2, 32], strides = [1, 1]} : vector<2x128xf32> to vector<2x32xf32>
    %847 = math.tanh %846 : vector<2x32xf32>
    %848 = vector.extract_strided_slice %826 {offsets = [0, 96], sizes = [2, 32], strides = [1, 1]} : vector<2x128xf32> to vector<2x32xf32>
    %849 = arith.negf %848 : vector<2x32xf32>
    %850 = math.exp %849 : vector<2x32xf32>
    %cst_228 = arith.constant 1.000000e+00 : f32
    %851 = vector.broadcast %cst_228 : f32 to vector<2x32xf32>
    %852 = arith.addf %851, %850 : vector<2x32xf32>
    %853 = arith.divf %851, %852 : vector<2x32xf32>
    %854 = arith.mulf %845, %791 : vector<2x32xf32>
    %855 = arith.mulf %839, %847 : vector<2x32xf32>
    %856 = arith.addf %854, %855 : vector<2x32xf32>
    %857 = math.tanh %856 : vector<2x32xf32>
    %858 = arith.mulf %853, %857 : vector<2x32xf32>
    %859 = vector.extract_strided_slice %833 {offsets = [0, 0], sizes = [2, 32], strides = [1, 1]} : vector<2x128xf32> to vector<2x32xf32>
    %860 = arith.negf %859 : vector<2x32xf32>
    %861 = math.exp %860 : vector<2x32xf32>
    %cst_229 = arith.constant 1.000000e+00 : f32
    %862 = vector.broadcast %cst_229 : f32 to vector<2x32xf32>
    %863 = arith.addf %862, %861 : vector<2x32xf32>
    %864 = arith.divf %862, %863 : vector<2x32xf32>
    %865 = vector.extract_strided_slice %833 {offsets = [0, 32], sizes = [2, 32], strides = [1, 1]} : vector<2x128xf32> to vector<2x32xf32>
    %866 = arith.negf %865 : vector<2x32xf32>
    %867 = math.exp %866 : vector<2x32xf32>
    %cst_230 = arith.constant 1.000000e+00 : f32
    %868 = vector.broadcast %cst_230 : f32 to vector<2x32xf32>
    %869 = arith.addf %868, %867 : vector<2x32xf32>
    %870 = arith.divf %868, %869 : vector<2x32xf32>
    %871 = vector.extract_strided_slice %833 {offsets = [0, 64], sizes = [2, 32], strides = [1, 1]} : vector<2x128xf32> to vector<2x32xf32>
    %872 = math.tanh %871 : vector<2x32xf32>
    %873 = vector.extract_strided_slice %833 {offsets = [0, 96], sizes = [2, 32], strides = [1, 1]} : vector<2x128xf32> to vector<2x32xf32>
    %874 = arith.negf %873 : vector<2x32xf32>
    %875 = math.exp %874 : vector<2x32xf32>
    %cst_231 = arith.constant 1.000000e+00 : f32
    %876 = vector.broadcast %cst_231 : f32 to vector<2x32xf32>
    %877 = arith.addf %876, %875 : vector<2x32xf32>
    %878 = arith.divf %876, %877 : vector<2x32xf32>
    %879 = arith.mulf %870, %816 : vector<2x32xf32>
    %880 = arith.mulf %864, %872 : vector<2x32xf32>
    %881 = arith.addf %879, %880 : vector<2x32xf32>
    %882 = math.tanh %881 : vector<2x32xf32>
    %883 = arith.mulf %878, %882 : vector<2x32xf32>
    %c4_i32_232 = arith.constant 4 : i32
    %c7_i32_233 = arith.constant 7 : i32
    %884 = arith.subi %c7_i32_233, %c4_i32_232 : i32
    %885 = arith.index_cast %c4_i32_232 : i32 to index
    %c0_234 = arith.constant 0 : index
    %c0_235 = arith.constant 0 : index
    %886 = vector.load %arg12[%885, %c0_234, %c0_235] : memref<8x2x256xf32, #tpu.memory_space<vmem>>, vector<1x2x256xf32>
    %887 = vector.shape_cast %886 : vector<1x2x256xf32> to vector<2x256xf32>
    %888 = vector.extract_strided_slice %887 {offsets = [0, 0], sizes = [2, 128], strides = [1, 1]} : vector<2x256xf32> to vector<2x128xf32>
    %889 = arith.truncf %858 : vector<2x32xf32> to vector<2x32xbf16>
    %cst_236 = arith.constant dense<0.000000e+00> : vector<2x128xf32>
    %890 = tpu.matmul %889, %605, %cst_236 {dimension_numbers = #tpu.dot_dimension_numbers<[1], [0], [0], [1], [0, 0, 1, 1], [], []>} : vector<2x32xbf16>, vector<32x128xbf16>, vector<2x128xf32> -> vector<2x128xf32>
    %891 = arith.addf %888, %890 : vector<2x128xf32>
    %892 = arith.index_cast %884 : i32 to index
    %c0_237 = arith.constant 0 : index
    %c0_238 = arith.constant 0 : index
    %893 = vector.load %arg12[%892, %c0_237, %c0_238] : memref<8x2x256xf32, #tpu.memory_space<vmem>>, vector<1x2x256xf32>
    %894 = vector.shape_cast %893 : vector<1x2x256xf32> to vector<2x256xf32>
    %895 = vector.extract_strided_slice %894 {offsets = [0, 128], sizes = [2, 128], strides = [1, 1]} : vector<2x256xf32> to vector<2x128xf32>
    %896 = arith.truncf %883 : vector<2x32xf32> to vector<2x32xbf16>
    %cst_239 = arith.constant dense<0.000000e+00> : vector<2x128xf32>
    %897 = tpu.matmul %896, %606, %cst_239 {dimension_numbers = #tpu.dot_dimension_numbers<[1], [0], [0], [1], [0, 0, 1, 1], [], []>} : vector<2x32xbf16>, vector<32x128xbf16>, vector<2x128xf32> -> vector<2x128xf32>
    %898 = arith.addf %895, %897 : vector<2x128xf32>
    %899 = vector.extract_strided_slice %891 {offsets = [0, 0], sizes = [2, 32], strides = [1, 1]} : vector<2x128xf32> to vector<2x32xf32>
    %900 = arith.negf %899 : vector<2x32xf32>
    %901 = math.exp %900 : vector<2x32xf32>
    %cst_240 = arith.constant 1.000000e+00 : f32
    %902 = vector.broadcast %cst_240 : f32 to vector<2x32xf32>
    %903 = arith.addf %902, %901 : vector<2x32xf32>
    %904 = arith.divf %902, %903 : vector<2x32xf32>
    %905 = vector.extract_strided_slice %891 {offsets = [0, 32], sizes = [2, 32], strides = [1, 1]} : vector<2x128xf32> to vector<2x32xf32>
    %906 = arith.negf %905 : vector<2x32xf32>
    %907 = math.exp %906 : vector<2x32xf32>
    %cst_241 = arith.constant 1.000000e+00 : f32
    %908 = vector.broadcast %cst_241 : f32 to vector<2x32xf32>
    %909 = arith.addf %908, %907 : vector<2x32xf32>
    %910 = arith.divf %908, %909 : vector<2x32xf32>
    %911 = vector.extract_strided_slice %891 {offsets = [0, 64], sizes = [2, 32], strides = [1, 1]} : vector<2x128xf32> to vector<2x32xf32>
    %912 = math.tanh %911 : vector<2x32xf32>
    %913 = vector.extract_strided_slice %891 {offsets = [0, 96], sizes = [2, 32], strides = [1, 1]} : vector<2x128xf32> to vector<2x32xf32>
    %914 = arith.negf %913 : vector<2x32xf32>
    %915 = math.exp %914 : vector<2x32xf32>
    %cst_242 = arith.constant 1.000000e+00 : f32
    %916 = vector.broadcast %cst_242 : f32 to vector<2x32xf32>
    %917 = arith.addf %916, %915 : vector<2x32xf32>
    %918 = arith.divf %916, %917 : vector<2x32xf32>
    %919 = arith.mulf %910, %856 : vector<2x32xf32>
    %920 = arith.mulf %904, %912 : vector<2x32xf32>
    %921 = arith.addf %919, %920 : vector<2x32xf32>
    %922 = math.tanh %921 : vector<2x32xf32>
    %923 = arith.mulf %918, %922 : vector<2x32xf32>
    %924 = vector.extract_strided_slice %898 {offsets = [0, 0], sizes = [2, 32], strides = [1, 1]} : vector<2x128xf32> to vector<2x32xf32>
    %925 = arith.negf %924 : vector<2x32xf32>
    %926 = math.exp %925 : vector<2x32xf32>
    %cst_243 = arith.constant 1.000000e+00 : f32
    %927 = vector.broadcast %cst_243 : f32 to vector<2x32xf32>
    %928 = arith.addf %927, %926 : vector<2x32xf32>
    %929 = arith.divf %927, %928 : vector<2x32xf32>
    %930 = vector.extract_strided_slice %898 {offsets = [0, 32], sizes = [2, 32], strides = [1, 1]} : vector<2x128xf32> to vector<2x32xf32>
    %931 = arith.negf %930 : vector<2x32xf32>
    %932 = math.exp %931 : vector<2x32xf32>
    %cst_244 = arith.constant 1.000000e+00 : f32
    %933 = vector.broadcast %cst_244 : f32 to vector<2x32xf32>
    %934 = arith.addf %933, %932 : vector<2x32xf32>
    %935 = arith.divf %933, %934 : vector<2x32xf32>
    %936 = vector.extract_strided_slice %898 {offsets = [0, 64], sizes = [2, 32], strides = [1, 1]} : vector<2x128xf32> to vector<2x32xf32>
    %937 = math.tanh %936 : vector<2x32xf32>
    %938 = vector.extract_strided_slice %898 {offsets = [0, 96], sizes = [2, 32], strides = [1, 1]} : vector<2x128xf32> to vector<2x32xf32>
    %939 = arith.negf %938 : vector<2x32xf32>
    %940 = math.exp %939 : vector<2x32xf32>
    %cst_245 = arith.constant 1.000000e+00 : f32
    %941 = vector.broadcast %cst_245 : f32 to vector<2x32xf32>
    %942 = arith.addf %941, %940 : vector<2x32xf32>
    %943 = arith.divf %941, %942 : vector<2x32xf32>
    %944 = arith.mulf %935, %881 : vector<2x32xf32>
    %945 = arith.mulf %929, %937 : vector<2x32xf32>
    %946 = arith.addf %944, %945 : vector<2x32xf32>
    %947 = math.tanh %946 : vector<2x32xf32>
    %948 = arith.mulf %943, %947 : vector<2x32xf32>
    %c5_i32_246 = arith.constant 5 : i32
    %c7_i32_247 = arith.constant 7 : i32
    %949 = arith.subi %c7_i32_247, %c5_i32_246 : i32
    %950 = arith.index_cast %c5_i32_246 : i32 to index
    %c0_248 = arith.constant 0 : index
    %c0_249 = arith.constant 0 : index
    %951 = vector.load %arg12[%950, %c0_248, %c0_249] : memref<8x2x256xf32, #tpu.memory_space<vmem>>, vector<1x2x256xf32>
    %952 = vector.shape_cast %951 : vector<1x2x256xf32> to vector<2x256xf32>
    %953 = vector.extract_strided_slice %952 {offsets = [0, 0], sizes = [2, 128], strides = [1, 1]} : vector<2x256xf32> to vector<2x128xf32>
    %954 = arith.truncf %923 : vector<2x32xf32> to vector<2x32xbf16>
    %cst_250 = arith.constant dense<0.000000e+00> : vector<2x128xf32>
    %955 = tpu.matmul %954, %605, %cst_250 {dimension_numbers = #tpu.dot_dimension_numbers<[1], [0], [0], [1], [0, 0, 1, 1], [], []>} : vector<2x32xbf16>, vector<32x128xbf16>, vector<2x128xf32> -> vector<2x128xf32>
    %956 = arith.addf %953, %955 : vector<2x128xf32>
    %957 = arith.index_cast %949 : i32 to index
    %c0_251 = arith.constant 0 : index
    %c0_252 = arith.constant 0 : index
    %958 = vector.load %arg12[%957, %c0_251, %c0_252] : memref<8x2x256xf32, #tpu.memory_space<vmem>>, vector<1x2x256xf32>
    %959 = vector.shape_cast %958 : vector<1x2x256xf32> to vector<2x256xf32>
    %960 = vector.extract_strided_slice %959 {offsets = [0, 128], sizes = [2, 128], strides = [1, 1]} : vector<2x256xf32> to vector<2x128xf32>
    %961 = arith.truncf %948 : vector<2x32xf32> to vector<2x32xbf16>
    %cst_253 = arith.constant dense<0.000000e+00> : vector<2x128xf32>
    %962 = tpu.matmul %961, %606, %cst_253 {dimension_numbers = #tpu.dot_dimension_numbers<[1], [0], [0], [1], [0, 0, 1, 1], [], []>} : vector<2x32xbf16>, vector<32x128xbf16>, vector<2x128xf32> -> vector<2x128xf32>
    %963 = arith.addf %960, %962 : vector<2x128xf32>
    %964 = vector.extract_strided_slice %956 {offsets = [0, 0], sizes = [2, 32], strides = [1, 1]} : vector<2x128xf32> to vector<2x32xf32>
    %965 = arith.negf %964 : vector<2x32xf32>
    %966 = math.exp %965 : vector<2x32xf32>
    %cst_254 = arith.constant 1.000000e+00 : f32
    %967 = vector.broadcast %cst_254 : f32 to vector<2x32xf32>
    %968 = arith.addf %967, %966 : vector<2x32xf32>
    %969 = arith.divf %967, %968 : vector<2x32xf32>
    %970 = vector.extract_strided_slice %956 {offsets = [0, 32], sizes = [2, 32], strides = [1, 1]} : vector<2x128xf32> to vector<2x32xf32>
    %971 = arith.negf %970 : vector<2x32xf32>
    %972 = math.exp %971 : vector<2x32xf32>
    %cst_255 = arith.constant 1.000000e+00 : f32
    %973 = vector.broadcast %cst_255 : f32 to vector<2x32xf32>
    %974 = arith.addf %973, %972 : vector<2x32xf32>
    %975 = arith.divf %973, %974 : vector<2x32xf32>
    %976 = vector.extract_strided_slice %956 {offsets = [0, 64], sizes = [2, 32], strides = [1, 1]} : vector<2x128xf32> to vector<2x32xf32>
    %977 = math.tanh %976 : vector<2x32xf32>
    %978 = vector.extract_strided_slice %956 {offsets = [0, 96], sizes = [2, 32], strides = [1, 1]} : vector<2x128xf32> to vector<2x32xf32>
    %979 = arith.negf %978 : vector<2x32xf32>
    %980 = math.exp %979 : vector<2x32xf32>
    %cst_256 = arith.constant 1.000000e+00 : f32
    %981 = vector.broadcast %cst_256 : f32 to vector<2x32xf32>
    %982 = arith.addf %981, %980 : vector<2x32xf32>
    %983 = arith.divf %981, %982 : vector<2x32xf32>
    %984 = arith.mulf %975, %921 : vector<2x32xf32>
    %985 = arith.mulf %969, %977 : vector<2x32xf32>
    %986 = arith.addf %984, %985 : vector<2x32xf32>
    %987 = math.tanh %986 : vector<2x32xf32>
    %988 = arith.mulf %983, %987 : vector<2x32xf32>
    %989 = vector.extract_strided_slice %963 {offsets = [0, 0], sizes = [2, 32], strides = [1, 1]} : vector<2x128xf32> to vector<2x32xf32>
    %990 = arith.negf %989 : vector<2x32xf32>
    %991 = math.exp %990 : vector<2x32xf32>
    %cst_257 = arith.constant 1.000000e+00 : f32
    %992 = vector.broadcast %cst_257 : f32 to vector<2x32xf32>
    %993 = arith.addf %992, %991 : vector<2x32xf32>
    %994 = arith.divf %992, %993 : vector<2x32xf32>
    %995 = vector.extract_strided_slice %963 {offsets = [0, 32], sizes = [2, 32], strides = [1, 1]} : vector<2x128xf32> to vector<2x32xf32>
    %996 = arith.negf %995 : vector<2x32xf32>
    %997 = math.exp %996 : vector<2x32xf32>
    %cst_258 = arith.constant 1.000000e+00 : f32
    %998 = vector.broadcast %cst_258 : f32 to vector<2x32xf32>
    %999 = arith.addf %998, %997 : vector<2x32xf32>
    %1000 = arith.divf %998, %999 : vector<2x32xf32>
    %1001 = vector.extract_strided_slice %963 {offsets = [0, 64], sizes = [2, 32], strides = [1, 1]} : vector<2x128xf32> to vector<2x32xf32>
    %1002 = math.tanh %1001 : vector<2x32xf32>
    %1003 = vector.extract_strided_slice %963 {offsets = [0, 96], sizes = [2, 32], strides = [1, 1]} : vector<2x128xf32> to vector<2x32xf32>
    %1004 = arith.negf %1003 : vector<2x32xf32>
    %1005 = math.exp %1004 : vector<2x32xf32>
    %cst_259 = arith.constant 1.000000e+00 : f32
    %1006 = vector.broadcast %cst_259 : f32 to vector<2x32xf32>
    %1007 = arith.addf %1006, %1005 : vector<2x32xf32>
    %1008 = arith.divf %1006, %1007 : vector<2x32xf32>
    %1009 = arith.mulf %1000, %946 : vector<2x32xf32>
    %1010 = arith.mulf %994, %1002 : vector<2x32xf32>
    %1011 = arith.addf %1009, %1010 : vector<2x32xf32>
    %1012 = math.tanh %1011 : vector<2x32xf32>
    %1013 = arith.mulf %1008, %1012 : vector<2x32xf32>
    %c6_i32_260 = arith.constant 6 : i32
    %c7_i32_261 = arith.constant 7 : i32
    %1014 = arith.subi %c7_i32_261, %c6_i32_260 : i32
    %1015 = arith.index_cast %c6_i32_260 : i32 to index
    %c0_262 = arith.constant 0 : index
    %c0_263 = arith.constant 0 : index
    %1016 = vector.load %arg12[%1015, %c0_262, %c0_263] : memref<8x2x256xf32, #tpu.memory_space<vmem>>, vector<1x2x256xf32>
    %1017 = vector.shape_cast %1016 : vector<1x2x256xf32> to vector<2x256xf32>
    %1018 = vector.extract_strided_slice %1017 {offsets = [0, 0], sizes = [2, 128], strides = [1, 1]} : vector<2x256xf32> to vector<2x128xf32>
    %1019 = arith.truncf %988 : vector<2x32xf32> to vector<2x32xbf16>
    %cst_264 = arith.constant dense<0.000000e+00> : vector<2x128xf32>
    %1020 = tpu.matmul %1019, %605, %cst_264 {dimension_numbers = #tpu.dot_dimension_numbers<[1], [0], [0], [1], [0, 0, 1, 1], [], []>} : vector<2x32xbf16>, vector<32x128xbf16>, vector<2x128xf32> -> vector<2x128xf32>
    %1021 = arith.addf %1018, %1020 : vector<2x128xf32>
    %1022 = arith.index_cast %1014 : i32 to index
    %c0_265 = arith.constant 0 : index
    %c0_266 = arith.constant 0 : index
    %1023 = vector.load %arg12[%1022, %c0_265, %c0_266] : memref<8x2x256xf32, #tpu.memory_space<vmem>>, vector<1x2x256xf32>
    %1024 = vector.shape_cast %1023 : vector<1x2x256xf32> to vector<2x256xf32>
    %1025 = vector.extract_strided_slice %1024 {offsets = [0, 128], sizes = [2, 128], strides = [1, 1]} : vector<2x256xf32> to vector<2x128xf32>
    %1026 = arith.truncf %1013 : vector<2x32xf32> to vector<2x32xbf16>
    %cst_267 = arith.constant dense<0.000000e+00> : vector<2x128xf32>
    %1027 = tpu.matmul %1026, %606, %cst_267 {dimension_numbers = #tpu.dot_dimension_numbers<[1], [0], [0], [1], [0, 0, 1, 1], [], []>} : vector<2x32xbf16>, vector<32x128xbf16>, vector<2x128xf32> -> vector<2x128xf32>
    %1028 = arith.addf %1025, %1027 : vector<2x128xf32>
    %1029 = vector.extract_strided_slice %1021 {offsets = [0, 0], sizes = [2, 32], strides = [1, 1]} : vector<2x128xf32> to vector<2x32xf32>
    %1030 = arith.negf %1029 : vector<2x32xf32>
    %1031 = math.exp %1030 : vector<2x32xf32>
    %cst_268 = arith.constant 1.000000e+00 : f32
    %1032 = vector.broadcast %cst_268 : f32 to vector<2x32xf32>
    %1033 = arith.addf %1032, %1031 : vector<2x32xf32>
    %1034 = arith.divf %1032, %1033 : vector<2x32xf32>
    %1035 = vector.extract_strided_slice %1021 {offsets = [0, 32], sizes = [2, 32], strides = [1, 1]} : vector<2x128xf32> to vector<2x32xf32>
    %1036 = arith.negf %1035 : vector<2x32xf32>
    %1037 = math.exp %1036 : vector<2x32xf32>
    %cst_269 = arith.constant 1.000000e+00 : f32
    %1038 = vector.broadcast %cst_269 : f32 to vector<2x32xf32>
    %1039 = arith.addf %1038, %1037 : vector<2x32xf32>
    %1040 = arith.divf %1038, %1039 : vector<2x32xf32>
    %1041 = vector.extract_strided_slice %1021 {offsets = [0, 64], sizes = [2, 32], strides = [1, 1]} : vector<2x128xf32> to vector<2x32xf32>
    %1042 = math.tanh %1041 : vector<2x32xf32>
    %1043 = vector.extract_strided_slice %1021 {offsets = [0, 96], sizes = [2, 32], strides = [1, 1]} : vector<2x128xf32> to vector<2x32xf32>
    %1044 = arith.negf %1043 : vector<2x32xf32>
    %1045 = math.exp %1044 : vector<2x32xf32>
    %cst_270 = arith.constant 1.000000e+00 : f32
    %1046 = vector.broadcast %cst_270 : f32 to vector<2x32xf32>
    %1047 = arith.addf %1046, %1045 : vector<2x32xf32>
    %1048 = arith.divf %1046, %1047 : vector<2x32xf32>
    %1049 = arith.mulf %1040, %986 : vector<2x32xf32>
    %1050 = arith.mulf %1034, %1042 : vector<2x32xf32>
    %1051 = arith.addf %1049, %1050 : vector<2x32xf32>
    %1052 = math.tanh %1051 : vector<2x32xf32>
    %1053 = arith.mulf %1048, %1052 : vector<2x32xf32>
    %1054 = vector.extract_strided_slice %1028 {offsets = [0, 0], sizes = [2, 32], strides = [1, 1]} : vector<2x128xf32> to vector<2x32xf32>
    %1055 = arith.negf %1054 : vector<2x32xf32>
    %1056 = math.exp %1055 : vector<2x32xf32>
    %cst_271 = arith.constant 1.000000e+00 : f32
    %1057 = vector.broadcast %cst_271 : f32 to vector<2x32xf32>
    %1058 = arith.addf %1057, %1056 : vector<2x32xf32>
    %1059 = arith.divf %1057, %1058 : vector<2x32xf32>
    %1060 = vector.extract_strided_slice %1028 {offsets = [0, 32], sizes = [2, 32], strides = [1, 1]} : vector<2x128xf32> to vector<2x32xf32>
    %1061 = arith.negf %1060 : vector<2x32xf32>
    %1062 = math.exp %1061 : vector<2x32xf32>
    %cst_272 = arith.constant 1.000000e+00 : f32
    %1063 = vector.broadcast %cst_272 : f32 to vector<2x32xf32>
    %1064 = arith.addf %1063, %1062 : vector<2x32xf32>
    %1065 = arith.divf %1063, %1064 : vector<2x32xf32>
    %1066 = vector.extract_strided_slice %1028 {offsets = [0, 64], sizes = [2, 32], strides = [1, 1]} : vector<2x128xf32> to vector<2x32xf32>
    %1067 = math.tanh %1066 : vector<2x32xf32>
    %1068 = vector.extract_strided_slice %1028 {offsets = [0, 96], sizes = [2, 32], strides = [1, 1]} : vector<2x128xf32> to vector<2x32xf32>
    %1069 = arith.negf %1068 : vector<2x32xf32>
    %1070 = math.exp %1069 : vector<2x32xf32>
    %cst_273 = arith.constant 1.000000e+00 : f32
    %1071 = vector.broadcast %cst_273 : f32 to vector<2x32xf32>
    %1072 = arith.addf %1071, %1070 : vector<2x32xf32>
    %1073 = arith.divf %1071, %1072 : vector<2x32xf32>
    %1074 = arith.mulf %1065, %1011 : vector<2x32xf32>
    %1075 = arith.mulf %1059, %1067 : vector<2x32xf32>
    %1076 = arith.addf %1074, %1075 : vector<2x32xf32>
    %1077 = math.tanh %1076 : vector<2x32xf32>
    %1078 = arith.mulf %1073, %1077 : vector<2x32xf32>
    %c7_i32_274 = arith.constant 7 : i32
    %c7_i32_275 = arith.constant 7 : i32
    %1079 = arith.subi %c7_i32_275, %c7_i32_274 : i32
    %1080 = arith.index_cast %c7_i32_274 : i32 to index
    %c0_276 = arith.constant 0 : index
    %c0_277 = arith.constant 0 : index
    %1081 = vector.load %arg12[%1080, %c0_276, %c0_277] : memref<8x2x256xf32, #tpu.memory_space<vmem>>, vector<1x2x256xf32>
    %1082 = vector.shape_cast %1081 : vector<1x2x256xf32> to vector<2x256xf32>
    %1083 = vector.extract_strided_slice %1082 {offsets = [0, 0], sizes = [2, 128], strides = [1, 1]} : vector<2x256xf32> to vector<2x128xf32>
    %1084 = arith.truncf %1053 : vector<2x32xf32> to vector<2x32xbf16>
    %cst_278 = arith.constant dense<0.000000e+00> : vector<2x128xf32>
    %1085 = tpu.matmul %1084, %605, %cst_278 {dimension_numbers = #tpu.dot_dimension_numbers<[1], [0], [0], [1], [0, 0, 1, 1], [], []>} : vector<2x32xbf16>, vector<32x128xbf16>, vector<2x128xf32> -> vector<2x128xf32>
    %1086 = arith.addf %1083, %1085 : vector<2x128xf32>
    %1087 = arith.index_cast %1079 : i32 to index
    %c0_279 = arith.constant 0 : index
    %c0_280 = arith.constant 0 : index
    %1088 = vector.load %arg12[%1087, %c0_279, %c0_280] : memref<8x2x256xf32, #tpu.memory_space<vmem>>, vector<1x2x256xf32>
    %1089 = vector.shape_cast %1088 : vector<1x2x256xf32> to vector<2x256xf32>
    %1090 = vector.extract_strided_slice %1089 {offsets = [0, 128], sizes = [2, 128], strides = [1, 1]} : vector<2x256xf32> to vector<2x128xf32>
    %1091 = arith.truncf %1078 : vector<2x32xf32> to vector<2x32xbf16>
    %cst_281 = arith.constant dense<0.000000e+00> : vector<2x128xf32>
    %1092 = tpu.matmul %1091, %606, %cst_281 {dimension_numbers = #tpu.dot_dimension_numbers<[1], [0], [0], [1], [0, 0, 1, 1], [], []>} : vector<2x32xbf16>, vector<32x128xbf16>, vector<2x128xf32> -> vector<2x128xf32>
    %1093 = arith.addf %1090, %1092 : vector<2x128xf32>
    %1094 = vector.extract_strided_slice %1086 {offsets = [0, 0], sizes = [2, 32], strides = [1, 1]} : vector<2x128xf32> to vector<2x32xf32>
    %1095 = arith.negf %1094 : vector<2x32xf32>
    %1096 = math.exp %1095 : vector<2x32xf32>
    %cst_282 = arith.constant 1.000000e+00 : f32
    %1097 = vector.broadcast %cst_282 : f32 to vector<2x32xf32>
    %1098 = arith.addf %1097, %1096 : vector<2x32xf32>
    %1099 = arith.divf %1097, %1098 : vector<2x32xf32>
    %1100 = vector.extract_strided_slice %1086 {offsets = [0, 32], sizes = [2, 32], strides = [1, 1]} : vector<2x128xf32> to vector<2x32xf32>
    %1101 = arith.negf %1100 : vector<2x32xf32>
    %1102 = math.exp %1101 : vector<2x32xf32>
    %cst_283 = arith.constant 1.000000e+00 : f32
    %1103 = vector.broadcast %cst_283 : f32 to vector<2x32xf32>
    %1104 = arith.addf %1103, %1102 : vector<2x32xf32>
    %1105 = arith.divf %1103, %1104 : vector<2x32xf32>
    %1106 = vector.extract_strided_slice %1086 {offsets = [0, 64], sizes = [2, 32], strides = [1, 1]} : vector<2x128xf32> to vector<2x32xf32>
    %1107 = math.tanh %1106 : vector<2x32xf32>
    %1108 = vector.extract_strided_slice %1086 {offsets = [0, 96], sizes = [2, 32], strides = [1, 1]} : vector<2x128xf32> to vector<2x32xf32>
    %1109 = arith.negf %1108 : vector<2x32xf32>
    %1110 = math.exp %1109 : vector<2x32xf32>
    %cst_284 = arith.constant 1.000000e+00 : f32
    %1111 = vector.broadcast %cst_284 : f32 to vector<2x32xf32>
    %1112 = arith.addf %1111, %1110 : vector<2x32xf32>
    %1113 = arith.divf %1111, %1112 : vector<2x32xf32>
    %1114 = arith.mulf %1105, %1051 : vector<2x32xf32>
    %1115 = arith.mulf %1099, %1107 : vector<2x32xf32>
    %1116 = arith.addf %1114, %1115 : vector<2x32xf32>
    %1117 = math.tanh %1116 : vector<2x32xf32>
    %1118 = arith.mulf %1113, %1117 : vector<2x32xf32>
    %1119 = vector.extract_strided_slice %1093 {offsets = [0, 0], sizes = [2, 32], strides = [1, 1]} : vector<2x128xf32> to vector<2x32xf32>
    %1120 = arith.negf %1119 : vector<2x32xf32>
    %1121 = math.exp %1120 : vector<2x32xf32>
    %cst_285 = arith.constant 1.000000e+00 : f32
    %1122 = vector.broadcast %cst_285 : f32 to vector<2x32xf32>
    %1123 = arith.addf %1122, %1121 : vector<2x32xf32>
    %1124 = arith.divf %1122, %1123 : vector<2x32xf32>
    %1125 = vector.extract_strided_slice %1093 {offsets = [0, 32], sizes = [2, 32], strides = [1, 1]} : vector<2x128xf32> to vector<2x32xf32>
    %1126 = arith.negf %1125 : vector<2x32xf32>
    %1127 = math.exp %1126 : vector<2x32xf32>
    %cst_286 = arith.constant 1.000000e+00 : f32
    %1128 = vector.broadcast %cst_286 : f32 to vector<2x32xf32>
    %1129 = arith.addf %1128, %1127 : vector<2x32xf32>
    %1130 = arith.divf %1128, %1129 : vector<2x32xf32>
    %1131 = vector.extract_strided_slice %1093 {offsets = [0, 64], sizes = [2, 32], strides = [1, 1]} : vector<2x128xf32> to vector<2x32xf32>
    %1132 = math.tanh %1131 : vector<2x32xf32>
    %1133 = vector.extract_strided_slice %1093 {offsets = [0, 96], sizes = [2, 32], strides = [1, 1]} : vector<2x128xf32> to vector<2x32xf32>
    %1134 = arith.negf %1133 : vector<2x32xf32>
    %1135 = math.exp %1134 : vector<2x32xf32>
    %cst_287 = arith.constant 1.000000e+00 : f32
    %1136 = vector.broadcast %cst_287 : f32 to vector<2x32xf32>
    %1137 = arith.addf %1136, %1135 : vector<2x32xf32>
    %1138 = arith.divf %1136, %1137 : vector<2x32xf32>
    %1139 = arith.mulf %1130, %1076 : vector<2x32xf32>
    %1140 = arith.mulf %1124, %1132 : vector<2x32xf32>
    %1141 = arith.addf %1139, %1140 : vector<2x32xf32>
    %1142 = math.tanh %1141 : vector<2x32xf32>
    %1143 = arith.mulf %1138, %1142 : vector<2x32xf32>
    %c8_i32_288 = arith.constant 8 : i32
    %1144 = tpu.concatenate %1118, %1143 in 1 : vector<2x32xf32>, vector<2x32xf32> -> vector<2x64xf32>
    %c1 = arith.constant 1 : index
    %c0_289 = arith.constant 0 : index
    %c0_290 = arith.constant 0 : index
    %1145 = vector.load %arg10[%c1, %c0_289, %c0_290] : memref<2x2x64xf32, #tpu.memory_space<vmem>>, vector<1x2x64xf32>
    %1146 = vector.shape_cast %1145 : vector<1x2x64xf32> to vector<2x64xf32>
    %1147 = vector.shape_cast %1144 : vector<2x64xf32> to vector<1x2x64xf32>
    tpu.vector_store %arg10[%c1, %c0_289, %c0_290], %1147 {strides = array<i32>} : memref<2x2x64xf32, #tpu.memory_space<vmem>>, vector<1x2x64xf32>,
    %1148 = tpu.concatenate %1116, %1141 in 1 : vector<2x32xf32>, vector<2x32xf32> -> vector<2x64xf32>
    %c1_291 = arith.constant 1 : index
    %c0_292 = arith.constant 0 : index
    %c0_293 = arith.constant 0 : index
    %1149 = vector.load %arg11[%c1_291, %c0_292, %c0_293] : memref<2x2x64xf32, #tpu.memory_space<vmem>>, vector<1x2x64xf32>
    %1150 = vector.shape_cast %1149 : vector<1x2x64xf32> to vector<2x64xf32>
    %1151 = vector.shape_cast %1148 : vector<2x64xf32> to vector<1x2x64xf32>
    tpu.vector_store %arg11[%c1_291, %c0_292, %c0_293], %1151 {strides = array<i32>} : memref<2x2x64xf32, #tpu.memory_space<vmem>>, vector<1x2x64xf32>,
    return
  }
  func.func @transform_0(%arg0: i32) -> (i32, i32, i32) {
    %c0_i32 = arith.constant 0 : i32
    %c0_i32_0 = arith.constant 0 : i32
    %c0_i32_1 = arith.constant 0 : i32
    %c0_i32_2 = arith.constant 0 : i32
    return %c0_i32, %c0_i32_0, %c0_i32_1 : i32, i32, i32
  }
  func.func @transform_1(%arg0: i32) -> (i32, i32) {
    %c0_i32 = arith.constant 0 : i32
    %c0_i32_0 = arith.constant 0 : i32
    %c0_i32_1 = arith.constant 0 : i32
    return %c0_i32, %c0_i32_0 : i32, i32
  }
  func.func @transform_2(%arg0: i32) -> (i32, i32) {
    %c0_i32 = arith.constant 0 : i32
    %c0_i32_0 = arith.constant 0 : i32
    %c0_i32_1 = arith.constant 0 : i32
    return %c0_i32, %c0_i32_0 : i32, i32
  }
  func.func @transform_3(%arg0: i32) -> (i32, i32) {
    %c0_i32 = arith.constant 0 : i32
    %c0_i32_0 = arith.constant 0 : i32
    %c0_i32_1 = arith.constant 0 : i32
    return %c0_i32, %c0_i32_0 : i32, i32
  }
  func.func @transform_4(%arg0: i32) -> (i32, i32) {
    %c0_i32 = arith.constant 0 : i32
    %c0_i32_0 = arith.constant 0 : i32
    %c0_i32_1 = arith.constant 0 : i32
    return %c0_i32, %c0_i32_0 : i32, i32
  }
  func.func @transform_5(%arg0: i32) -> (i32, i32) {
    %c0_i32 = arith.constant 0 : i32
    %c0_i32_0 = arith.constant 0 : i32
    %c0_i32_1 = arith.constant 0 : i32
    return %c0_i32, %c0_i32_0 : i32, i32
  }
  func.func @transform_6(%arg0: i32) -> (i32, i32) {
    %c0_i32 = arith.constant 0 : i32
    %c0_i32_0 = arith.constant 0 : i32
    %c0_i32_1 = arith.constant 0 : i32
    return %c0_i32, %c0_i32_0 : i32, i32
  }
  func.func @transform_7(%arg0: i32) -> (i32, i32) {
    %c0_i32 = arith.constant 0 : i32
    %c0_i32_0 = arith.constant 0 : i32
    %c0_i32_1 = arith.constant 0 : i32
    return %c0_i32, %c0_i32_0 : i32, i32
  }
  func.func @transform_8(%arg0: i32) -> (i32, i32) {
    %c0_i32 = arith.constant 0 : i32
    %c0_i32_0 = arith.constant 0 : i32
    %c0_i32_1 = arith.constant 0 : i32
    return %c0_i32, %c0_i32_0 : i32, i32
  }
  func.func @transform_9(%arg0: i32) -> (i32, i32, i32) {
    %c0_i32 = arith.constant 0 : i32
    %c0_i32_0 = arith.constant 0 : i32
    %c0_i32_1 = arith.constant 0 : i32
    %c0_i32_2 = arith.constant 0 : i32
    return %c0_i32, %c0_i32_0, %c0_i32_1 : i32, i32, i32
  }
  func.func @transform_10(%arg0: i32) -> (i32, i32, i32) {
    %c0_i32 = arith.constant 0 : i32
    %c0_i32_0 = arith.constant 0 : i32
    %c0_i32_1 = arith.constant 0 : i32
    %c0_i32_2 = arith.constant 0 : i32
    return %c0_i32, %c0_i32_0, %c0_i32_1 : i32, i32, i32
  }
}

</mosaic_0001>

<bundles_post_ra>
// kernel: lstm_bi_enc_forward.3
= control target key start
LH: loop header
LB: loop body
LE: loop exit
PB: predicated region body
PF: predicated region fallthrough
CT: control target
= control target key end

     0   :  { %13 = vsyncpa [#allocation3], 0  ;;  %v425_v3 = vmov 0.0|0.0   ;;  %vm426_vm0 = vmmov 0   ;;  %v427_v11 = vmov 0.0   ;;  %v52_v14 = vlaneseq  ;;  %s570_s0 = inlined_call_operand.vmem [shape: f32[2,2,64], index: 0, kind: input, shape index: {}]   ;;  %s571_s1 = inlined_call_operand.vmem [shape: f32[2,2,64], index: 1, kind: input, shape index: {}]   ;;  %s572_s2 = inlined_call_operand.vmem [shape: f32[64,32], index: 2, kind: input, shape index: {}]   ;;  %s573_s3 = inlined_call_operand.vmem [shape: f32[1,32], index: 3, kind: input, shape index: {}]   ;;  %s574_s4 = inlined_call_operand.vmem [shape: f32[64,32], index: 4, kind: input, shape index: {}]   ;;  %s575_s5 = inlined_call_operand.vmem [shape: f32[1,32], index: 5, kind: input, shape index: {}]   ;;  %s576_s6 = inlined_call_operand.hbm [shape: f32[2,2,32], index: 6, kind: output, shape index: {0}]   ;;  %s577_s7 = inlined_call_operand.hbm [shape: f32[2,2,32], index: 7, kind: output, shape index: {1}]  }
   0x1   :  { %v31_v0 = vld [vmem:[%s572_s2] sm:$0xff]  ;;  %v32_v1 = vld [vmem:[%s572_s2 + $0x8] sm:$0xff]  ;;  %345 = vmatprep.subr.bf16.mxu0 %v425_v3  ;;  %357 = vmatprep.subr.bf16.mxu1 %v425_v3  ;;  %v33_v6 = vld [vmem:[%s572_s2 + $0x10] sm:$0xff]  ;;  %v428_v12 = vmov 1983009808  }
   0x2   :  { %v129_v2 = vld [vmem:[%s574_s4] sm:$0xff]  ;;  %v346_v4 = vpack.c.bf16 %v32_v1, %v31_v0  ;;  %v130_v5 = vld [vmem:[%s574_s4 + $0x8] sm:$0xff]  ;;  %v34_v7 = vld [vmem:[%s572_s2 + $0x18] sm:$0xff]  ;;  %323 = vmatprep.mubr.msk.f32.mxu0 %vm426_vm0, %v427_v11  ;;  %342 = vmatprep.mubr.msk.f32.mxu1 %vm426_vm0, %v427_v11  ;;  %v50_v13 = vunpack.c.l.s4 %v428_v12  ;;  %v53_v23 = vshrl.u32 %v52_v14, 7 }
   0x3   :  { %v358_v8 = vpack.c.bf16 %v130_v5, %v129_v2  ;;  %v131_v9 = vld [vmem:[%s574_s4 + $0x10] sm:$0xff]  ;;  %v132_v10 = vld [vmem:[%s574_s4 + $0x18] sm:$0xff]  ;;  %v349_v15 = vpack.c.bf16 %v34_v7, %v33_v6  ;;  %v35_v17 = vld [vmem:[%s572_s2 + $0x20] sm:$0xff] }
   0x4   :  { %347 = vmatpush3.bf16.msra.mxu0 %v346_v4  ;;  %v361_v16 = vpack.c.bf16 %v132_v10, %v131_v9  ;;  %v36_v18 = vld [vmem:[%s572_s2 + $0x28] sm:$0xff]  ;;  %v133_v19 = vld [vmem:[%s574_s4 + $0x20] sm:$0xff]  ;;  %v37_v21 = vld [vmem:[%s572_s2 + $0x30] sm:$0xff]  ;;  %v51_v22 = vunpack.c.0.s8 %v50_v13 }
   0x5   :  { %359 = vmatpush3.bf16.msra.mxu1 %v358_v8  ;;  %348 = vmatprep.subr.bf16.mxu0 %v425_v3  ;;  %v134_v20 = vld [vmem:[%s574_s4 + $0x28] sm:$0xff]  ;;  %v352_v24 = vpack.c.bf16 %v36_v18, %v35_v17  ;;  %v27_v25 = vld [vmem:[%s570_s0] sm:$0x3]  ;;  %v28_v26 = vld [vmem:[%s570_s0 + $0x2] sm:$0x3] }
   0x6   :  { %360 = vmatprep.subr.bf16.mxu1 %v425_v3 }
   0x8   :  { %350 = vmatpush3.bf16.msra.mxu0 %v349_v15 }
   0x9   :  { %14 = vsyncpa [#allocation5], 0  ;;  %362 = vmatpush3.bf16.msra.mxu1 %v361_v16  ;;  %351 = vmatprep.subr.bf16.mxu0 %v425_v3  ;;  %v364_v27 = vpack.c.bf16 %v134_v20, %v133_v19  ;;  %v38_v28 = vld [vmem:[%s572_s2 + $0x38] sm:$0xff]  ;;  %v29_v29 = vld [vmem:[%s571_s1] sm:$0x3]  ;;  %v48_v33 = vcombine.low %v27_v25, %v28_v26  ;;  %v54_v34 = vsub.s32 %v51_v22, %v53_v23  ;;  %vm56_vm1 = vcmask 523264  }
   0xa   :  { %v30_v30 = vld [vmem:[%s571_s1 + $0x2] sm:$0x3]  ;;  %363 = vmatprep.subr.bf16.mxu1 %v425_v3  ;;  %v135_v31 = vld [vmem:[%s574_s4 + $0x30] sm:$0xff]  ;;  %v136_v32 = vld [vmem:[%s574_s4 + $0x38] sm:$0xff]  ;;  %v355_v35 = vpack.c.bf16 %v38_v28, %v37_v21  ;;  %s429_s18 = smov [#allocation2]   ;;  %vm237_vm2 = vcmask 254976  }
   0xb   :  { %v146_v36 = vcombine.low %v29_v29, %v30_v30  ;;  %v367_v37 = vpack.c.bf16 %v136_v32, %v135_v31  ;;  %v55_v38 = vrot.slane %v48_v33, %v54_v34  ;;  %v285_v40 = vld [vmem:[%s573_s3] ss:$0 sm:$0xff]  ;;  %s258_s19 = sshll.u32 %s429_s18, 4  ;;  %s430_s20 = smov [#allocation4]   ;;  %s259_s19 = int_to_ptr.vmem [resolvable:$true] %s258_s19 }
   0xc   :  { %353 = vmatpush3.bf16.msra.mxu0 %v352_v24  ;;  %v287_v41 = vld [vmem:[%s575_s5] ss:$0 sm:$0xff]  ;;  %s270_s21 = sshll.u32 %s430_s20, 4  ;;  %s377_s3 = scalar_lea.vmem %s259_s19, 64  ;;  %s539_s21 = int_to_ptr.vmem [resolvable:$true] %s270_s21 }
   0xd   :  { %365 = vmatpush3.bf16.msra.mxu1 %v364_v27  ;;  %354 = vmatprep.subr.bf16.mxu0 %v425_v3  ;;  %v153_v39 = vrot.slane %v146_v36, %v54_v34  ;;  %p378_p0 = scmp.ne.s32.totalorder %s259_s19, %s377_s3  ;;  %p382_p1 = scmp.lt.s32.totalorder %s259_s19, %s259_s19 }
   0xe   :  { %366 = vmatprep.subr.bf16.mxu1 %v425_v3  ;;  %p383_p2 = scmp.lt.s32.totalorder %s377_s3, %s377_s3 }
  0x10   :  { %356 = vmatpush3.bf16.msra.mxu0 %v355_v35  ;;  %p384_p3 = por %p383_p2, %p382_p1 }
  0x11   :  { %368 = vmatpush3.bf16.msra.mxu1 %v367_v37 }
  0x12   :  { %p385_p4 = pnand %p384_p3, %p378_p0 }
  0x13   :  { %324 = vmatmul.mubr.msk.f32.vlgmr.msra.gmra.mrb[0].mxu0 %vm56_vm1, %v55_v38 }
  0x14   :  { %343 = vmatmul.mubr.msk.f32.vlgmr.msra.gmra.mrb[0].mxu1 %vm56_vm1, %v153_v39 }
  0xe6   :  { %v125_v42 = vpop.f32.mrb[0].mxu0 }
  0xe7   :  { %v126_v43 = vadd.f32 %v285_v40, %v125_v42  ;;  %v222_v44 = vpop.f32.mrb[0].mxu1  ;;  %v325_v45 = vpop.f32.mrb[1].mxu0 }
  0xe8   :  { %v223_v46 = vadd.f32 %v287_v41, %v222_v44  ;;  %v344_v47 = vpop.f32.mrb[1].mxu1 }
  0xe9   :  { %v233_v48 = vrot.slane %v126_v43, %v54_v34 }
  0xea   :  { %v247_v49 = vrot.slane %v223_v46, %v54_v34 }
  0xeb   :  { %v234_v50 = vcombine.high %v233_v48, %v233_v48  ;;  %238 = vst.msk [vmem:[#allocation2] sm:$0x3] %vm237_vm2, %v233_v48 }
  0xec   :  { %v248_v51 = vcombine.high %v247_v49, %v247_v49  ;;  %251 = vst.msk [vmem:[#allocation4] sm:$0x3] %vm237_vm2, %v247_v49 }
  0xed   :  { %239 = vst.msk [vmem:[#allocation2 + $0x2] sm:$0x3] %vm237_vm2, %v234_v50 }
  0xee   :  { %252 = vst.msk [vmem:[#allocation4 + $0x2] sm:$0x3] %vm237_vm2, %v248_v51 }
  0xef   :  { %388 = shalt.err (!%p385_p4)
}
  0xf0   :  { %s389_s23 = scalar_lea.hbm %s576_s6, 64 }
  0xf1   :  { %p390_p5 = scmp.ne.s32.totalorder %s576_s6, %s389_s23  ;;  %p393_p6 = scmp.lt.u32.totalorder %s389_s23, %s576_s6 }
  0xf3   :  { %p395_p7 = pnand %p393_p6, %p390_p5 }
  0xf5   :  { %398 = shalt.err (!%p395_p7)
}
  0xf6   :  { %s431_s28 = smov 32   ;;  %s432_s29 = smov 2  }
  0xf7   :  { %264 = dma.vmem_to_hbm [thread:$0]  %s259_s19, 64, %s576_s6, [#allocation3], %s431_s28, %s431_s28, %s432_s29  }
  0xf8   :  { %s399_s9 = scalar_lea.vmem %s539_s21, 64  ;;  %p404_p9 = scmp.lt.s32.totalorder %s539_s21, %s539_s21 }
  0xf9   :  { %p400_p8 = scmp.ne.s32.totalorder %s539_s21, %s399_s9  ;;  %p405_p10 = scmp.lt.s32.totalorder %s399_s9, %s399_s9 }
  0xfb   :  { %p406_p11 = por %p405_p10, %p404_p9 }
  0xfd   :  { %p407_p12 = pnand %p406_p11, %p400_p8 }
  0xff   :  { %410 = shalt.err (!%p407_p12)
}
 0x100   :  { %s411_s12 = scalar_lea.hbm %s577_s7, 64 }
 0x101   :  { %p412_p13 = scmp.ne.s32.totalorder %s577_s7, %s411_s12  ;;  %p415_p0 = scmp.lt.u32.totalorder %s411_s12, %s577_s7 }
 0x103   :  { %p417_p1 = pnand %p415_p0, %p412_p13 }
 0x105   :  { %420 = shalt.err (!%p417_p1)
}
 0x106   :  { %276 = dma.vmem_to_hbm [thread:$0]  %s539_s21, 64, %s577_s7, [#allocation5], %s431_s28, %s431_s28, %s432_s29  }
 0x107   :  { %421 = dma.done.wait [#allocation3], 64  }
 0x108   :  { %422 = vsyncadd [#allocation3], 4294967232 }
 0x109   :  { %423 = dma.done.wait [#allocation5], 64  }
 0x10a   :  { %424 = vsyncadd [#allocation5], 4294967232 }
 0x10b   :  { %283 = vsyncpa [#allocation3], 1 }
 0x10c   :  { %284 = vsyncpa [#allocation5], 1 }

// kernel: lstm_bi_enc_forward.2
= control target key start
LH: loop header
LB: loop body
LE: loop exit
PB: predicated region body
PF: predicated region fallthrough
CT: control target
= control target key end

     0   :  { %v57_v0 = vlaneseq  ;;  %v3995_v2 = vmov 0   ;;  %v3996_v3 = vmov 1966171168   ;;  %v3997_v11 = vmov 0.0   ;;  %s4001_s23 = smov 32   ;;  %s4852_s1 = inlined_call_operand.vmem [shape: bf16[32,256], index: 1, kind: input, shape index: {}]   ;;  %s4853_s0 = inlined_call_operand.vmem [shape: bf16[8,2,32], index: 0, kind: input, shape index: {}]   ;;  %s4854_s2 = inlined_call_operand.vmem [shape: bf16[32,128], index: 2, kind: input, shape index: {}]   ;;  %s4855_s3 = inlined_call_operand.vmem [shape: bf16[32,128], index: 3, kind: input, shape index: {}]   ;;  %s4856_s4 = inlined_call_operand.vmem [shape: f32[1,256], index: 4, kind: input, shape index: {}]   ;;  %s4857_s5 = inlined_call_operand.vmem [shape: bf16[64,256], index: 5, kind: input, shape index: {}]   ;;  %s4858_s6 = inlined_call_operand.vmem [shape: bf16[32,128], index: 6, kind: input, shape index: {}]   ;;  %s4859_s7 = inlined_call_operand.vmem [shape: bf16[32,128], index: 7, kind: input, shape index: {}]   ;;  %s4860_s8 = inlined_call_operand.vmem [shape: f32[1,256], index: 8, kind: input, shape index: {}]   ;;  %s4861_s9 = inlined_call_operand.vmem [shape: f32[2,2,64], index: 9, kind: output, shape index: {0}]   ;;  %s4862_s10 = inlined_call_operand.vmem [shape: f32[2,2,64], index: 10, kind: output, shape index: {1}]  }
   0x1   :  { %v3709_v1 = vld [vmem:[%s4852_s1 + $0x4] ss:$8 sps:$4 sm:$0xff]   ;;  %180 = vmatprep.mubr.bf16.mxu0 %v3995_v2  ;;  %v80_v4 = vunpack.c.l.s4 %v3996_v3  ;;  %v3711_v5 = vld [vmem:[%s4852_s1] ss:$8 sps:$4 sm:$0xff]   ;;  %v3712_v7 = vld [vmem:[%s4852_s1 + $0x14] ss:$8 sps:$4 sm:$0xff]   ;;  %3441 = vmatprep.subr.bf16.mxu1 %v3997_v11 }
   0x2   :  { %v4065_v6 = vshrl.u32 %v57_v0, 7  ;;  %148 = vmatprep.subr.bf16.mxu0 %v3709_v1  ;;  %v3714_v8 = vld [vmem:[%s4852_s1 + $0x10] ss:$8 sps:$4 sm:$0xff]   ;;  %v48_v9 = vld [vmem:[%s4853_s0] sm:$0x1]  ;;  %vm3998_vm0 = vmmov 0  }
   0x3   :  { %v81_v10 = vunpack.c.0.s8 %v80_v4  ;;  %149 = vmatpush1.bf16.msra.mxu0 %v3711_v5  ;;  %v49_v12 = vld [vmem:[%s4853_s0 + $0x1] sm:$0x1]  ;;  %v50_v13 = vld [vmem:[%s4853_s0 + $0x2] sm:$0x1]  ;;  %v51_v14 = vld [vmem:[%s4853_s0 + $0x3] sm:$0x1]  ;;  %3445 = vmatprep.mubr.msk.bf16.mxu1 %vm3998_vm0, %v3997_v11 }
   0x4   :  { %150 = vmatprep.subr.bf16.mxu0 %v3712_v7  ;;  %v52_v15 = vld [vmem:[%s4853_s0 + $0x4] sm:$0x1]  ;;  %v53_v16 = vld [vmem:[%s4853_s0 + $0x5] sm:$0x1]  ;;  %v54_v17 = vld [vmem:[%s4853_s0 + $0x6] sm:$0x1]  ;;  %v75_v18 = vcombine.low %v48_v9, %v49_v12  ;;  %v76_v19 = vcombine.low %v50_v13, %v51_v14 }
   0x5   :  { %v84_v20 = vsub.s32 %v81_v10, %v4065_v6  ;;  %v55_v21 = vld [vmem:[%s4853_s0 + $0x7] sm:$0x1]  ;;  %v77_v22 = vcombine.low %v52_v15, %v53_v16  ;;  %v4110_v30 = vld [vmem:[%s4854_s2 + $0x8] sm:$0xff]   ;;  %vm144_vm1 = vcmask 261120   ;;  %v59_v37 = vsub.s32 0, %v4065_v6 }
   0x6   :  { %v78_v23 = vcombine.low %v54_v17, %v55_v21  ;;  %v4102_v26 = vld [vmem:[%s4854_s2] sm:$0xff]   ;;  %v4128_v36 = vld [vmem:[%s4855_s3 + $0x8] sm:$0xff]   ;;  %v3999_v38 = vmov 1983009808   ;;  %v63_v41 = vsub.s32 1, %v4065_v6  ;;  %vm421_vm2 = vcmask 254976  }
   0x7   :  { %v85_v24 = vrot.slane %v75_v18, %v84_v20  ;;  %v92_v25 = vrot.slane %v76_v19, %v84_v20  ;;  %151 = vmatpush1.bf16.msra.mxu0 %v3714_v8  ;;  %v99_v27 = vrot.slane %v77_v22, %v84_v20  ;;  %3442 = vmatpush3.bf16.msra.mxu1 %v4102_v26  ;;  %v4118_v34 = vld [vmem:[%s4855_s3] sm:$0xff]   ;;  %v198_v39 = vunpack.c.l.s4 %v3999_v38 }
   0x8   :  { %v106_v28 = vrot.slane %v78_v23, %v84_v20  ;;  %3449 = vmatprep.subr.bf16.mxu0 %v3997_v11  ;;  %3443 = vmatprep.subr.bf16.mxu1 %v3997_v11  ;;  %v47_v40 = vld [vmem:[%s4856_s4] sm:$0x3]  ;;  %s4000_s4 = smov 64   ;;  %vm1670_vm3 = vcmask 517120  }
   0x9   :  { %v107_v29 = vcombine.low %v85_v24, %v92_v25  ;;  %v60_v42 = vrot.slane %v47_v40, %v59_v37  ;;  %v199_v43 = vunpack.c.0.s8 %v198_v39  ;;  %v64_v44 = vrot.slane %v47_v40, %v63_v41 }
   0xa   :  { %v108_v31 = vcombine.low %v99_v27, %v106_v28 }
   0xb   :  { %v115_v32 = vrot.slane %v107_v29, %v84_v20  ;;  %3444 = vmatpush3.bf16.msra.mxu1 %v4110_v30  ;;  %v4157_v51 = vsub.s32 %v199_v43, %v4065_v6 }
   0xc   :  { %v122_v33 = vrot.slane %v108_v31, %v84_v20  ;;  %3457 = vmatprep.subr.bf16.mxu1 %v3997_v11 }
   0xe   :  { %v123_v35 = vcombine.low %v115_v32, %v122_v33  ;;  %3446 = vmatmul.mubr.bf16.vlgmr.msra.gmra.mrb[0].mxu1 %v3995_v2 }
   0xf   :  { %3458 = vmatpush3.bf16.msra.mxu1 %v4102_v26  ;;  %3461 = vmatprep.mubr.msk.bf16.mxu1 %vm3998_vm0, %v3997_v11 }
  0x10   :  { %3256 = vmatmul.mubr.msk.bf16.vlgmr.msra.gmra.mrb[0].mxu0 %vm144_vm1, %v123_v35  ;;  %3459 = vmatprep.subr.bf16.mxu1 %v3997_v11 }
  0x11   :  { %3450 = vmatpush3.bf16.msra.mxu0 %v4118_v34  ;;  %3453 = vmatprep.mubr.msk.bf16.mxu0 %vm3998_vm0, %v3997_v11 }
  0x12   :  { %3451 = vmatprep.subr.bf16.mxu0 %v3997_v11 }
  0x13   :  { %3460 = vmatpush3.bf16.msra.mxu1 %v4110_v30 }
  0x14   :  { %3473 = vmatprep.subr.bf16.mxu1 %v3997_v11 }
  0x15   :  { %3452 = vmatpush3.bf16.msra.mxu0 %v4128_v36 }
  0x16   :  { %3465 = vmatprep.subr.bf16.mxu0 %v3997_v11 }
  0x18   :  { %3454 = vmatmul.mubr.bf16.vlgmr.msra.gmra.mrb[4].mxu0 %v3995_v2 }
  0x19   :  { %3466 = vmatpush3.bf16.msra.mxu0 %v4118_v34  ;;  %3469 = vmatprep.mubr.msk.bf16.mxu0 %vm3998_vm0, %v3997_v11 }
  0x1a   :  { %3467 = vmatprep.subr.bf16.mxu0 %v3997_v11 }
  0x1d   :  { %3468 = vmatpush3.bf16.msra.mxu0 %v4128_v36 }
  0x1e   :  { %3481 = vmatprep.subr.bf16.mxu0 %v3997_v11 }
  0xe1   :  { %v297_v45 = vpop.f32.mrb[0].mxu1 }
  0xe2   :  { %v3447_v47 = vpop.f32.mrb[1].mxu1 }
  0xe3   :  { %v182_v46 = vpop.f32.mrb[0].mxu0  ;;  %v300_v50 = vpop.f32.mrb[2].mxu1 }
  0xe4   :  { %v183_v48 = vadd.f32 %v182_v46, %v60_v42  ;;  %v184_v49 = vpop.f32.mrb[1].mxu0  ;;  %v3448_v54 = vpop.f32.mrb[3].mxu1 }
  0xe5   :  { %v185_v52 = vadd.f32 %v184_v49, %v64_v44  ;;  %v186_v53 = vpop.f32.mrb[2].mxu0 }
  0xe6   :  { %v187_v55 = vadd.f32 %v186_v53, %v60_v42  ;;  %v188_v56 = vpop.f32.mrb[3].mxu0 }
  0xe7   :  { %v195_v57 = vcombine.low %v183_v48, %v185_v52  ;;  %v196_v58 = vcombine.high %v183_v48, %v185_v52  ;;  %v189_v59 = vadd.f32 %v188_v56, %v64_v44 }
  0xe9   :  { %v203_v60 = vrot.slane %v195_v57, %v4157_v51  ;;  %v210_v61 = vrot.slane %v196_v58, %v4157_v51  ;;  %3257 = vst.sshfl [vmem:[#allocation2] sm:$0x33 pattern:$0x76325410] %v195_v57  ;;  %v213_v62 = vcombine.low %v187_v55, %v189_v59  ;;  %v214_v63 = vcombine.high %v187_v55, %v189_v59 }
  0xea   :  { %3258 = vst.sshfl [vmem:[#allocation2 + $0x8] sm:$0x33 pattern:$0x76325410] %v196_v58 }
  0xeb   :  { %v211_v0 = vcombine.high %v203_v60, %v203_v60  ;;  %v212_v1 = vcombine.high %v210_v61, %v210_v61  ;;  %v221_v3 = vrot.slane %v213_v62, %v4157_v51  ;;  %v228_v4 = vrot.slane %v214_v63, %v4157_v51  ;;  %3259 = vst.sshfl [vmem:[#allocation2 + $0x10] sm:$0x33 pattern:$0x76325410] %v213_v62  ;;  %v352_v5 = vpop.f32.mrb[4].mxu0 }
  0xec   :  { %3260 = vst.sshfl [vmem:[#allocation2 + $0x18] sm:$0x33 pattern:$0x76325410] %v214_v63  ;;  %v3455_v7 = vpop.f32.mrb[5].mxu0 }
  0xed   :  { %240 = vst [vmem:[#allocation2 + $0x4] sm:$0xf] %v211_v0  ;;  %242 = vst [vmem:[#allocation2 + $0xc] sm:$0xf] %v212_v1  ;;  %v229_v8 = vcombine.high %v221_v3, %v221_v3  ;;  %v230_v9 = vcombine.high %v228_v4, %v228_v4  ;;  %v355_v10 = vpop.f32.mrb[6].mxu0 }
  0xee   :  { %v3456_v12 = vpop.f32.mrb[7].mxu0 }
  0xef   :  { %244 = vst [vmem:[#allocation2 + $0x14] sm:$0xf] %v229_v8  ;;  %246 = vst [vmem:[#allocation2 + $0x1c] sm:$0xf] %v230_v9 }
  0xf0   :  { %v247_v15 = vld [vmem:[#allocation2] sm:$0xf] }
  0xf1   :  { %v303_v17 = vadd.f32 %v297_v45, %v247_v15 }
  0xf3   :  { %v3265_v21 = vmul.f32 -1.442695, %v303_v17  ;;  %v487_v55 = vld [vmem:[#allocation2 + $0x18] sm:$0xf] }
  0xf4   :  { %v536_v56 = vrot.slane %v487_v55, 2  ;;  %v437_v62 = vld [vmem:[#allocation2 + $0x4] sm:$0xf] }
  0xf6   :  { %v305_v13 = vld [vmem:[#allocation2 + $0x1c] sm:$0xf] }
  0xf7   :  { %v359_v14 = vrot.slane %v305_v13, 2 }
  0xf9   :  { %v361_v16 = vadd.f32 %v359_v14, %v352_v5 }
  0xfb   :  { %3735 = vtanh.f32 %v361_v16  ;;  %v3266_v20 = vmul.f32 -1.442695, %v361_v16 }
  0xfc   :  { %3737 = vtanh.f32 %v303_v17 }
  0xfd   :  { %3739 = vpow2.f32 %v3266_v20 }
  0xfe   :  { %3741 = vpow2.f32 %v3265_v21 }
 0x105   :  { %v3736_v18 = vpop.eup %3735 }
 0x106   :  { %395 = vrot.lane.b32.xlu0 %v3736_v18, %s4000_s4  ;;  %v3738_v19 = vpop.eup %3737 }
 0x107   :  { %v3740_v22 = vpop.eup %3739 }
 0x108   :  { %v389_v23 = vadd.f32 1.0, %v3740_v22  ;;  %v3742_v24 = vpop.eup %3741 }
 0x109   :  { %v365_v25 = vadd.f32 1.0, %v3742_v24 }
 0x10a   :  { %371 = vrot.lane.b32.xlu0 %v3738_v19, %s4000_s4  ;;  %3743 = vrcp.f32 %v389_v23 }
 0x10b   :  { %3745 = vrcp.f32 %v365_v25 }
 0x114   :  { %v3744_v27 = vpop.eup %3743 }
 0x115   :  { %v3746_v31 = vpop.eup %3745  ;;  %v393_v35 = vmul.f32 0.0, %v3744_v27 }
 0x116   :  { %v369_v40 = vmul.f32 0.0, %v3746_v31 }
 0x178   :  { %v396_v28 = vpop.permute.xlu0 %395 }
 0x179   :  { %v398_v29 = vmul.f32 %v3744_v27, %v396_v28 }
 0x17b   :  { %400 = vrot.lane.b32.xlu1 %v398_v29, %s4001_s23 }
 0x17c   :  { %v372_v32 = vpop.permute.xlu0 %371 }
 0x17d   :  { %v374_v33 = vmul.f32 %v3746_v31, %v372_v32 }
 0x17f   :  { %376 = vrot.lane.b32.xlu1 %v374_v33, %s4001_s23 }
 0x1ed   :  { %v401_v38 = vpop.permute.xlu1 %400 }
 0x1ee   :  { %v4167_v39 = vadd.f32 %v401_v38, %v393_v35 }
 0x1f0   :  { %3747 = vtanh.f32 %v4167_v39 }
 0x1f1   :  { %v377_v42 = vpop.permute.xlu1 %376 }
 0x1f2   :  { %v4170_v43 = vadd.f32 %v377_v42, %v369_v40 }
 0x1f4   :  { %3749 = vtanh.f32 %v4170_v43 }
 0x1fa   :  { %v3748_v44 = vpop.eup %3747 }
 0x1fb   :  { %406 = vrot.lane.b32.xlu0 %v3748_v44, %s4000_s4 }
 0x1fe   :  { %v3750_v45 = vpop.eup %3749 }
 0x1ff   :  { %382 = vrot.lane.b32.xlu1 %v3750_v45, %s4000_s4 }
 0x26d   :  { %v407_v46 = vpop.permute.xlu0 %406 }
 0x26e   :  { %v4175_v47 = vmul.f32 %v3744_v27, %v407_v46 }
 0x270   :  { %v488_v48 = vpack.c.bf16 %v4175_v47, %v4175_v47 }
 0x271   :  { %v383_v49 = vpop.permute.xlu1 %382 }
 0x272   :  { %v4179_v50 = vmul.f32 %v3746_v31, %v383_v49  ;;  %490 = vrot.lane.b32.xlu0 %v488_v48, %s4001_s23 }
 0x274   :  { %v438_v52 = vpack.c.bf16 %v4179_v50, %v4179_v50 }
 0x276   :  { %440 = vrot.lane.b32.xlu1 %v438_v52, %s4001_s23 }
 0x2e4   :  { %v491_v53 = vpop.permute.xlu0 %490 }
 0x2e5   :  { %3470 = vmatmul.mubr.msk.bf16.vlgmr.msra.gmra.mrb[8].mxu0 %vm144_vm1, %v491_v53  ;;  %v614_v53 = vld [vmem:[#allocation2 + $0x8] sm:$0xf] }
 0x2e6   :  { %3482 = vmatpush3.bf16.msra.mxu0 %v4118_v34  ;;  %3485 = vmatprep.mubr.msk.bf16.mxu0 %vm3998_vm0, %v3997_v11 }
 0x2e7   :  { %3483 = vmatprep.subr.bf16.mxu0 %v3997_v11 }
 0x2e8   :  { %v441_v54 = vpop.permute.xlu1 %440 }
 0x2e9   :  { %3462 = vmatmul.mubr.msk.bf16.vlgmr.msra.gmra.mrb[4].mxu1 %vm144_vm1, %v441_v54 }
 0x2ea   :  { %3484 = vmatpush3.bf16.msra.mxu0 %v4128_v36  ;;  %3474 = vmatpush3.bf16.msra.mxu1 %v4102_v26 }
 0x2eb   :  { %3475 = vmatprep.subr.bf16.mxu1 %v3997_v11  ;;  %3477 = vmatprep.mubr.msk.bf16.mxu1 %vm3998_vm0, %v3997_v11 }
 0x2ec   :  { %3497 = vmatprep.subr.bf16.mxu0 %v3997_v11 }
 0x2ee   :  { %3476 = vmatpush3.bf16.msra.mxu1 %v4110_v30 }
 0x2ef   :  { %3489 = vmatprep.subr.bf16.mxu1 %v3997_v11 }
 0x3b8   :  { %v529_v57 = vpop.f32.mrb[8].mxu0 }
 0x3b9   :  { %v538_v58 = vadd.f32 %v536_v56, %v529_v57  ;;  %v3471_v59 = vpop.f32.mrb[9].mxu0 }
 0x3ba   :  { %v532_v60 = vpop.f32.mrb[10].mxu0 }
 0x3bb   :  { %3751 = vtanh.f32 %v538_v58  ;;  %v3472_v61 = vpop.f32.mrb[11].mxu0  ;;  %v3270_v8 = vmul.f32 -1.442695, %v538_v58 }
 0x3bc   :  { %v479_v63 = vpop.f32.mrb[4].mxu1 }
 0x3bd   :  { %v485_v0 = vadd.f32 %v479_v63, %v437_v62  ;;  %v3463_v1 = vpop.f32.mrb[5].mxu1 }
 0x3be   :  { %v482_v3 = vpop.f32.mrb[6].mxu1 }
 0x3bf   :  { %3753 = vtanh.f32 %v485_v0  ;;  %v3464_v4 = vpop.f32.mrb[7].mxu1  ;;  %v3269_v9 = vmul.f32 -1.442695, %v485_v0 }
 0x3c0   :  { %3755 = vpow2.f32 %v3270_v8 }
 0x3c1   :  { %3757 = vpow2.f32 %v3269_v9 }
 0x3c5   :  { %v3752_v5 = vpop.eup %3751 }
 0x3c6   :  { %572 = vrot.lane.b32.xlu0 %v3752_v5, %s4000_s4 }
 0x3c9   :  { %v3754_v7 = vpop.eup %3753 }
 0x3ca   :  { %548 = vrot.lane.b32.xlu1 %v3754_v7, %s4000_s4  ;;  %v3756_v10 = vpop.eup %3755 }
 0x3cb   :  { %v566_v12 = vadd.f32 1.0, %v3756_v10  ;;  %v3758_v13 = vpop.eup %3757 }
 0x3cc   :  { %v542_v14 = vadd.f32 1.0, %v3758_v13 }
 0x3cd   :  { %3759 = vrcp.f32 %v566_v12 }
 0x3ce   :  { %3761 = vrcp.f32 %v542_v14 }
 0x3d7   :  { %v3760_v15 = vpop.eup %3759 }
 0x3d8   :  { %v3762_v18 = vpop.eup %3761  ;;  %v570_v21 = vmul.f32 %v3760_v15, %v4167_v39 }
 0x3d9   :  { %v546_v24 = vmul.f32 %v3762_v18, %v4170_v43  ;;  %v664_v43 = vld [vmem:[#allocation2 + $0x14] sm:$0xf] }
 0x3da   :  { %v713_v44 = vrot.slane %v664_v43, 2  ;;  %v791_v43 = vld [vmem:[#allocation2 + $0xc] sm:$0xf] }
 0x438   :  { %v573_v16 = vpop.permute.xlu0 %572 }
 0x439   :  { %v575_v17 = vmul.f32 %v3760_v15, %v573_v16 }
 0x43b   :  { %577 = vrot.lane.b32.xlu0 %v575_v17, %s4001_s23 }
 0x43c   :  { %v549_v19 = vpop.permute.xlu1 %548 }
 0x43d   :  { %v551_v20 = vmul.f32 %v3762_v18, %v549_v19 }
 0x43f   :  { %553 = vrot.lane.b32.xlu1 %v551_v20, %s4001_s23 }
 0x4ad   :  { %v578_v22 = vpop.permute.xlu0 %577 }
 0x4ae   :  { %v4204_v23 = vadd.f32 %v578_v22, %v570_v21 }
 0x4b0   :  { %3763 = vtanh.f32 %v4204_v23 }
 0x4b1   :  { %v554_v25 = vpop.permute.xlu1 %553 }
 0x4b2   :  { %v4208_v27 = vadd.f32 %v554_v25, %v546_v24 }
 0x4b4   :  { %3765 = vtanh.f32 %v4208_v27 }
 0x4ba   :  { %v3764_v28 = vpop.eup %3763 }
 0x4bb   :  { %583 = vrot.lane.b32.xlu0 %v3764_v28, %s4000_s4 }
 0x4be   :  { %v3766_v29 = vpop.eup %3765 }
 0x4bf   :  { %559 = vrot.lane.b32.xlu1 %v3766_v29, %s4000_s4  ;;  %v841_v29 = vld [vmem:[#allocation2 + $0x10] sm:$0xf] }
 0x52d   :  { %v584_v31 = vpop.permute.xlu0 %583 }
 0x52e   :  { %v4213_v32 = vmul.f32 %v3760_v15, %v584_v31  ;;  %v890_v31 = vrot.slane %v841_v29, 2 }
 0x530   :  { %v665_v33 = vpack.c.bf16 %v4213_v32, %v4213_v32 }
 0x531   :  { %v560_v35 = vpop.permute.xlu1 %559 }
 0x532   :  { %v4217_v38 = vmul.f32 %v3762_v18, %v560_v35  ;;  %667 = vrot.lane.b32.xlu0 %v665_v33, %s4001_s23 }
 0x534   :  { %v615_v39 = vpack.c.bf16 %v4217_v38, %v4217_v38 }
 0x536   :  { %617 = vrot.lane.b32.xlu1 %v615_v39, %s4001_s23 }
 0x5a4   :  { %v668_v40 = vpop.permute.xlu0 %667 }
 0x5a5   :  { %3486 = vmatmul.mubr.msk.bf16.vlgmr.msra.gmra.mrb[12].mxu0 %vm144_vm1, %v668_v40 }
 0x5a6   :  { %3498 = vmatpush3.bf16.msra.mxu0 %v4118_v34  ;;  %3501 = vmatprep.mubr.msk.bf16.mxu0 %vm3998_vm0, %v3997_v11 }
 0x5a7   :  { %3499 = vmatprep.subr.bf16.mxu0 %v3997_v11 }
 0x5a8   :  { %v618_v42 = vpop.permute.xlu1 %617 }
 0x5a9   :  { %3478 = vmatmul.mubr.msk.bf16.vlgmr.msra.gmra.mrb[8].mxu1 %vm144_vm1, %v618_v42 }
 0x5aa   :  { %3500 = vmatpush3.bf16.msra.mxu0 %v4128_v36  ;;  %3490 = vmatpush3.bf16.msra.mxu1 %v4102_v26 }
 0x5ab   :  { %3491 = vmatprep.subr.bf16.mxu1 %v3997_v11  ;;  %3493 = vmatprep.mubr.msk.bf16.mxu1 %vm3998_vm0, %v3997_v11 }
 0x5ac   :  { %3513 = vmatprep.subr.bf16.mxu0 %v3997_v11 }
 0x5ae   :  { %3492 = vmatpush3.bf16.msra.mxu1 %v4110_v30 }
 0x5af   :  { %3505 = vmatprep.subr.bf16.mxu1 %v3997_v11 }
 0x678   :  { %v706_v45 = vpop.f32.mrb[12].mxu0 }
 0x679   :  { %v715_v46 = vadd.f32 %v713_v44, %v706_v45  ;;  %v3487_v48 = vpop.f32.mrb[13].mxu0 }
 0x67a   :  { %v709_v49 = vpop.f32.mrb[14].mxu0 }
 0x67b   :  { %3767 = vtanh.f32 %v715_v46  ;;  %v3488_v52 = vpop.f32.mrb[15].mxu0  ;;  %v3274_v61 = vmul.f32 -1.442695, %v715_v46 }
 0x67c   :  { %v656_v54 = vpop.f32.mrb[8].mxu1 }
 0x67d   :  { %v662_v55 = vadd.f32 %v656_v54, %v614_v53  ;;  %v3479_v56 = vpop.f32.mrb[9].mxu1 }
 0x67e   :  { %v659_v57 = vpop.f32.mrb[10].mxu1 }
 0x67f   :  { %3769 = vtanh.f32 %v662_v55  ;;  %v3480_v58 = vpop.f32.mrb[11].mxu1  ;;  %v3273_v62 = vmul.f32 -1.442695, %v662_v55 }
 0x680   :  { %3771 = vpow2.f32 %v3274_v61 }
 0x681   :  { %3773 = vpow2.f32 %v3273_v62 }
 0x685   :  { %v3768_v59 = vpop.eup %3767 }
 0x686   :  { %749 = vrot.lane.b32.xlu0 %v3768_v59, %s4000_s4 }
 0x689   :  { %v3770_v60 = vpop.eup %3769 }
 0x68a   :  { %725 = vrot.lane.b32.xlu1 %v3770_v60, %s4000_s4  ;;  %v3772_v63 = vpop.eup %3771 }
 0x68b   :  { %v743_v0 = vadd.f32 1.0, %v3772_v63  ;;  %v3774_v1 = vpop.eup %3773 }
 0x68c   :  { %v719_v3 = vadd.f32 1.0, %v3774_v1 }
 0x68d   :  { %3775 = vrcp.f32 %v743_v0 }
 0x68e   :  { %3777 = vrcp.f32 %v719_v3 }
 0x697   :  { %v3776_v4 = vpop.eup %3775 }
 0x698   :  { %v3778_v8 = vpop.eup %3777  ;;  %v747_v12 = vmul.f32 %v3776_v4, %v4204_v23 }
 0x699   :  { %v723_v15 = vmul.f32 %v3778_v8, %v4208_v27 }
 0x6f8   :  { %v750_v5 = vpop.permute.xlu0 %749 }
 0x6f9   :  { %v752_v7 = vmul.f32 %v3776_v4, %v750_v5 }
 0x6fb   :  { %754 = vrot.lane.b32.xlu0 %v752_v7, %s4001_s23 }
 0x6fc   :  { %v726_v9 = vpop.permute.xlu1 %725 }
 0x6fd   :  { %v728_v10 = vmul.f32 %v3778_v8, %v726_v9 }
 0x6ff   :  { %730 = vrot.lane.b32.xlu1 %v728_v10, %s4001_s23 }
 0x76d   :  { %v755_v13 = vpop.permute.xlu0 %754 }
 0x76e   :  { %v4242_v14 = vadd.f32 %v755_v13, %v747_v12 }
 0x770   :  { %3779 = vtanh.f32 %v4242_v14 }
 0x771   :  { %v731_v16 = vpop.permute.xlu1 %730 }
 0x772   :  { %v4246_v17 = vadd.f32 %v731_v16, %v723_v15 }
 0x774   :  { %3781 = vtanh.f32 %v4246_v17 }
 0x77a   :  { %v3780_v18 = vpop.eup %3779 }
 0x77b   :  { %760 = vrot.lane.b32.xlu0 %v3780_v18, %s4000_s4 }
 0x77e   :  { %v3782_v19 = vpop.eup %3781 }
 0x77f   :  { %736 = vrot.lane.b32.xlu1 %v3782_v19, %s4000_s4 }
 0x7ed   :  { %v761_v20 = vpop.permute.xlu0 %760 }
 0x7ee   :  { %v4251_v21 = vmul.f32 %v3776_v4, %v761_v20 }
 0x7f0   :  { %v842_v22 = vpack.c.bf16 %v4251_v21, %v4251_v21 }
 0x7f1   :  { %v737_v23 = vpop.permute.xlu1 %736 }
 0x7f2   :  { %v4255_v24 = vmul.f32 %v3778_v8, %v737_v23  ;;  %844 = vrot.lane.b32.xlu0 %v842_v22, %s4001_s23  ;;  %v1016_v22 = vld [vmem:[#allocation2 + $0xc] sm:$0xf] }
 0x7f3   :  { %v1065_v23 = vrot.slane %v1016_v22, 2 }
 0x7f4   :  { %v792_v25 = vpack.c.bf16 %v4255_v24, %v4255_v24 }
 0x7f6   :  { %794 = vrot.lane.b32.xlu1 %v792_v25, %s4001_s23 }
 0x864   :  { %v845_v27 = vpop.permute.xlu0 %844 }
 0x865   :  { %3502 = vmatmul.mubr.msk.bf16.vlgmr.msra.gmra.mrb[16].mxu0 %vm144_vm1, %v845_v27 }
 0x866   :  { %3514 = vmatpush3.bf16.msra.mxu0 %v4118_v34  ;;  %3517 = vmatprep.mubr.msk.bf16.mxu0 %vm3998_vm0, %v3997_v11 }
 0x867   :  { %3515 = vmatprep.subr.bf16.mxu0 %v3997_v11 }
 0x868   :  { %v795_v28 = vpop.permute.xlu1 %794 }
 0x869   :  { %3494 = vmatmul.mubr.msk.bf16.vlgmr.msra.gmra.mrb[12].mxu1 %vm144_vm1, %v795_v28 }
 0x86a   :  { %3516 = vmatpush3.bf16.msra.mxu0 %v4128_v36  ;;  %3506 = vmatpush3.bf16.msra.mxu1 %v4102_v26 }
 0x86b   :  { %3507 = vmatprep.subr.bf16.mxu1 %v3997_v11  ;;  %3509 = vmatprep.mubr.msk.bf16.mxu1 %vm3998_vm0, %v3997_v11 }
 0x86c   :  { %3529 = vmatprep.subr.bf16.mxu0 %v3997_v11 }
 0x86e   :  { %3508 = vmatpush3.bf16.msra.mxu1 %v4110_v30 }
 0x86f   :  { %3521 = vmatprep.subr.bf16.mxu1 %v3997_v11 }
 0x938   :  { %v883_v33 = vpop.f32.mrb[16].mxu0 }
 0x939   :  { %v892_v35 = vadd.f32 %v890_v31, %v883_v33  ;;  %v3503_v39 = vpop.f32.mrb[17].mxu0  ;;  %v967_v33 = vld [vmem:[#allocation2 + $0x10] sm:$0xf] }
 0x93a   :  { %v886_v40 = vpop.f32.mrb[18].mxu0 }
 0x93b   :  { %3783 = vtanh.f32 %v892_v35  ;;  %v3504_v42 = vpop.f32.mrb[19].mxu0  ;;  %v3278_v54 = vmul.f32 -1.442695, %v892_v35 }
 0x93c   :  { %v833_v44 = vpop.f32.mrb[12].mxu1 }
 0x93d   :  { %v839_v45 = vadd.f32 %v833_v44, %v791_v43  ;;  %v3495_v46 = vpop.f32.mrb[13].mxu1 }
 0x93e   :  { %v836_v48 = vpop.f32.mrb[14].mxu1 }
 0x93f   :  { %3785 = vtanh.f32 %v839_v45  ;;  %v3496_v49 = vpop.f32.mrb[15].mxu1  ;;  %v3277_v55 = vmul.f32 -1.442695, %v839_v45 }
 0x940   :  { %3787 = vpow2.f32 %v3278_v54 }
 0x941   :  { %3789 = vpow2.f32 %v3277_v55 }
 0x945   :  { %v3784_v52 = vpop.eup %3783 }
 0x946   :  { %926 = vrot.lane.b32.xlu0 %v3784_v52, %s4000_s4 }
 0x949   :  { %v3786_v53 = vpop.eup %3785 }
 0x94a   :  { %902 = vrot.lane.b32.xlu1 %v3786_v53, %s4000_s4  ;;  %v3788_v56 = vpop.eup %3787 }
 0x94b   :  { %v920_v57 = vadd.f32 1.0, %v3788_v56  ;;  %v3790_v58 = vpop.eup %3789 }
 0x94c   :  { %v896_v59 = vadd.f32 1.0, %v3790_v58 }
 0x94d   :  { %3791 = vrcp.f32 %v920_v57 }
 0x94e   :  { %3793 = vrcp.f32 %v896_v59 }
 0x957   :  { %v3792_v60 = vpop.eup %3791 }
 0x958   :  { %v3794_v63 = vpop.eup %3793  ;;  %v924_v3 = vmul.f32 %v3792_v60, %v4242_v14 }
 0x959   :  { %v900_v7 = vmul.f32 %v3794_v63, %v4246_v17 }
 0x9b8   :  { %v927_v61 = vpop.permute.xlu0 %926 }
 0x9b9   :  { %v929_v62 = vmul.f32 %v3792_v60, %v927_v61 }
 0x9bb   :  { %931 = vrot.lane.b32.xlu0 %v929_v62, %s4001_s23 }
 0x9bc   :  { %v903_v0 = vpop.permute.xlu1 %902 }
 0x9bd   :  { %v905_v1 = vmul.f32 %v3794_v63, %v903_v0 }
 0x9bf   :  { %907 = vrot.lane.b32.xlu1 %v905_v1, %s4001_s23 }
 0xa2d   :  { %v932_v4 = vpop.permute.xlu0 %931 }
 0xa2e   :  { %v4280_v5 = vadd.f32 %v932_v4, %v924_v3 }
 0xa30   :  { %3795 = vtanh.f32 %v4280_v5 }
 0xa31   :  { %v908_v8 = vpop.permute.xlu1 %907 }
 0xa32   :  { %v4284_v9 = vadd.f32 %v908_v8, %v900_v7 }
 0xa34   :  { %3797 = vtanh.f32 %v4284_v9 }
 0xa3a   :  { %v3796_v10 = vpop.eup %3795 }
 0xa3b   :  { %937 = vrot.lane.b32.xlu0 %v3796_v10, %s4000_s4 }
 0xa3e   :  { %v3798_v12 = vpop.eup %3797 }
 0xa3f   :  { %913 = vrot.lane.b32.xlu1 %v3798_v12, %s4000_s4 }
 0xaad   :  { %v938_v13 = vpop.permute.xlu0 %937 }
 0xaae   :  { %v4289_v14 = vmul.f32 %v3792_v60, %v938_v13 }
 0xab0   :  { %v1017_v15 = vpack.c.bf16 %v4289_v14, %v4289_v14 }
 0xab1   :  { %v914_v16 = vpop.permute.xlu1 %913 }
 0xab2   :  { %v4293_v18 = vmul.f32 %v3794_v63, %v914_v16  ;;  %1019 = vrot.lane.b32.xlu0 %v1017_v15, %s4001_s23 }
 0xab4   :  { %v968_v17 = vpack.c.bf16 %v4293_v18, %v4293_v18 }
 0xab6   :  { %970 = vrot.lane.b32.xlu1 %v968_v17, %s4001_s23  ;;  %v1191_v17 = vld [vmem:[#allocation2 + $0x8] sm:$0xf] }
 0xb24   :  { %v1020_v19 = vpop.permute.xlu0 %1019 }
 0xb25   :  { %3518 = vmatmul.mubr.msk.bf16.vlgmr.msra.gmra.mrb[20].mxu0 %vm144_vm1, %v1020_v19  ;;  %v1240_v19 = vrot.slane %v1191_v17, 2 }
 0xb26   :  { %3530 = vmatpush3.bf16.msra.mxu0 %v4118_v34  ;;  %3533 = vmatprep.mubr.msk.bf16.mxu0 %vm3998_vm0, %v3997_v11 }
 0xb27   :  { %3531 = vmatprep.subr.bf16.mxu0 %v3997_v11 }
 0xb28   :  { %v971_v20 = vpop.permute.xlu1 %970 }
 0xb29   :  { %3510 = vmatmul.mubr.msk.bf16.vlgmr.msra.gmra.mrb[16].mxu1 %vm144_vm1, %v971_v20 }
 0xb2a   :  { %3532 = vmatpush3.bf16.msra.mxu0 %v4128_v36  ;;  %3522 = vmatpush3.bf16.msra.mxu1 %v4102_v26 }
 0xb2b   :  { %3523 = vmatprep.subr.bf16.mxu1 %v3997_v11  ;;  %3525 = vmatprep.mubr.msk.bf16.mxu1 %vm3998_vm0, %v3997_v11 }
 0xb2c   :  { %3545 = vmatprep.subr.bf16.mxu0 %v3997_v11 }
 0xb2e   :  { %3524 = vmatpush3.bf16.msra.mxu1 %v4110_v30 }
 0xb2f   :  { %3537 = vmatprep.subr.bf16.mxu1 %v3997_v11 }
 0xbf8   :  { %v1058_v25 = vpop.f32.mrb[20].mxu0 }
 0xbf9   :  { %v1067_v27 = vadd.f32 %v1065_v23, %v1058_v25  ;;  %v3519_v28 = vpop.f32.mrb[21].mxu0 }
 0xbfa   :  { %v1061_v29 = vpop.f32.mrb[22].mxu0  ;;  %v1142_v28 = vld [vmem:[#allocation2 + $0x14] sm:$0xf] }
 0xbfb   :  { %3799 = vtanh.f32 %v1067_v27  ;;  %v3520_v31 = vpop.f32.mrb[23].mxu0  ;;  %v3282_v46 = vmul.f32 -1.442695, %v1067_v27 }
 0xbfc   :  { %v1009_v35 = vpop.f32.mrb[16].mxu1 }
 0xbfd   :  { %v1015_v39 = vadd.f32 %v1009_v35, %v967_v33  ;;  %v3511_v40 = vpop.f32.mrb[17].mxu1 }
 0xbfe   :  { %v1012_v42 = vpop.f32.mrb[18].mxu1 }
 0xbff   :  { %3801 = vtanh.f32 %v1015_v39  ;;  %v3512_v43 = vpop.f32.mrb[19].mxu1  ;;  %v3281_v48 = vmul.f32 -1.442695, %v1015_v39 }
 0xc00   :  { %3803 = vpow2.f32 %v3282_v46 }
 0xc01   :  { %3805 = vpow2.f32 %v3281_v48 }
 0xc05   :  { %v3800_v44 = vpop.eup %3799 }
 0xc06   :  { %1101 = vrot.lane.b32.xlu0 %v3800_v44, %s4000_s4 }
 0xc09   :  { %v3802_v45 = vpop.eup %3801 }
 0xc0a   :  { %1077 = vrot.lane.b32.xlu1 %v3802_v45, %s4000_s4  ;;  %v3804_v49 = vpop.eup %3803 }
 0xc0b   :  { %v1095_v52 = vadd.f32 1.0, %v3804_v49  ;;  %v3806_v53 = vpop.eup %3805 }
 0xc0c   :  { %v1071_v54 = vadd.f32 1.0, %v3806_v53 }
 0xc0d   :  { %3807 = vrcp.f32 %v1095_v52 }
 0xc0e   :  { %3809 = vrcp.f32 %v1071_v54 }
 0xc17   :  { %v3808_v55 = vpop.eup %3807 }
 0xc18   :  { %v3810_v58 = vpop.eup %3809  ;;  %v1099_v61 = vmul.f32 %v3808_v55, %v4280_v5 }
 0xc19   :  { %v1075_v0 = vmul.f32 %v3810_v58, %v4284_v9 }
 0xc78   :  { %v1102_v56 = vpop.permute.xlu0 %1101 }
 0xc79   :  { %v1104_v57 = vmul.f32 %v3808_v55, %v1102_v56 }
 0xc7b   :  { %1106 = vrot.lane.b32.xlu0 %v1104_v57, %s4001_s23 }
 0xc7c   :  { %v1078_v59 = vpop.permute.xlu1 %1077 }
 0xc7d   :  { %v1080_v60 = vmul.f32 %v3810_v58, %v1078_v59 }
 0xc7f   :  { %1082 = vrot.lane.b32.xlu1 %v1080_v60, %s4001_s23 }
 0xced   :  { %v1107_v62 = vpop.permute.xlu0 %1106 }
 0xcee   :  { %v4318_v63 = vadd.f32 %v1107_v62, %v1099_v61 }
 0xcf0   :  { %3811 = vtanh.f32 %v4318_v63 }
 0xcf1   :  { %v1083_v1 = vpop.permute.xlu1 %1082 }
 0xcf2   :  { %v4322_v3 = vadd.f32 %v1083_v1, %v1075_v0 }
 0xcf4   :  { %3813 = vtanh.f32 %v4322_v3 }
 0xcfa   :  { %v3812_v4 = vpop.eup %3811 }
 0xcfb   :  { %1112 = vrot.lane.b32.xlu0 %v3812_v4, %s4000_s4 }
 0xcfe   :  { %v3814_v7 = vpop.eup %3813 }
 0xcff   :  { %1088 = vrot.lane.b32.xlu1 %v3814_v7, %s4000_s4 }
 0xd6d   :  { %v1113_v8 = vpop.permute.xlu0 %1112 }
 0xd6e   :  { %v4327_v5 = vmul.f32 %v3808_v55, %v1113_v8 }
 0xd70   :  { %v1192_v10 = vpack.c.bf16 %v4327_v5, %v4327_v5 }
 0xd71   :  { %v1089_v12 = vpop.permute.xlu1 %1088 }
 0xd72   :  { %v4331_v13 = vmul.f32 %v3810_v58, %v1089_v12  ;;  %1194 = vrot.lane.b32.xlu0 %v1192_v10, %s4001_s23 }
 0xd74   :  { %v1143_v9 = vpack.c.bf16 %v4331_v13, %v4331_v13 }
 0xd76   :  { %1145 = vrot.lane.b32.xlu1 %v1143_v9, %s4001_s23 }
 0xde4   :  { %v1195_v15 = vpop.permute.xlu0 %1194 }
 0xde5   :  { %3534 = vmatmul.mubr.msk.bf16.vlgmr.msra.gmra.mrb[24].mxu0 %vm144_vm1, %v1195_v15 }
 0xde6   :  { %3546 = vmatpush3.bf16.msra.mxu0 %v4118_v34  ;;  %3549 = vmatprep.mubr.msk.bf16.mxu0 %vm3998_vm0, %v3997_v11 }
 0xde7   :  { %3547 = vmatprep.subr.bf16.mxu0 %v3997_v11 }
 0xde8   :  { %v1146_v16 = vpop.permute.xlu1 %1145 }
 0xde9   :  { %3526 = vmatmul.mubr.msk.bf16.vlgmr.msra.gmra.mrb[20].mxu1 %vm144_vm1, %v1146_v16 }
 0xdea   :  { %3548 = vmatpush3.bf16.msra.mxu0 %v4128_v36  ;;  %3538 = vmatpush3.bf16.msra.mxu1 %v4102_v26 }
 0xdeb   :  { %3539 = vmatprep.subr.bf16.mxu1 %v3997_v11  ;;  %3541 = vmatprep.mubr.msk.bf16.mxu1 %vm3998_vm0, %v3997_v11 }
 0xdec   :  { %3561 = vmatprep.subr.bf16.mxu0 %v3997_v11 }
 0xdee   :  { %3540 = vmatpush3.bf16.msra.mxu1 %v4110_v30 }
 0xdef   :  { %3553 = vmatprep.subr.bf16.mxu1 %v3997_v11 }
 0xeb8   :  { %v1233_v20 = vpop.f32.mrb[24].mxu0 }
 0xeb9   :  { %v1242_v22 = vadd.f32 %v1240_v19, %v1233_v20  ;;  %v3535_v23 = vpop.f32.mrb[25].mxu0 }
 0xeba   :  { %v1236_v25 = vpop.f32.mrb[26].mxu0 }
 0xebb   :  { %3815 = vtanh.f32 %v1242_v22  ;;  %v3536_v27 = vpop.f32.mrb[27].mxu0  ;;  %v3286_v43 = vmul.f32 -1.442695, %v1242_v22 }
 0xebc   :  { %v1184_v29 = vpop.f32.mrb[20].mxu1 }
 0xebd   :  { %v1190_v31 = vadd.f32 %v1184_v29, %v1142_v28  ;;  %v3527_v33 = vpop.f32.mrb[21].mxu1 }
 0xebe   :  { %v1187_v35 = vpop.f32.mrb[22].mxu1 }
 0xebf   :  { %3817 = vtanh.f32 %v1190_v31  ;;  %v3528_v39 = vpop.f32.mrb[23].mxu1  ;;  %v3285_v44 = vmul.f32 -1.442695, %v1190_v31 }
 0xec0   :  { %3819 = vpow2.f32 %v3286_v43 }
 0xec1   :  { %3821 = vpow2.f32 %v3285_v44 }
 0xec5   :  { %v3816_v40 = vpop.eup %3815 }
 0xec6   :  { %1276 = vrot.lane.b32.xlu0 %v3816_v40, %s4000_s4 }
 0xec9   :  { %v3818_v42 = vpop.eup %3817 }
 0xeca   :  { %1252 = vrot.lane.b32.xlu1 %v3818_v42, %s4000_s4  ;;  %v3820_v45 = vpop.eup %3819 }
 0xecb   :  { %v1270_v46 = vadd.f32 1.0, %v3820_v45  ;;  %v3822_v48 = vpop.eup %3821 }
 0xecc   :  { %v1246_v49 = vadd.f32 1.0, %v3822_v48 }
 0xecd   :  { %3823 = vrcp.f32 %v1270_v46 }
 0xece   :  { %3825 = vrcp.f32 %v1246_v49 }
 0xed7   :  { %v3824_v52 = vpop.eup %3823 }
 0xed8   :  { %v3826_v55 = vpop.eup %3825  ;;  %v1274_v58 = vmul.f32 %v3824_v52, %v4318_v63 }
 0xed9   :  { %v1250_v61 = vmul.f32 %v3826_v55, %v4322_v3 }
 0xf38   :  { %v1277_v53 = vpop.permute.xlu0 %1276 }
 0xf39   :  { %v1279_v54 = vmul.f32 %v3824_v52, %v1277_v53 }
 0xf3b   :  { %1281 = vrot.lane.b32.xlu0 %v1279_v54, %s4001_s23 }
 0xf3c   :  { %v1253_v56 = vpop.permute.xlu1 %1252 }
 0xf3d   :  { %v1255_v57 = vmul.f32 %v3826_v55, %v1253_v56 }
 0xf3f   :  { %1257 = vrot.lane.b32.xlu1 %v1255_v57, %s4001_s23 }
 0xfad   :  { %v1282_v59 = vpop.permute.xlu0 %1281 }
 0xfae   :  { %v4356_v60 = vadd.f32 %v1282_v59, %v1274_v58 }
 0xfb0   :  { %3827 = vtanh.f32 %v4356_v60 }
 0xfb1   :  { %v1258_v62 = vpop.permute.xlu1 %1257 }
 0xfb2   :  { %v4360_v0 = vadd.f32 %v1258_v62, %v1250_v61 }
 0xfb4   :  { %3829 = vtanh.f32 %v4360_v0 }
 0xfba   :  { %v3828_v1 = vpop.eup %3827 }
 0xfbb   :  { %1287 = vrot.lane.b32.xlu0 %v3828_v1, %s4000_s4 }
 0xfbe   :  { %v3830_v4 = vpop.eup %3829 }
 0xfbf   :  { %1263 = vrot.lane.b32.xlu1 %v3830_v4, %s4000_s4 }
0x102d   :  { %v1288_v7 = vpop.permute.xlu0 %1287 }
0x102e   :  { %v4365_v63 = vmul.f32 %v3824_v52, %v1288_v7 }
0x1030   :  { %v1367_v8 = vpack.c.bf16 %v4365_v63, %v4365_v63 }
0x1031   :  { %v1264_v10 = vpop.permute.xlu1 %1263 }
0x1032   :  { %v4369_v12 = vmul.f32 %v3826_v55, %v1264_v10  ;;  %1369 = vrot.lane.b32.xlu0 %v1367_v8, %s4001_s23 }
0x1034   :  { %v1318_v3 = vpack.c.bf16 %v4369_v12, %v4369_v12 }
0x1036   :  { %1320 = vrot.lane.b32.xlu1 %v1318_v3, %s4001_s23  ;;  %v1541_v3 = vld [vmem:[#allocation2] sm:$0xf] }
0x10a4   :  { %v1370_v9 = vpop.permute.xlu0 %1369 }
0x10a5   :  { %3550 = vmatmul.mubr.msk.bf16.vlgmr.msra.gmra.mrb[28].mxu0 %vm144_vm1, %v1370_v9  ;;  %v1590_v9 = vrot.slane %v1541_v3, 2  ;;  %v3727_v3 = vld [vmem:[%s4857_s5 + $0x4] ss:$8 sps:$4 sm:$0xff]  }
0x10a6   :  { %3562 = vmatpush3.bf16.msra.mxu0 %v4118_v34  ;;  %3565 = vmatprep.mubr.msk.bf16.mxu0 %vm3998_vm0, %v3997_v11  ;;  %v1366_v34 = vld [vmem:[#allocation2 + $0x4] sm:$0xf] }
0x10a7   :  { %3563 = vmatprep.subr.bf16.mxu0 %v3997_v11  ;;  %v1415_v16 = vrot.slane %v1366_v34, 2 }
0x10a8   :  { %v1321_v15 = vpop.permute.xlu1 %1320 }
0x10a9   :  { %3542 = vmatmul.mubr.msk.bf16.vlgmr.msra.gmra.mrb[24].mxu1 %vm144_vm1, %v1321_v15 }
0x10aa   :  { %3564 = vmatpush3.bf16.msra.mxu0 %v4128_v36  ;;  %3554 = vmatpush3.bf16.msra.mxu1 %v4102_v26  ;;  %v1317_v36 = vld [vmem:[#allocation2 + $0x18] sm:$0xf] }
0x10ab   :  { %3555 = vmatprep.subr.bf16.mxu1 %v3997_v11  ;;  %3557 = vmatprep.mubr.msk.bf16.mxu1 %vm3998_vm0, %v3997_v11 }
0x10ac   :  { %3569 = vmatprep.subr.bf16.mxu0 %v3997_v11 }
0x10ae   :  { %3556 = vmatpush3.bf16.msra.mxu1 %v4110_v30 }
0x1178   :  { %v1408_v17 = vpop.f32.mrb[28].mxu0 }
0x1179   :  { %v1417_v19 = vadd.f32 %v1415_v16, %v1408_v17  ;;  %v3551_v20 = vpop.f32.mrb[29].mxu0 }
0x117a   :  { %v1411_v22 = vpop.f32.mrb[30].mxu0  ;;  %v1492_v20 = vld [vmem:[#allocation2 + $0x1c] sm:$0xf] }
0x117b   :  { %3831 = vtanh.f32 %v1417_v19  ;;  %v3552_v23 = vpop.f32.mrb[31].mxu0  ;;  %v3290_v30 = vmul.f32 -1.442695, %v1417_v19 }
0x117c   :  { %v1359_v25 = vpop.f32.mrb[24].mxu1 }
0x117d   :  { %v1365_v26 = vadd.f32 %v1359_v25, %v1317_v36  ;;  %v3543_v27 = vpop.f32.mrb[25].mxu1 }
0x117e   :  { %v1362_v28 = vpop.f32.mrb[26].mxu1 }
0x117f   :  { %3833 = vtanh.f32 %v1365_v26  ;;  %v3544_v29 = vpop.f32.mrb[27].mxu1  ;;  %v3289_v35 = vmul.f32 -1.442695, %v1365_v26 }
0x1180   :  { %3835 = vpow2.f32 %v3290_v30 }
0x1181   :  { %3837 = vpow2.f32 %v3289_v35 }
0x1185   :  { %v3832_v31 = vpop.eup %3831 }
0x1186   :  { %1451 = vrot.lane.b32.xlu0 %v3832_v31, %s4000_s4 }
0x1189   :  { %v3834_v33 = vpop.eup %3833 }
0x118a   :  { %1427 = vrot.lane.b32.xlu1 %v3834_v33, %s4000_s4  ;;  %v3836_v39 = vpop.eup %3835 }
0x118b   :  { %v1445_v40 = vadd.f32 1.0, %v3836_v39  ;;  %v3838_v42 = vpop.eup %3837 }
0x118c   :  { %v1421_v43 = vadd.f32 1.0, %v3838_v42 }
0x118d   :  { %3839 = vrcp.f32 %v1445_v40 }
0x118e   :  { %3841 = vrcp.f32 %v1421_v43 }
0x1197   :  { %v3840_v44 = vpop.eup %3839 }
0x1198   :  { %v3842_v48 = vpop.eup %3841  ;;  %v1449_v53 = vmul.f32 %v3840_v44, %v4356_v60 }
0x1199   :  { %v1425_v56 = vmul.f32 %v3842_v48, %v4360_v0 }
0x11f8   :  { %v1452_v45 = vpop.permute.xlu0 %1451 }
0x11f9   :  { %v1454_v46 = vmul.f32 %v3840_v44, %v1452_v45 }
0x11fb   :  { %1456 = vrot.lane.b32.xlu0 %v1454_v46, %s4001_s23 }
0x11fc   :  { %v1428_v49 = vpop.permute.xlu1 %1427 }
0x11fd   :  { %v1430_v52 = vmul.f32 %v3842_v48, %v1428_v49 }
0x11ff   :  { %1432 = vrot.lane.b32.xlu1 %v1430_v52, %s4001_s23 }
0x126d   :  { %v1457_v54 = vpop.permute.xlu0 %1456 }
0x126e   :  { %v1459_v55 = vadd.f32 %v1457_v54, %v1449_v53 }
0x1270   :  { %3843 = vtanh.f32 %v1459_v55 }
0x1271   :  { %v1433_v57 = vpop.permute.xlu1 %1432 }
0x1272   :  { %v1435_v58 = vadd.f32 %v1433_v57, %v1425_v56 }
0x1274   :  { %3845 = vtanh.f32 %v1435_v58 }
0x127a   :  { %v3844_v59 = vpop.eup %3843 }
0x127b   :  { %1462 = vrot.lane.b32.xlu0 %v3844_v59, %s4000_s4  ;;  %v430_v59 = vrot.slane %v4175_v47, %v4157_v51  ;;  %v1136_v47 = vrot.slane %v4327_v5, %v4157_v51  ;;  %v594_v5 = vrot.slane %v4217_v38, %v4157_v51  ;;  %v3719_v38 = vld [vmem:[%s4857_s5 + $0x20] ss:$8 sps:$4 sm:$0xff]  }
0x127e   :  { %v3846_v61 = vpop.eup %3845 }
0x127f   :  { %1438 = vrot.lane.b32.xlu1 %v3846_v61, %s4000_s4 }
0x12ed   :  { %v1463_v62 = vpop.permute.xlu0 %1462 }
0x12ee   :  { %v4396_v1 = vmul.f32 %v3840_v44, %v1463_v62  ;;  %v961_v62 = vrot.slane %v4289_v14, %v4157_v51  ;;  %v417_v14 = vrot.slane %v4179_v50, %v4157_v51 }
0x12f0   :  { %v1542_v60 = vpack.c.bf16 %v4396_v1, %v4396_v1 }
0x12f1   :  { %v1439_v4 = vpop.permute.xlu1 %1438 }
0x12f2   :  { %v4400_v7 = vmul.f32 %v3842_v48, %v1439_v4  ;;  %1544 = vrot.lane.b32.xlu0 %v1542_v60, %s4001_s23 }
0x12f4   :  { %v1493_v0 = vpack.c.bf16 %v4400_v7, %v4400_v7  ;;  %v1473_v50 = vrot.slane %v4400_v7, %v4157_v51  ;;  %v3722_v7 = vld [vmem:[%s4857_s5 + $0x30] ss:$8 sps:$4 sm:$0xff]  }
0x12f6   :  { %1495 = vrot.lane.b32.xlu1 %v1493_v0, %s4001_s23 }
0x1364   :  { %v1545_v8 = vpop.permute.xlu0 %1544 }
0x1365   :  { %3566 = vmatmul.mubr.msk.bf16.vlgmr.msra.gmra.mrb[32].mxu0 %vm144_vm1, %v1545_v8 }
0x1366   :  { %3573 = vmatprep.mubr.msk.bf16.mxu0 %vm3998_vm0, %v3997_v11 }
0x1368   :  { %v1496_v10 = vpop.permute.xlu1 %1495 }
0x1369   :  { %3558 = vmatmul.mubr.msk.bf16.vlgmr.msra.gmra.mrb[28].mxu1 %vm144_vm1, %v1496_v10 }
0x136a   :  { %1863 = vmatprep.mubr.bf16.mxu1 %v3995_v2 }
0x1438   :  { %v1583_v15 = vpop.f32.mrb[32].mxu0 }
0x1439   :  { %v1592_v34 = vadd.f32 %v1590_v9, %v1583_v15  ;;  %v3567_v16 = vpop.f32.mrb[33].mxu0  ;;  %v948_v9 = vrot.slane %v4293_v18, %v4157_v51 }
0x143a   :  { %v1586_v17 = vpop.f32.mrb[34].mxu0  ;;  %v1298_v16 = vrot.slane %v4369_v12, %v4157_v51 }
0x143b   :  { %3847 = vtanh.f32 %v1592_v34  ;;  %v3568_v19 = vpop.f32.mrb[35].mxu0  ;;  %v3294_v29 = vmul.f32 -1.442695, %v1592_v34 }
0x143c   :  { %v1534_v22 = vpop.f32.mrb[28].mxu1 }
0x143d   :  { %v1540_v23 = vadd.f32 %v1534_v22, %v1492_v20  ;;  %v3559_v36 = vpop.f32.mrb[29].mxu1 }
0x143e   :  { %v1537_v25 = vpop.f32.mrb[30].mxu1 }
0x143f   :  { %3849 = vtanh.f32 %v1540_v23  ;;  %v3560_v26 = vpop.f32.mrb[31].mxu1  ;;  %v3293_v31 = vmul.f32 -1.442695, %v1540_v23  ;;  %v4504_v25 = vld [vmem:[%s4858_s6] sm:$0xff]  }
0x1440   :  { %3851 = vpow2.f32 %v3294_v29  ;;  %3570 = vmatpush3.bf16.msra.mxu0 %v4504_v25  ;;  %v4510_v26 = vld [vmem:[%s4858_s6 + $0x8] sm:$0xff]  }
0x1441   :  { %3853 = vpow2.f32 %v3293_v31  ;;  %3571 = vmatprep.subr.bf16.mxu0 %v3997_v11  ;;  %v4527_v31 = vld [vmem:[%s4859_s7 + $0x8] sm:$0xff]  }
0x1444   :  { %3572 = vmatpush3.bf16.msra.mxu0 %v4510_v26 }
0x1445   :  { %v3848_v27 = vpop.eup %3847  ;;  %3577 = vmatprep.subr.bf16.mxu0 %v3997_v11 }
0x1446   :  { %1626 = vrot.lane.b32.xlu0 %v3848_v27, %s4000_s4 }
0x1447   :  { %3574 = vmatmul.mubr.bf16.vlgmr.msra.gmra.mrb[36].mxu0 %v3995_v2 }
0x1448   :  { %3581 = vmatprep.mubr.msk.bf16.mxu0 %vm3998_vm0, %v3997_v11 }
0x1449   :  { %v3850_v28 = vpop.eup %3849 }
0x144a   :  { %1602 = vrot.lane.b32.xlu1 %v3850_v28, %s4000_s4  ;;  %v3852_v33 = vpop.eup %3851  ;;  %v4518_v28 = vld [vmem:[%s4859_s7] sm:$0xff]  }
0x144b   :  { %v1620_v30 = vadd.f32 1.0, %v3852_v33  ;;  %v3854_v35 = vpop.eup %3853  ;;  %3578 = vmatpush3.bf16.msra.mxu0 %v4518_v28 }
0x144c   :  { %v1596_v39 = vadd.f32 1.0, %v3854_v35  ;;  %3579 = vmatprep.subr.bf16.mxu0 %v3997_v11 }
0x144d   :  { %3855 = vrcp.f32 %v1620_v30 }
0x144e   :  { %3857 = vrcp.f32 %v1596_v39 }
0x144f   :  { %3580 = vmatpush3.bf16.msra.mxu0 %v4527_v31 }
0x1450   :  { %3593 = vmatprep.subr.bf16.mxu0 %v3997_v11 }
0x1452   :  { %3582 = vmatmul.mubr.bf16.vlgmr.msra.gmra.mrb[40].mxu0 %v3995_v2 }
0x1453   :  { %3594 = vmatpush3.bf16.msra.mxu0 %v4518_v28  ;;  %3597 = vmatprep.mubr.msk.bf16.mxu0 %vm3998_vm0, %v3997_v11 }
0x1454   :  { %3595 = vmatprep.subr.bf16.mxu0 %v3997_v11 }
0x1457   :  { %v3856_v40 = vpop.eup %3855  ;;  %3596 = vmatpush3.bf16.msra.mxu0 %v4527_v31 }
0x1458   :  { %v4414_v44 = vpop.eup %3857  ;;  %v1624_v48 = vmul.f32 %v3856_v40, %v1459_v55  ;;  %v607_v55 = vrot.slane %v4213_v32, %v4157_v51  ;;  %v1311_v32 = vrot.slane %v4365_v63, %v4157_v51  ;;  %v771_v63 = vrot.slane %v4255_v24, %v4157_v51  ;;  %v3721_v24 = vld [vmem:[%s4857_s5 + $0x24] ss:$8 sps:$4 sm:$0xff]   ;;  %3609 = vmatprep.subr.bf16.mxu0 %v3997_v11 }
0x1459   :  { %v1600_v53 = vmul.f32 %v4414_v44, %v1435_v58  ;;  %v784_v58 = vrot.slane %v4251_v21, %v4157_v51  ;;  %v1486_v21 = vrot.slane %v4396_v1, %v4157_v51  ;;  %v1123_v1 = vrot.slane %v4331_v13, %v4157_v51  ;;  %1831 = vmatprep.subr.bf16.mxu1 %v3721_v24  ;;  %v3724_v13 = vld [vmem:[%s4857_s5 + $0x34] ss:$8 sps:$4 sm:$0xff]  }
0x145a   :  { %1832 = vmatpush1.bf16.msra.mxu1 %v3719_v38 }
0x145b   :  { %1833 = vmatprep.subr.bf16.mxu1 %v3724_v13 }
0x145e   :  { %1834 = vmatpush1.bf16.msra.mxu1 %v3722_v7 }
0x145f   :  { %1897 = vmatprep.subr.bf16.mxu1 %v3727_v3 }
0x14b8   :  { %v1627_v42 = vpop.permute.xlu0 %1626 }
0x14b9   :  { %v1629_v43 = vmul.f32 %v3856_v40, %v1627_v42 }
0x14bb   :  { %1631 = vrot.lane.b32.xlu0 %v1629_v43, %s4001_s23 }
0x14bc   :  { %v1603_v45 = vpop.permute.xlu1 %1602 }
0x14bd   :  { %v1605_v46 = vmul.f32 %v4414_v44, %v1603_v45 }
0x14bf   :  { %1607 = vrot.lane.b32.xlu1 %v1605_v46, %s4001_s23 }
0x152d   :  { %v1632_v49 = vpop.permute.xlu0 %1631 }
0x152e   :  { %v4418_v52 = vadd.f32 %v1632_v49, %v1624_v48 }
0x1530   :  { %3859 = vtanh.f32 %v4418_v52 }
0x1531   :  { %v1608_v54 = vpop.permute.xlu1 %1607 }
0x1532   :  { %v4422_v56 = vadd.f32 %v1608_v54, %v1600_v53 }
0x1534   :  { %3861 = vtanh.f32 %v4422_v56 }
0x153a   :  { %v3860_v57 = vpop.eup %3859 }
0x153b   :  { %1637 = vrot.lane.b32.xlu0 %v3860_v57, %s4000_s4 }
0x153e   :  { %v3862_v61 = vpop.eup %3861 }
0x153f   :  { %431 = vrot.lane.b32.xlu0 %v430_v59, %s4001_s23  ;;  %1613 = vrot.lane.b32.xlu1 %v3862_v61, %s4000_s4 }
0x1543   :  { %785 = vrot.lane.b32.xlu0 %v784_v58, %s4001_s23  ;;  %608 = vrot.lane.b32.xlu1 %v607_v55, %s4001_s23 }
0x1547   :  { %1137 = vrot.lane.b32.xlu0 %v1136_v47, %s4001_s23  ;;  %962 = vrot.lane.b32.xlu1 %v961_v62, %s4001_s23 }
0x154b   :  { %1487 = vrot.lane.b32.xlu0 %v1486_v21, %s4001_s23  ;;  %1312 = vrot.lane.b32.xlu1 %v1311_v32, %s4001_s23 }
0x154f   :  { %418 = vrot.lane.b32.xlu0 %v417_v14, %s4001_s23  ;;  %595 = vrot.lane.b32.xlu1 %v594_v5, %s4001_s23  ;;  %v3725_v14 = vld [vmem:[%s4857_s5] ss:$8 sps:$4 sm:$0xff]  }
0x1553   :  { %772 = vrot.lane.b32.xlu0 %v771_v63, %s4001_s23 }
0x1557   :  { %1124 = vrot.lane.b32.xlu0 %v1123_v1, %s4001_s23  ;;  %v3730_v1 = vld [vmem:[%s4857_s5 + $0x14] ss:$8 sps:$4 sm:$0xff]  }
0x155b   :  { %1474 = vrot.lane.b32.xlu0 %v1473_v50, %s4001_s23 }
0x15ad   :  { %v1638_v60 = vpop.permute.xlu0 %1637 }
0x15ae   :  { %v1640_v4 = vmul.f32 %v3856_v40, %v1638_v60 }
0x15b0   :  { %v4476_v0 = vrot.slane %v1640_v4, %v4157_v51  ;;  %v3728_v4 = vld [vmem:[%s4857_s5 + $0x10] ss:$8 sps:$4 sm:$0xff]  }
0x15b1   :  { %v432_v8 = vpop.permute.xlu0 %431  ;;  %v1614_v10 = vpop.permute.xlu1 %1613 }
0x15b2   :  { %435 = vst.msk [vmem:[#allocation4 + $0xe] sm:$0x3] %vm421_vm2, %v432_v8  ;;  %1662 = vrot.lane.b32.xlu1 %v4476_v0, %s4001_s23  ;;  %v1616_v17 = vmul.f32 %v4414_v44, %v1614_v10 }
0x15b4   :  { %v1648_v18 = vrot.slane %v1616_v17, %v4157_v51 }
0x15b5   :  { %v786_v15 = vpop.permute.xlu0 %785  ;;  %v609_v34 = vpop.permute.xlu1 %608 }
0x15b6   :  { %789 = vst.msk [vmem:[#allocation4 + $0xa] sm:$0x3] %vm421_vm2, %v786_v15  ;;  %612 = vst.msk [vmem:[#allocation4 + $0xc] sm:$0x3] %vm421_vm2, %v609_v34  ;;  %949 = vrot.lane.b32.xlu1 %v948_v9, %s4001_s23 }
0x15b9   :  { %v1138_v19 = vpop.permute.xlu0 %1137  ;;  %v963_v20 = vpop.permute.xlu1 %962  ;;  %v1762_v46 = vld [vmem:[#allocation4 + $0xe] sm:$0x3] }
0x15ba   :  { %1141 = vst.msk [vmem:[#allocation4 + $0x6] sm:$0x3] %vm421_vm2, %v1138_v19  ;;  %966 = vst.msk [vmem:[#allocation4 + $0x8] sm:$0x3] %vm421_vm2, %v963_v20  ;;  %1299 = vrot.lane.b32.xlu1 %v1298_v16, %s4001_s23 }
0x15bd   :  { %v1488_v22 = vpop.permute.xlu0 %1487  ;;  %v1313_v23 = vpop.permute.xlu1 %1312  ;;  %v1760_v42 = vld [vmem:[#allocation4 + $0xa] sm:$0x3]  ;;  %v1761_v43 = vld [vmem:[#allocation4 + $0xc] sm:$0x3] }
0x15be   :  { %1491 = vst.msk [vmem:[#allocation4 + $0x2] sm:$0x3] %vm421_vm2, %v1488_v22  ;;  %1316 = vst.msk [vmem:[#allocation4 + $0x4] sm:$0x3] %vm421_vm2, %v1313_v23  ;;  %1649 = vrot.lane.b32.xlu1 %v1648_v18, %s4001_s23  ;;  %v1789_v49 = vcombine.low %v1761_v43, %v1762_v46  ;;  %v2058_v22 = vpop.f32.mrb[36].mxu0 }
0x15bf   :  { %v3575_v23 = vpop.f32.mrb[37].mxu0 }
0x15c0   :  { %v1803_v62 = vrot.slane %v1789_v49, %v4157_v51 }
0x15c1   :  { %v419_v12 = vpop.permute.xlu0 %418  ;;  %v596_v36 = vpop.permute.xlu1 %595  ;;  %v1759_v35 = vld [vmem:[#allocation4 + $0x8] sm:$0x3]  ;;  %v1758_v45 = vld [vmem:[#allocation4 + $0x6] sm:$0x3] }
0x15c2   :  { %422 = vst.msk [vmem:[#allocation3] sm:$0x3] %vm421_vm2, %v419_v12  ;;  %599 = vst.msk [vmem:[#allocation3 + $0x2] sm:$0x3] %vm421_vm2, %v596_v36  ;;  %v1788_v44 = vcombine.low %v1759_v35, %v1760_v42  ;;  %v2061_v12 = vpop.f32.mrb[38].mxu0 }
0x15c3   :  { %v3576_v36 = vpop.f32.mrb[39].mxu0  ;;  %v1701_v35 = vld [vmem:[%s4860_s8] sm:$0x3] }
0x15c4   :  { %v1796_v61 = vrot.slane %v1788_v44, %v4157_v51 }
0x15c5   :  { %v773_v27 = vpop.permute.xlu0 %772  ;;  %v1757_v40 = vld [vmem:[#allocation4 + $0x4] sm:$0x3]  ;;  %v1756_v57 = vld [vmem:[#allocation4 + $0x2] sm:$0x3] }
0x15c6   :  { %776 = vst.msk [vmem:[#allocation3 + $0x4] sm:$0x3] %vm421_vm2, %v773_v27  ;;  %v1772_v48 = vcombine.low %v1757_v40, %v1758_v45  ;;  %v1804_v21 = vcombine.low %v1796_v61, %v1803_v62  ;;  %v2112_v27 = vpop.f32.mrb[40].mxu0  ;;  %v1948_v40 = vrot.slane %v1701_v35, %v63_v41 }
0x15c8   :  { %v1786_v58 = vrot.slane %v1772_v48, %v4157_v51 }
0x15c9   :  { %v1125_v29 = vpop.permute.xlu0 %1124  ;;  %v1702_v50 = vld [vmem:[#allocation3] sm:$0x3]  ;;  %v1703_v38 = vld [vmem:[#allocation3 + $0x2] sm:$0x3] }
0x15ca   :  { %1128 = vst.msk [vmem:[#allocation3 + $0x8] sm:$0x3] %vm421_vm2, %v1125_v29  ;;  %v1718_v8 = vcombine.low %v1702_v50, %v1703_v38  ;;  %v3583_v29 = vpop.f32.mrb[41].mxu0 }
0x15cc   :  { %v1726_v16 = vrot.slane %v1718_v8, %v4157_v51 }
0x15cd   :  { %v1475_v33 = vpop.permute.xlu0 %1474  ;;  %v1704_v24 = vld [vmem:[#allocation3 + $0x4] sm:$0x3] }
0x15ce   :  { %1478 = vst.msk [vmem:[#allocation3 + $0xc] sm:$0x3] %vm421_vm2, %v1475_v33  ;;  %v2115_v33 = vpop.f32.mrb[42].mxu0 }
0x15d1   :  { %v1706_v7 = vld [vmem:[#allocation3 + $0x8] sm:$0x3] }
0x15d5   :  { %v1708_v3 = vld [vmem:[#allocation3 + $0xc] sm:$0x3] }
0x1624   :  { %v1663_v30 = vpop.permute.xlu1 %1662 }
0x1625   :  { %1665 = vst.msk [vmem:[#allocation4] sm:$0x3] %vm421_vm2, %v1663_v30  ;;  %v3584_v30 = vpop.f32.mrb[43].mxu0 }
0x1628   :  { %v950_v39 = vpop.permute.xlu1 %949 }
0x1629   :  { %953 = vst.msk [vmem:[#allocation3 + $0x6] sm:$0x3] %vm421_vm2, %v950_v39  ;;  %v1944_v39 = vrot.slane %v1701_v35, %v59_v37 }
0x162c   :  { %v1300_v53 = vpop.permute.xlu1 %1299  ;;  %v1755_v54 = vld [vmem:[#allocation4] sm:$0x3] }
0x162d   :  { %1303 = vst.msk [vmem:[#allocation3 + $0xa] sm:$0x3] %vm421_vm2, %v1300_v53  ;;  %v1771_v59 = vcombine.low %v1755_v54, %v1756_v57 }
0x162f   :  { %v1779_v55 = vrot.slane %v1771_v59, %v4157_v51 }
0x1630   :  { %v4549_v47 = vpop.permute.xlu1 %1649  ;;  %v1705_v5 = vld [vmem:[#allocation3 + $0x6] sm:$0x3] }
0x1631   :  { %1653 = vst.msk [vmem:[#allocation3 + $0xe] sm:$0x3] %vm421_vm2, %v4549_v47  ;;  %v1787_v32 = vcombine.low %v1779_v55, %v1786_v58  ;;  %v1719_v13 = vcombine.low %v1704_v24, %v1705_v5 }
0x1633   :  { %v1807_v63 = vpack.c.bf16 %v1804_v21, %v1787_v32  ;;  %v1733_v15 = vrot.slane %v1719_v13, %v4157_v51 }
0x1634   :  { %v1707_v60 = vld [vmem:[#allocation3 + $0xa] sm:$0x3] }
0x1635   :  { %3299 = vmatmul.mubr.msk.bf16.vlgmr.msra.gmra.mrb[32].mxu1 %vm144_vm1, %v1807_v63  ;;  %v1735_v10 = vcombine.low %v1706_v7, %v1707_v60  ;;  %v1734_v20 = vcombine.low %v1726_v16, %v1733_v15 }
0x1636   :  { %1898 = vmatpush1.bf16.msra.mxu1 %v3725_v14  ;;  %1929 = vmatprep.mubr.bf16.mxu1 %v3995_v2 }
0x1637   :  { %1899 = vmatprep.subr.bf16.mxu1 %v3730_v1  ;;  %v1743_v17 = vrot.slane %v1735_v10, %v4157_v51 }
0x1638   :  { %v1709_v9 = vld [vmem:[#allocation3 + $0xe] sm:$0x3] }
0x1639   :  { %v1736_v34 = vcombine.low %v1708_v3, %v1709_v9 }
0x163a   :  { %1900 = vmatpush1.bf16.msra.mxu1 %v3728_v4 }
0x163b   :  { %v1750_v19 = vrot.slane %v1736_v34, %v4157_v51  ;;  %3585 = vmatprep.subr.bf16.mxu1 %v3997_v11 }
0x163d   :  { %v1751_v2 = vcombine.low %v1743_v17, %v1750_v19 }
0x163f   :  { %v1754_v18 = vpack.c.bf16 %v1751_v2, %v1734_v20 }
0x1641   :  { %3304 = vmatmul.mubr.msk.bf16.vlgmr.msra.gmra.mrb[32].mxu1 %vm144_vm1, %v1754_v18 }
0x1642   :  { %3586 = vmatpush3.bf16.msra.mxu1 %v4504_v25  ;;  %3589 = vmatprep.mubr.msk.bf16.mxu1 %vm3998_vm0, %v3997_v11 }
0x1643   :  { %3587 = vmatprep.subr.bf16.mxu1 %v3997_v11 }
0x1646   :  { %3588 = vmatpush3.bf16.msra.mxu1 %v4510_v26 }
0x1647   :  { %3601 = vmatprep.subr.bf16.mxu1 %v3997_v11 }
0x1714   :  { %v1931_v42 = vpop.f32.mrb[32].mxu1 }
0x1715   :  { %v1951_v43 = vadd.f32 %v1944_v39, %v1931_v42  ;;  %v1933_v44 = vpop.f32.mrb[33].mxu1 }
0x1716   :  { %v1952_v45 = vadd.f32 %v1948_v40, %v1933_v44  ;;  %v1935_v46 = vpop.f32.mrb[34].mxu1 }
0x1717   :  { %v1953_v48 = vadd.f32 %v1944_v39, %v1935_v46  ;;  %v1937_v49 = vpop.f32.mrb[35].mxu1 }
0x1718   :  { %v1959_v53 = vcombine.low %v1951_v43, %v1952_v45  ;;  %v1960_v54 = vcombine.high %v1951_v43, %v1952_v45  ;;  %v1954_v57 = vadd.f32 %v1948_v40, %v1937_v49 }
0x171a   :  { %v1967_v59 = vrot.slane %v1959_v53, %v4157_v51  ;;  %v1974_v61 = vrot.slane %v1960_v54, %v4157_v51  ;;  %3305 = vst.sshfl [vmem:[#allocation2] sm:$0x33 pattern:$0x76325410] %v1959_v53  ;;  %v1977_v37 = vcombine.low %v1953_v48, %v1954_v57  ;;  %v1978_v55 = vcombine.high %v1953_v48, %v1954_v57 }
0x171b   :  { %3306 = vst.sshfl [vmem:[#allocation2 + $0x8] sm:$0x33 pattern:$0x76325410] %v1960_v54 }
0x171c   :  { %v1975_v6 = vcombine.high %v1967_v59, %v1967_v59  ;;  %v1976_v41 = vcombine.high %v1974_v61, %v1974_v61  ;;  %v1985_v58 = vrot.slane %v1977_v37, %v4157_v51  ;;  %v1992_v62 = vrot.slane %v1978_v55, %v4157_v51  ;;  %3307 = vst.sshfl [vmem:[#allocation2 + $0x10] sm:$0x33 pattern:$0x76325410] %v1977_v37 }
0x171d   :  { %3308 = vst.sshfl [vmem:[#allocation2 + $0x18] sm:$0x33 pattern:$0x76325410] %v1978_v55 }
0x171e   :  { %2004 = vst [vmem:[#allocation2 + $0x4] sm:$0xf] %v1975_v6  ;;  %2006 = vst [vmem:[#allocation2 + $0xc] sm:$0xf] %v1976_v41  ;;  %v1993_v32 = vcombine.high %v1985_v58, %v1985_v58  ;;  %v1994_v21 = vcombine.high %v1992_v62, %v1992_v62 }
0x1720   :  { %2008 = vst [vmem:[#allocation2 + $0x14] sm:$0xf] %v1993_v32  ;;  %2010 = vst [vmem:[#allocation2 + $0x1c] sm:$0xf] %v1994_v21 }
0x1721   :  { %v4587_v14 = vld [vmem:[#allocation2] sm:$0xf] }
0x1722   :  { %v2064_v5 = vadd.f32 %v2058_v22, %v4587_v14 }
0x1724   :  { %3863 = vtanh.f32 %v2064_v5  ;;  %v3313_v60 = vmul.f32 -1.442695, %v2064_v5  ;;  %v4624_v53 = vld [vmem:[#allocation2 + $0x18] sm:$0xf] }
0x1725   :  { %v4621_v43 = vld [vmem:[#allocation2 + $0x4] sm:$0xf]  ;;  %v2268_v54 = vrot.slane %v4624_v53, 2 }
0x1727   :  { %v4590_v63 = vld [vmem:[#allocation2 + $0x1c] sm:$0xf] }
0x1728   :  { %v2119_v1 = vrot.slane %v4590_v63, 2 }
0x172a   :  { %v2121_v50 = vadd.f32 %v2119_v1, %v2112_v27 }
0x172c   :  { %3865 = vtanh.f32 %v2121_v50  ;;  %v3314_v13 = vmul.f32 -1.442695, %v2121_v50 }
0x172d   :  { %3867 = vpow2.f32 %v3313_v60 }
0x172e   :  { %v3864_v38 = vpop.eup %3863  ;;  %3869 = vpow2.f32 %v3314_v13 }
0x172f   :  { %2131 = vrot.lane.b32.xlu0 %v3864_v38, %s4000_s4 }
0x1736   :  { %v3866_v24 = vpop.eup %3865 }
0x1737   :  { %2155 = vrot.lane.b32.xlu1 %v3866_v24, %s4000_s4  ;;  %v3868_v4 = vpop.eup %3867 }
0x1738   :  { %v2125_v7 = vadd.f32 1.0, %v3868_v4  ;;  %v3870_v8 = vpop.eup %3869 }
0x1739   :  { %v2149_v10 = vadd.f32 1.0, %v3870_v8 }
0x173a   :  { %3871 = vrcp.f32 %v2125_v7 }
0x173b   :  { %3873 = vrcp.f32 %v2149_v10 }
0x1744   :  { %v3872_v3 = vpop.eup %3871 }
0x1745   :  { %v3874_v34 = vpop.eup %3873  ;;  %v2129_v19 = vmul.f32 0.0, %v3872_v3 }
0x1746   :  { %v2153_v18 = vmul.f32 0.0, %v3874_v34 }
0x17a1   :  { %v2132_v9 = vpop.permute.xlu0 %2131 }
0x17a2   :  { %v2134_v15 = vmul.f32 %v3872_v3, %v2132_v9 }
0x17a4   :  { %2136 = vrot.lane.b32.xlu0 %v2134_v15, %s4001_s23 }
0x17a9   :  { %v2156_v16 = vpop.permute.xlu1 %2155 }
0x17aa   :  { %v2158_v17 = vmul.f32 %v3874_v34, %v2156_v16 }
0x17ac   :  { %2160 = vrot.lane.b32.xlu1 %v2158_v17, %s4001_s23 }
0x1816   :  { %v2137_v20 = vpop.permute.xlu0 %2136 }
0x1817   :  { %v4597_v2 = vadd.f32 %v2137_v20, %v2129_v19 }
0x1819   :  { %3875 = vtanh.f32 %v4597_v2 }
0x181e   :  { %v2161_v22 = vpop.permute.xlu1 %2160 }
0x181f   :  { %v4600_v23 = vadd.f32 %v2161_v22, %v2153_v18 }
0x1821   :  { %3877 = vtanh.f32 %v4600_v23 }
0x1823   :  { %v3876_v12 = vpop.eup %3875 }
0x1824   :  { %2142 = vrot.lane.b32.xlu0 %v3876_v12, %s4000_s4 }
0x182b   :  { %v3878_v36 = vpop.eup %3877 }
0x182c   :  { %2166 = vrot.lane.b32.xlu1 %v3878_v36, %s4000_s4  ;;  %v4657_v36 = vld [vmem:[#allocation2 + $0x8] sm:$0xf] }
0x1896   :  { %v2143_v27 = vpop.permute.xlu0 %2142 }
0x1897   :  { %v2145_v29 = vmul.f32 %v3872_v3, %v2143_v27 }
0x1899   :  { %v2171_v33 = vpack.c.bf16 %v2145_v29, %v2145_v29 }
0x189b   :  { %2173 = vrot.lane.b32.xlu0 %v2171_v33, %s4001_s23 }
0x189e   :  { %v2167_v30 = vpop.permute.xlu1 %2166 }
0x189f   :  { %v2169_v35 = vmul.f32 %v3874_v34, %v2167_v30 }
0x18a1   :  { %v2220_v39 = vpack.c.bf16 %v2169_v35, %v2169_v35 }
0x18a3   :  { %2222 = vrot.lane.b32.xlu1 %v2220_v39, %s4001_s23  ;;  %v4660_v39 = vld [vmem:[#allocation2 + $0x14] sm:$0xf] }
0x190d   :  { %v2174_v40 = vpop.permute.xlu0 %2173 }
0x190e   :  { %3590 = vmatmul.mubr.msk.bf16.vlgmr.msra.gmra.mrb[36].mxu1 %vm144_vm1, %v2174_v40  ;;  %v2417_v40 = vrot.slane %v4660_v39, 2 }
0x190f   :  { %3602 = vmatpush3.bf16.msra.mxu1 %v4504_v25  ;;  %3605 = vmatprep.mubr.msk.bf16.mxu1 %vm3998_vm0, %v3997_v11 }
0x1910   :  { %3603 = vmatprep.subr.bf16.mxu1 %v3997_v11 }
0x1913   :  { %3604 = vmatpush3.bf16.msra.mxu1 %v4510_v26 }
0x1914   :  { %3617 = vmatprep.subr.bf16.mxu1 %v3997_v11 }
0x1915   :  { %v2223_v42 = vpop.permute.xlu1 %2222 }
0x1916   :  { %3598 = vmatmul.mubr.msk.bf16.vlgmr.msra.gmra.mrb[44].mxu0 %vm144_vm1, %v2223_v42 }
0x1917   :  { %3610 = vmatpush3.bf16.msra.mxu0 %v4518_v28  ;;  %3613 = vmatprep.mubr.msk.bf16.mxu0 %vm3998_vm0, %v3997_v11 }
0x1918   :  { %3611 = vmatprep.subr.bf16.mxu0 %v3997_v11 }
0x191b   :  { %3612 = vmatpush3.bf16.msra.mxu0 %v4527_v31 }
0x191c   :  { %3625 = vmatprep.subr.bf16.mxu0 %v3997_v11 }
0x19e1   :  { %v2212_v44 = vpop.f32.mrb[36].mxu1 }
0x19e2   :  { %v2218_v45 = vadd.f32 %v2212_v44, %v4621_v43  ;;  %v3591_v46 = vpop.f32.mrb[37].mxu1 }
0x19e3   :  { %v2215_v48 = vpop.f32.mrb[38].mxu1 }
0x19e4   :  { %3879 = vtanh.f32 %v2218_v45  ;;  %v3592_v49 = vpop.f32.mrb[39].mxu1  ;;  %v3317_v58 = vmul.f32 -1.442695, %v2218_v45 }
0x19e9   :  { %v2261_v57 = vpop.f32.mrb[44].mxu0 }
0x19ea   :  { %v2270_v59 = vadd.f32 %v2268_v54, %v2261_v57  ;;  %v3599_v61 = vpop.f32.mrb[45].mxu0 }
0x19eb   :  { %v2264_v37 = vpop.f32.mrb[46].mxu0 }
0x19ec   :  { %3881 = vtanh.f32 %v2270_v59  ;;  %v3600_v55 = vpop.f32.mrb[47].mxu0  ;;  %v3318_v62 = vmul.f32 -1.442695, %v2270_v59 }
0x19ed   :  { %3883 = vpow2.f32 %v3317_v58 }
0x19ee   :  { %v3880_v6 = vpop.eup %3879  ;;  %3885 = vpow2.f32 %v3318_v62 }
0x19ef   :  { %2280 = vrot.lane.b32.xlu0 %v3880_v6, %s4000_s4 }
0x19f6   :  { %v3882_v41 = vpop.eup %3881 }
0x19f7   :  { %2304 = vrot.lane.b32.xlu1 %v3882_v41, %s4000_s4  ;;  %v3884_v32 = vpop.eup %3883 }
0x19f8   :  { %v2274_v21 = vadd.f32 1.0, %v3884_v32  ;;  %v3886_v5 = vpop.eup %3885 }
0x19f9   :  { %v2298_v1 = vadd.f32 1.0, %v3886_v5 }
0x19fa   :  { %3887 = vrcp.f32 %v2274_v21 }
0x19fb   :  { %3889 = vrcp.f32 %v2298_v1 }
0x1a04   :  { %v3888_v50 = vpop.eup %3887 }
0x1a05   :  { %v3890_v60 = vpop.eup %3889  ;;  %v2278_v7 = vmul.f32 %v3888_v50, %v4597_v2 }
0x1a06   :  { %v2302_v3 = vmul.f32 %v3890_v60, %v4600_v23 }
0x1a61   :  { %v2281_v38 = vpop.permute.xlu0 %2280 }
0x1a62   :  { %v2283_v24 = vmul.f32 %v3888_v50, %v2281_v38 }
0x1a64   :  { %2285 = vrot.lane.b32.xlu0 %v2283_v24, %s4001_s23 }
0x1a69   :  { %v2305_v13 = vpop.permute.xlu1 %2304 }
0x1a6a   :  { %v2307_v4 = vmul.f32 %v3890_v60, %v2305_v13 }
0x1a6c   :  { %2309 = vrot.lane.b32.xlu1 %v2307_v4, %s4001_s23 }
0x1ad6   :  { %v2286_v8 = vpop.permute.xlu0 %2285 }
0x1ad7   :  { %v4632_v10 = vadd.f32 %v2286_v8, %v2278_v7 }
0x1ad9   :  { %3891 = vtanh.f32 %v4632_v10 }
0x1ade   :  { %v2310_v9 = vpop.permute.xlu1 %2309 }
0x1adf   :  { %v4636_v15 = vadd.f32 %v2310_v9, %v2302_v3 }
0x1ae1   :  { %3893 = vtanh.f32 %v4636_v15 }
0x1ae3   :  { %v3892_v34 = vpop.eup %3891 }
0x1ae4   :  { %2291 = vrot.lane.b32.xlu0 %v3892_v34, %s4000_s4 }
0x1aeb   :  { %v3894_v16 = vpop.eup %3893 }
0x1aec   :  { %2315 = vrot.lane.b32.xlu1 %v3894_v16, %s4000_s4 }
0x1b56   :  { %v2292_v17 = vpop.permute.xlu0 %2291 }
0x1b57   :  { %v2294_v19 = vmul.f32 %v3888_v50, %v2292_v17 }
0x1b59   :  { %v2320_v20 = vpack.c.bf16 %v2294_v19, %v2294_v19  ;;  %v4693_v19 = vld [vmem:[#allocation2 + $0xc] sm:$0xf] }
0x1b5b   :  { %2322 = vrot.lane.b32.xlu0 %v2320_v20, %s4001_s23 }
0x1b5e   :  { %v2316_v2 = vpop.permute.xlu1 %2315 }
0x1b5f   :  { %v2318_v18 = vmul.f32 %v3890_v60, %v2316_v2 }
0x1b61   :  { %v2369_v22 = vpack.c.bf16 %v2318_v18, %v2318_v18 }
0x1b63   :  { %2371 = vrot.lane.b32.xlu1 %v2369_v22, %s4001_s23 }
0x1bcd   :  { %v2323_v23 = vpop.permute.xlu0 %2322 }
0x1bce   :  { %3606 = vmatmul.mubr.msk.bf16.vlgmr.msra.gmra.mrb[40].mxu1 %vm144_vm1, %v2323_v23 }
0x1bcf   :  { %3618 = vmatpush3.bf16.msra.mxu1 %v4504_v25  ;;  %3621 = vmatprep.mubr.msk.bf16.mxu1 %vm3998_vm0, %v3997_v11 }
0x1bd0   :  { %3619 = vmatprep.subr.bf16.mxu1 %v3997_v11 }
0x1bd3   :  { %3620 = vmatpush3.bf16.msra.mxu1 %v4510_v26 }
0x1bd4   :  { %3633 = vmatprep.subr.bf16.mxu1 %v3997_v11 }
0x1bd5   :  { %v2372_v12 = vpop.permute.xlu1 %2371 }
0x1bd6   :  { %3614 = vmatmul.mubr.msk.bf16.vlgmr.msra.gmra.mrb[48].mxu0 %vm144_vm1, %v2372_v12  ;;  %v4696_v12 = vld [vmem:[#allocation2 + $0x10] sm:$0xf] }
0x1bd7   :  { %3626 = vmatpush3.bf16.msra.mxu0 %v4518_v28  ;;  %3629 = vmatprep.mubr.msk.bf16.mxu0 %vm3998_vm0, %v3997_v11 }
0x1bd8   :  { %3627 = vmatprep.subr.bf16.mxu0 %v3997_v11 }
0x1bdb   :  { %3628 = vmatpush3.bf16.msra.mxu0 %v4527_v31 }
0x1bdc   :  { %3641 = vmatprep.subr.bf16.mxu0 %v3997_v11 }
0x1ca1   :  { %v2361_v27 = vpop.f32.mrb[40].mxu1 }
0x1ca2   :  { %v2367_v29 = vadd.f32 %v2361_v27, %v4657_v36  ;;  %v3607_v33 = vpop.f32.mrb[41].mxu1  ;;  %v2566_v27 = vrot.slane %v4696_v12, 2 }
0x1ca3   :  { %v2364_v30 = vpop.f32.mrb[42].mxu1 }
0x1ca4   :  { %3895 = vtanh.f32 %v2367_v29  ;;  %v3608_v35 = vpop.f32.mrb[43].mxu1  ;;  %v3321_v57 = vmul.f32 -1.442695, %v2367_v29 }
0x1ca9   :  { %v2410_v42 = vpop.f32.mrb[48].mxu0 }
0x1caa   :  { %v2419_v44 = vadd.f32 %v2417_v40, %v2410_v42  ;;  %v3615_v45 = vpop.f32.mrb[49].mxu0 }
0x1cab   :  { %v2413_v46 = vpop.f32.mrb[50].mxu0 }
0x1cac   :  { %3897 = vtanh.f32 %v2419_v44  ;;  %v3616_v48 = vpop.f32.mrb[51].mxu0  ;;  %v3322_v59 = vmul.f32 -1.442695, %v2419_v44 }
0x1cad   :  { %3899 = vpow2.f32 %v3321_v57 }
0x1cae   :  { %v3896_v49 = vpop.eup %3895  ;;  %3901 = vpow2.f32 %v3322_v59 }
0x1caf   :  { %2429 = vrot.lane.b32.xlu0 %v3896_v49, %s4000_s4 }
0x1cb6   :  { %v3898_v54 = vpop.eup %3897 }
0x1cb7   :  { %2453 = vrot.lane.b32.xlu1 %v3898_v54, %s4000_s4  ;;  %v3900_v61 = vpop.eup %3899 }
0x1cb8   :  { %v2423_v37 = vadd.f32 1.0, %v3900_v61  ;;  %v3902_v55 = vpop.eup %3901 }
0x1cb9   :  { %v2447_v6 = vadd.f32 1.0, %v3902_v55 }
0x1cba   :  { %3903 = vrcp.f32 %v2423_v37 }
0x1cbb   :  { %3905 = vrcp.f32 %v2447_v6 }
0x1cc4   :  { %v3904_v41 = vpop.eup %3903 }
0x1cc5   :  { %v3906_v32 = vpop.eup %3905  ;;  %v2427_v1 = vmul.f32 %v3904_v41, %v4632_v10 }
0x1cc6   :  { %v2451_v24 = vmul.f32 %v3906_v32, %v4636_v15 }
0x1d21   :  { %v2430_v58 = vpop.permute.xlu0 %2429 }
0x1d22   :  { %v2432_v62 = vmul.f32 %v3904_v41, %v2430_v58 }
0x1d24   :  { %2434 = vrot.lane.b32.xlu0 %v2432_v62, %s4001_s23 }
0x1d29   :  { %v2454_v21 = vpop.permute.xlu1 %2453 }
0x1d2a   :  { %v2456_v5 = vmul.f32 %v3906_v32, %v2454_v21 }
0x1d2c   :  { %2458 = vrot.lane.b32.xlu1 %v2456_v5, %s4001_s23 }
0x1d96   :  { %v2435_v50 = vpop.permute.xlu0 %2434 }
0x1d97   :  { %v4668_v38 = vadd.f32 %v2435_v50, %v2427_v1 }
0x1d99   :  { %3907 = vtanh.f32 %v4668_v38 }
0x1d9e   :  { %v2459_v60 = vpop.permute.xlu1 %2458 }
0x1d9f   :  { %v4672_v13 = vadd.f32 %v2459_v60, %v2451_v24 }
0x1da1   :  { %3909 = vtanh.f32 %v4672_v13 }
0x1da3   :  { %v3908_v4 = vpop.eup %3907 }
0x1da4   :  { %2440 = vrot.lane.b32.xlu0 %v3908_v4, %s4000_s4 }
0x1dab   :  { %v3910_v7 = vpop.eup %3909 }
0x1dac   :  { %2464 = vrot.lane.b32.xlu1 %v3910_v7, %s4000_s4 }
0x1e16   :  { %v2441_v8 = vpop.permute.xlu0 %2440 }
0x1e17   :  { %v2443_v10 = vmul.f32 %v3904_v41, %v2441_v8 }
0x1e19   :  { %v2469_v3 = vpack.c.bf16 %v2443_v10, %v2443_v10 }
0x1e1b   :  { %2471 = vrot.lane.b32.xlu0 %v2469_v3, %s4001_s23 }
0x1e1e   :  { %v2465_v9 = vpop.permute.xlu1 %2464 }
0x1e1f   :  { %v2467_v34 = vmul.f32 %v3906_v32, %v2465_v9 }
0x1e21   :  { %v2518_v16 = vpack.c.bf16 %v2467_v34, %v2467_v34 }
0x1e23   :  { %2520 = vrot.lane.b32.xlu1 %v2518_v16, %s4001_s23 }
0x1e8d   :  { %v2472_v15 = vpop.permute.xlu0 %2471 }
0x1e8e   :  { %3622 = vmatmul.mubr.msk.bf16.vlgmr.msra.gmra.mrb[44].mxu1 %vm144_vm1, %v2472_v15 }
0x1e8f   :  { %3634 = vmatpush3.bf16.msra.mxu1 %v4504_v25  ;;  %3637 = vmatprep.mubr.msk.bf16.mxu1 %vm3998_vm0, %v3997_v11 }
0x1e90   :  { %3635 = vmatprep.subr.bf16.mxu1 %v3997_v11 }
0x1e93   :  { %3636 = vmatpush3.bf16.msra.mxu1 %v4510_v26 }
0x1e94   :  { %3649 = vmatprep.subr.bf16.mxu1 %v3997_v11 }
0x1e95   :  { %v2521_v17 = vpop.permute.xlu1 %2520 }
0x1e96   :  { %3630 = vmatmul.mubr.msk.bf16.vlgmr.msra.gmra.mrb[52].mxu0 %vm144_vm1, %v2521_v17 }
0x1e97   :  { %3642 = vmatpush3.bf16.msra.mxu0 %v4518_v28  ;;  %3645 = vmatprep.mubr.msk.bf16.mxu0 %vm3998_vm0, %v3997_v11 }
0x1e98   :  { %3643 = vmatprep.subr.bf16.mxu0 %v3997_v11 }
0x1e9b   :  { %3644 = vmatpush3.bf16.msra.mxu0 %v4527_v31 }
0x1e9c   :  { %3657 = vmatprep.subr.bf16.mxu0 %v3997_v11 }
0x1f61   :  { %v2510_v20 = vpop.f32.mrb[44].mxu1 }
0x1f62   :  { %v2516_v2 = vadd.f32 %v2510_v20, %v4693_v19  ;;  %v3623_v18 = vpop.f32.mrb[45].mxu1  ;;  %v2713_v20 = vrot.slane %v4693_v19, 2 }
0x1f63   :  { %v2513_v22 = vpop.f32.mrb[46].mxu1 }
0x1f64   :  { %3911 = vtanh.f32 %v2516_v2  ;;  %v3624_v23 = vpop.f32.mrb[47].mxu1  ;;  %v3325_v45 = vmul.f32 -1.442695, %v2516_v2 }
0x1f69   :  { %v2559_v29 = vpop.f32.mrb[52].mxu0 }
0x1f6a   :  { %v2568_v33 = vadd.f32 %v2566_v27, %v2559_v29  ;;  %v3631_v30 = vpop.f32.mrb[53].mxu0 }
0x1f6b   :  { %v2562_v35 = vpop.f32.mrb[54].mxu0 }
0x1f6c   :  { %3913 = vtanh.f32 %v2568_v33  ;;  %v3632_v40 = vpop.f32.mrb[55].mxu0  ;;  %v3326_v46 = vmul.f32 -1.442695, %v2568_v33 }
0x1f6d   :  { %3915 = vpow2.f32 %v3325_v45 }
0x1f6e   :  { %v3912_v42 = vpop.eup %3911  ;;  %3917 = vpow2.f32 %v3326_v46 }
0x1f6f   :  { %2578 = vrot.lane.b32.xlu0 %v3912_v42, %s4000_s4 }
0x1f76   :  { %v3914_v44 = vpop.eup %3913 }
0x1f77   :  { %2602 = vrot.lane.b32.xlu1 %v3914_v44, %s4000_s4  ;;  %v3916_v48 = vpop.eup %3915 }
0x1f78   :  { %v2572_v49 = vadd.f32 1.0, %v3916_v48  ;;  %v3918_v54 = vpop.eup %3917 }
0x1f79   :  { %v2596_v57 = vadd.f32 1.0, %v3918_v54 }
0x1f7a   :  { %3919 = vrcp.f32 %v2572_v49 }
0x1f7b   :  { %3921 = vrcp.f32 %v2596_v57 }
0x1f84   :  { %v3920_v59 = vpop.eup %3919 }
0x1f85   :  { %v3922_v55 = vpop.eup %3921  ;;  %v2576_v58 = vmul.f32 %v3920_v59, %v4668_v38 }
0x1f86   :  { %v2600_v21 = vmul.f32 %v3922_v55, %v4672_v13 }
0x1fe1   :  { %v2579_v61 = vpop.permute.xlu0 %2578 }
0x1fe2   :  { %v2581_v37 = vmul.f32 %v3920_v59, %v2579_v61 }
0x1fe4   :  { %2583 = vrot.lane.b32.xlu0 %v2581_v37, %s4001_s23 }
0x1fe9   :  { %v2603_v6 = vpop.permute.xlu1 %2602 }
0x1fea   :  { %v2605_v41 = vmul.f32 %v3922_v55, %v2603_v6 }
0x1fec   :  { %2607 = vrot.lane.b32.xlu1 %v2605_v41, %s4001_s23 }
0x2056   :  { %v2584_v62 = vpop.permute.xlu0 %2583 }
0x2057   :  { %v4704_v32 = vadd.f32 %v2584_v62, %v2576_v58 }
0x2059   :  { %3923 = vtanh.f32 %v4704_v32 }
0x205e   :  { %v2608_v5 = vpop.permute.xlu1 %2607 }
0x205f   :  { %v4708_v1 = vadd.f32 %v2608_v5, %v2600_v21 }
0x2061   :  { %3925 = vtanh.f32 %v4708_v1 }
0x2063   :  { %v3924_v50 = vpop.eup %3923 }
0x2064   :  { %2589 = vrot.lane.b32.xlu0 %v3924_v50, %s4000_s4 }
0x206b   :  { %v3926_v24 = vpop.eup %3925 }
0x206c   :  { %2613 = vrot.lane.b32.xlu1 %v3926_v24, %s4000_s4 }
0x20d6   :  { %v2590_v60 = vpop.permute.xlu0 %2589 }
0x20d7   :  { %v2592_v38 = vmul.f32 %v3920_v59, %v2590_v60 }
0x20d9   :  { %v2617_v4 = vpack.c.bf16 %v2592_v38, %v2592_v38 }
0x20db   :  { %2619 = vrot.lane.b32.xlu0 %v2617_v4, %s4001_s23 }
0x20de   :  { %v2614_v7 = vpop.permute.xlu1 %2613 }
0x20df   :  { %v2616_v8 = vmul.f32 %v3922_v55, %v2614_v7 }
0x20e1   :  { %v2665_v10 = vpack.c.bf16 %v2616_v8, %v2616_v8  ;;  %v2860_v8 = vrot.slane %v4657_v36, 2 }
0x20e3   :  { %2667 = vrot.lane.b32.xlu1 %v2665_v10, %s4001_s23 }
0x214d   :  { %v2620_v13 = vpop.permute.xlu0 %2619 }
0x214e   :  { %3638 = vmatmul.mubr.msk.bf16.vlgmr.msra.gmra.mrb[48].mxu1 %vm144_vm1, %v2620_v13 }
0x214f   :  { %3650 = vmatpush3.bf16.msra.mxu1 %v4504_v25  ;;  %3653 = vmatprep.mubr.msk.bf16.mxu1 %vm3998_vm0, %v3997_v11 }
0x2150   :  { %3651 = vmatprep.subr.bf16.mxu1 %v3997_v11 }
0x2153   :  { %3652 = vmatpush3.bf16.msra.mxu1 %v4510_v26 }
0x2154   :  { %3665 = vmatprep.subr.bf16.mxu1 %v3997_v11 }
0x2155   :  { %v2668_v3 = vpop.permute.xlu1 %2667 }
0x2156   :  { %3646 = vmatmul.mubr.msk.bf16.vlgmr.msra.gmra.mrb[56].mxu0 %vm144_vm1, %v2668_v3 }
0x2157   :  { %3658 = vmatpush3.bf16.msra.mxu0 %v4518_v28  ;;  %3661 = vmatprep.mubr.msk.bf16.mxu0 %vm3998_vm0, %v3997_v11 }
0x2158   :  { %3659 = vmatprep.subr.bf16.mxu0 %v3997_v11 }
0x215b   :  { %3660 = vmatpush3.bf16.msra.mxu0 %v4527_v31 }
0x215c   :  { %3673 = vmatprep.subr.bf16.mxu0 %v3997_v11 }
0x2221   :  { %v2658_v9 = vpop.f32.mrb[48].mxu1 }
0x2222   :  { %v2664_v34 = vadd.f32 %v2658_v9, %v4696_v12  ;;  %v3639_v16 = vpop.f32.mrb[49].mxu1 }
0x2223   :  { %v2661_v15 = vpop.f32.mrb[50].mxu1 }
0x2224   :  { %3927 = vtanh.f32 %v2664_v34  ;;  %v3640_v17 = vpop.f32.mrb[51].mxu1  ;;  %v3329_v30 = vmul.f32 -1.442695, %v2664_v34 }
0x2229   :  { %v2706_v2 = vpop.f32.mrb[56].mxu0 }
0x222a   :  { %v2715_v18 = vadd.f32 %v2713_v20, %v2706_v2  ;;  %v3647_v22 = vpop.f32.mrb[57].mxu0 }
0x222b   :  { %v2709_v23 = vpop.f32.mrb[58].mxu0 }
0x222c   :  { %3929 = vtanh.f32 %v2715_v18  ;;  %v3648_v27 = vpop.f32.mrb[59].mxu0  ;;  %v3330_v12 = vmul.f32 -1.442695, %v2715_v18 }
0x222d   :  { %3931 = vpow2.f32 %v3329_v30 }
0x222e   :  { %v3928_v29 = vpop.eup %3927  ;;  %3933 = vpow2.f32 %v3330_v12 }
0x222f   :  { %2725 = vrot.lane.b32.xlu0 %v3928_v29, %s4000_s4 }
0x2236   :  { %v3930_v33 = vpop.eup %3929 }
0x2237   :  { %2749 = vrot.lane.b32.xlu1 %v3930_v33, %s4000_s4  ;;  %v3932_v35 = vpop.eup %3931 }
0x2238   :  { %v2719_v40 = vadd.f32 1.0, %v3932_v35  ;;  %v3934_v19 = vpop.eup %3933 }
0x2239   :  { %v2743_v42 = vadd.f32 1.0, %v3934_v19 }
0x223a   :  { %3935 = vrcp.f32 %v2719_v40 }
0x223b   :  { %3937 = vrcp.f32 %v2743_v42 }
0x2244   :  { %v3936_v44 = vpop.eup %3935 }
0x2245   :  { %v3938_v48 = vpop.eup %3937  ;;  %v2723_v57 = vmul.f32 %v3936_v44, %v4704_v32 }
0x2246   :  { %v2747_v37 = vmul.f32 %v3938_v48, %v4708_v1 }
0x22a1   :  { %v2726_v45 = vpop.permute.xlu0 %2725 }
0x22a2   :  { %v2728_v46 = vmul.f32 %v3936_v44, %v2726_v45 }
0x22a4   :  { %2730 = vrot.lane.b32.xlu0 %v2728_v46, %s4001_s23 }
0x22a9   :  { %v2750_v49 = vpop.permute.xlu1 %2749 }
0x22aa   :  { %v2752_v54 = vmul.f32 %v3938_v48, %v2750_v49 }
0x22ac   :  { %2754 = vrot.lane.b32.xlu1 %v2752_v54, %s4001_s23 }
0x2316   :  { %v2731_v59 = vpop.permute.xlu0 %2730 }
0x2317   :  { %v4736_v61 = vadd.f32 %v2731_v59, %v2723_v57 }
0x2319   :  { %3939 = vtanh.f32 %v4736_v61 }
0x231e   :  { %v2755_v55 = vpop.permute.xlu1 %2754 }
0x231f   :  { %v4740_v6 = vadd.f32 %v2755_v55, %v2747_v37  ;;  %v3992_v37 = vld [vmem:[%s4858_s6 + $0x8] sm:$0xff]  }
0x2321   :  { %3941 = vtanh.f32 %v4740_v6 }
0x2323   :  { %v3940_v41 = vpop.eup %3939 }
0x2324   :  { %2736 = vrot.lane.b32.xlu0 %v3940_v41, %s4000_s4  ;;  %v3994_v41 = vld [vmem:[%s4859_s7 + $0x8] sm:$0xff]  }
0x232b   :  { %v3942_v58 = vpop.eup %3941 }
0x232c   :  { %2760 = vrot.lane.b32.xlu1 %v3942_v58, %s4000_s4 }
0x2396   :  { %v2737_v62 = vpop.permute.xlu0 %2736 }
0x2397   :  { %v2739_v32 = vmul.f32 %v3936_v44, %v2737_v62 }
0x2399   :  { %v2764_v21 = vpack.c.bf16 %v2739_v32, %v2739_v32 }
0x239b   :  { %2766 = vrot.lane.b32.xlu0 %v2764_v21, %s4001_s23 }
0x239e   :  { %v2761_v5 = vpop.permute.xlu1 %2760 }
0x239f   :  { %v2763_v50 = vmul.f32 %v3938_v48, %v2761_v5 }
0x23a1   :  { %v2812_v24 = vpack.c.bf16 %v2763_v50, %v2763_v50  ;;  %v3007_v50 = vrot.slane %v4621_v43, 2 }
0x23a3   :  { %2814 = vrot.lane.b32.xlu1 %v2812_v24, %s4001_s23 }
0x240d   :  { %v2767_v1 = vpop.permute.xlu0 %2766 }
0x240e   :  { %3654 = vmatmul.mubr.msk.bf16.vlgmr.msra.gmra.mrb[52].mxu1 %vm144_vm1, %v2767_v1 }
0x240f   :  { %3666 = vmatpush3.bf16.msra.mxu1 %v4504_v25  ;;  %3669 = vmatprep.mubr.msk.bf16.mxu1 %vm3998_vm0, %v3997_v11 }
0x2410   :  { %3667 = vmatprep.subr.bf16.mxu1 %v3997_v11 }
0x2413   :  { %3668 = vmatpush3.bf16.msra.mxu1 %v4510_v26 }
0x2414   :  { %3681 = vmatprep.subr.bf16.mxu1 %v3997_v11 }
0x2415   :  { %v2815_v60 = vpop.permute.xlu1 %2814 }
0x2416   :  { %3662 = vmatmul.mubr.msk.bf16.vlgmr.msra.gmra.mrb[60].mxu0 %vm144_vm1, %v2815_v60 }
0x2417   :  { %3674 = vmatpush3.bf16.msra.mxu0 %v4518_v28  ;;  %3677 = vmatprep.mubr.msk.bf16.mxu0 %vm3998_vm0, %v3997_v11 }
0x2418   :  { %3675 = vmatprep.subr.bf16.mxu0 %v3997_v11 }
0x241b   :  { %3676 = vmatpush3.bf16.msra.mxu0 %v4527_v31 }
0x241c   :  { %3689 = vmatprep.subr.bf16.mxu0 %v3997_v11 }
0x24e1   :  { %v2805_v25 = vpop.f32.mrb[52].mxu1 }
0x24e2   :  { %v2811_v38 = vadd.f32 %v2805_v25, %v4660_v39  ;;  %v3655_v26 = vpop.f32.mrb[53].mxu1 }
0x24e3   :  { %v2808_v4 = vpop.f32.mrb[54].mxu1 }
0x24e4   :  { %3943 = vtanh.f32 %v2811_v38  ;;  %v3656_v7 = vpop.f32.mrb[55].mxu1  ;;  %v3333_v16 = vmul.f32 -1.442695, %v2811_v38 }
0x24e9   :  { %v2853_v10 = vpop.f32.mrb[60].mxu0 }
0x24ea   :  { %v2862_v28 = vadd.f32 %v2860_v8, %v2853_v10  ;;  %v3663_v13 = vpop.f32.mrb[61].mxu0 }
0x24eb   :  { %v2856_v3 = vpop.f32.mrb[62].mxu0 }
0x24ec   :  { %3945 = vtanh.f32 %v2862_v28  ;;  %v3664_v9 = vpop.f32.mrb[63].mxu0  ;;  %v3334_v39 = vmul.f32 -1.442695, %v2862_v28 }
0x24ed   :  { %3947 = vpow2.f32 %v3333_v16 }
0x24ee   :  { %v3944_v34 = vpop.eup %3943  ;;  %3949 = vpow2.f32 %v3334_v39 }
0x24ef   :  { %2872 = vrot.lane.b32.xlu0 %v3944_v34, %s4000_s4 }
0x24f6   :  { %v3946_v31 = vpop.eup %3945 }
0x24f7   :  { %2896 = vrot.lane.b32.xlu1 %v3946_v31, %s4000_s4  ;;  %v3948_v15 = vpop.eup %3947 }
0x24f8   :  { %v2866_v17 = vadd.f32 1.0, %v3948_v15  ;;  %v3950_v36 = vpop.eup %3949 }
0x24f9   :  { %v2890_v20 = vadd.f32 1.0, %v3950_v36 }
0x24fa   :  { %3951 = vrcp.f32 %v2866_v17 }
0x24fb   :  { %3953 = vrcp.f32 %v2890_v20 }
0x2504   :  { %v3952_v2 = vpop.eup %3951 }
0x2505   :  { %v3954_v23 = vpop.eup %3953  ;;  %v2870_v33 = vmul.f32 %v3952_v2, %v4736_v61  ;;  %v3991_v61 = vld [vmem:[%s4858_s6] sm:$0xff]   ;;  %s4002_s6 = smov 96  }
0x2506   :  { %v2894_v35 = vmul.f32 %v3954_v23, %v4740_v6  ;;  %v3993_v6 = vld [vmem:[%s4859_s7] sm:$0xff]  }
0x2561   :  { %v2873_v18 = vpop.permute.xlu0 %2872 }
0x2562   :  { %v2875_v22 = vmul.f32 %v3952_v2, %v2873_v18 }
0x2564   :  { %2877 = vrot.lane.b32.xlu0 %v2875_v22, %s4001_s23 }
0x2569   :  { %v2897_v27 = vpop.permute.xlu1 %2896 }
0x256a   :  { %v2899_v29 = vmul.f32 %v3954_v23, %v2897_v27 }
0x256c   :  { %2901 = vrot.lane.b32.xlu1 %v2899_v29, %s4001_s23 }
0x25d6   :  { %v2878_v30 = vpop.permute.xlu0 %2877 }
0x25d7   :  { %v4768_v12 = vadd.f32 %v2878_v30, %v2870_v33 }
0x25d9   :  { %3955 = vtanh.f32 %v4768_v12 }
0x25de   :  { %v2902_v40 = vpop.permute.xlu1 %2901 }
0x25df   :  { %v4772_v19 = vadd.f32 %v2902_v40, %v2894_v35 }
0x25e1   :  { %3957 = vtanh.f32 %v4772_v19 }
0x25e3   :  { %v3956_v42 = vpop.eup %3955 }
0x25e4   :  { %2883 = vrot.lane.b32.xlu0 %v3956_v42, %s4000_s4 }
0x25eb   :  { %v3958_v44 = vpop.eup %3957 }
0x25ec   :  { %2907 = vrot.lane.b32.xlu1 %v3958_v44, %s4000_s4 }
0x2656   :  { %v2884_v45 = vpop.permute.xlu0 %2883 }
0x2657   :  { %v2886_v46 = vmul.f32 %v3952_v2, %v2884_v45 }
0x2659   :  { %v2911_v48 = vpack.c.bf16 %v2886_v46, %v2886_v46  ;;  %v3154_v46 = vrot.slane %v4587_v14, 2 }
0x265b   :  { %2913 = vrot.lane.b32.xlu0 %v2911_v48, %s4001_s23 }
0x265e   :  { %v2908_v49 = vpop.permute.xlu1 %2907 }
0x265f   :  { %v2910_v54 = vmul.f32 %v3954_v23, %v2908_v49 }
0x2661   :  { %v2959_v57 = vpack.c.bf16 %v2910_v54, %v2910_v54 }
0x2663   :  { %2961 = vrot.lane.b32.xlu1 %v2959_v57, %s4001_s23 }
0x26cd   :  { %v2914_v59 = vpop.permute.xlu0 %2913 }
0x26ce   :  { %3670 = vmatmul.mubr.msk.bf16.vlgmr.msra.gmra.mrb[56].mxu1 %vm144_vm1, %v2914_v59 }
0x26cf   :  { %3682 = vmatpush3.bf16.msra.mxu1 %v3991_v61  ;;  %3685 = vmatprep.mubr.msk.bf16.mxu1 %vm3998_vm0, %v3997_v11 }
0x26d0   :  { %3683 = vmatprep.subr.bf16.mxu1 %v3997_v11 }
0x26d3   :  { %3684 = vmatpush3.bf16.msra.mxu1 %v3992_v37 }
0x26d5   :  { %v2962_v55 = vpop.permute.xlu1 %2961 }
0x26d6   :  { %3678 = vmatmul.mubr.msk.bf16.vlgmr.msra.gmra.mrb[64].mxu0 %vm144_vm1, %v2962_v55 }
0x26d7   :  { %3690 = vmatpush3.bf16.msra.mxu0 %v3993_v6  ;;  %3693 = vmatprep.mubr.msk.bf16.mxu0 %vm3998_vm0, %v3997_v11 }
0x26d8   :  { %3691 = vmatprep.subr.bf16.mxu0 %v3997_v11 }
0x26db   :  { %3692 = vmatpush3.bf16.msra.mxu0 %v3994_v41 }
0x27a1   :  { %v2952_v58 = vpop.f32.mrb[56].mxu1 }
0x27a2   :  { %v2958_v62 = vadd.f32 %v2952_v58, %v4624_v53  ;;  %v3671_v32 = vpop.f32.mrb[57].mxu1 }
0x27a3   :  { %v2955_v21 = vpop.f32.mrb[58].mxu1 }
0x27a4   :  { %3959 = vtanh.f32 %v2958_v62  ;;  %v3672_v5 = vpop.f32.mrb[59].mxu1  ;;  %v3337_v4 = vmul.f32 -1.442695, %v2958_v62 }
0x27a9   :  { %v3000_v24 = vpop.f32.mrb[64].mxu0 }
0x27aa   :  { %v3009_v1 = vadd.f32 %v3007_v50, %v3000_v24  ;;  %v3679_v60 = vpop.f32.mrb[65].mxu0 }
0x27ab   :  { %v3003_v25 = vpop.f32.mrb[66].mxu0 }
0x27ac   :  { %3961 = vtanh.f32 %v3009_v1  ;;  %v3680_v11 = vpop.f32.mrb[67].mxu0  ;;  %v3338_v53 = vmul.f32 -1.442695, %v3009_v1 }
0x27ad   :  { %3963 = vpow2.f32 %v3337_v4 }
0x27ae   :  { %v3960_v38 = vpop.eup %3959  ;;  %3965 = vpow2.f32 %v3338_v53 }
0x27af   :  { %3019 = vrot.lane.b32.xlu0 %v3960_v38, %s4000_s4 }
0x27b6   :  { %v3962_v26 = vpop.eup %3961 }
0x27b7   :  { %3043 = vrot.lane.b32.xlu1 %v3962_v26, %s4000_s4  ;;  %v3964_v7 = vpop.eup %3963 }
0x27b8   :  { %v3013_v8 = vadd.f32 1.0, %v3964_v7  ;;  %v3966_v43 = vpop.eup %3965  ;;  %v1679_v7 = vrot.slane %v4422_v56, %v4157_v51 }
0x27b9   :  { %v3037_v10 = vadd.f32 1.0, %v3966_v43 }
0x27ba   :  { %3967 = vrcp.f32 %v3013_v8 }
0x27bb   :  { %3969 = vrcp.f32 %v3037_v10 }
0x27c4   :  { %v3968_v28 = vpop.eup %3967 }
0x27c5   :  { %v3970_v9 = vpop.eup %3969  ;;  %v3017_v16 = vmul.f32 %v3968_v28, %v4768_v12 }
0x27c6   :  { %v3041_v17 = vmul.f32 %v3970_v9, %v4772_v19 }
0x2821   :  { %v3020_v13 = vpop.permute.xlu0 %3019 }
0x2822   :  { %v3022_v3 = vmul.f32 %v3968_v28, %v3020_v13 }
0x2824   :  { %3024 = vrot.lane.b32.xlu0 %v3022_v3, %s4001_s23 }
0x2829   :  { %v3044_v34 = vpop.permute.xlu1 %3043 }
0x282a   :  { %v3046_v31 = vmul.f32 %v3970_v9, %v3044_v34 }
0x282c   :  { %3048 = vrot.lane.b32.xlu1 %v3046_v31, %s4001_s23 }
0x2896   :  { %v3025_v39 = vpop.permute.xlu0 %3024 }
0x2897   :  { %v3027_v15 = vadd.f32 %v3025_v39, %v3017_v16 }
0x2899   :  { %3971 = vtanh.f32 %v3027_v15 }
0x289e   :  { %v3049_v36 = vpop.permute.xlu1 %3048 }
0x289f   :  { %v3051_v20 = vadd.f32 %v3049_v36, %v3041_v17 }
0x28a1   :  { %3973 = vtanh.f32 %v3051_v20 }
0x28a3   :  { %v3972_v2 = vpop.eup %3971 }
0x28a4   :  { %3030 = vrot.lane.b32.xlu0 %v3972_v2, %s4000_s4 }
0x28ab   :  { %v3974_v18 = vpop.eup %3973 }
0x28ac   :  { %3054 = vrot.lane.b32.xlu1 %v3974_v18, %s4000_s4 }
0x2916   :  { %v3031_v22 = vpop.permute.xlu0 %3030 }
0x2917   :  { %v3033_v23 = vmul.f32 %v3968_v28, %v3031_v22 }
0x2919   :  { %v3058_v27 = vpack.c.bf16 %v3033_v23, %v3033_v23 }
0x291b   :  { %3060 = vrot.lane.b32.xlu0 %v3058_v27, %s4001_s23 }
0x291e   :  { %v3055_v29 = vpop.permute.xlu1 %3054 }
0x291f   :  { %v3057_v33 = vmul.f32 %v3970_v9, %v3055_v29 }
0x2921   :  { %v3106_v30 = vpack.c.bf16 %v3057_v33, %v3057_v33 }
0x2923   :  { %3108 = vrot.lane.b32.xlu1 %v3106_v30, %s4001_s23 }
0x298d   :  { %v3061_v12 = vpop.permute.xlu0 %3060 }
0x298e   :  { %3686 = vmatmul.mubr.msk.bf16.vlgmr.msra.gmra.mrb[60].mxu1 %vm144_vm1, %v3061_v12 }
0x2995   :  { %v3109_v35 = vpop.permute.xlu1 %3108 }
0x2996   :  { %3694 = vmatmul.mubr.msk.bf16.vlgmr.msra.gmra.mrb[68].mxu0 %vm144_vm1, %v3109_v35 }
0x2a61   :  { %v3099_v40 = vpop.f32.mrb[60].mxu1 }
0x2a62   :  { %v3105_v19 = vadd.f32 %v3099_v40, %v4590_v63  ;;  %v3687_v42 = vpop.f32.mrb[61].mxu1 }
0x2a63   :  { %v3102_v44 = vpop.f32.mrb[62].mxu1 }
0x2a64   :  { %3975 = vtanh.f32 %v3105_v19  ;;  %v3688_v45 = vpop.f32.mrb[63].mxu1  ;;  %v3341_v55 = vmul.f32 -1.442695, %v3105_v19 }
0x2a69   :  { %v3147_v48 = vpop.f32.mrb[68].mxu0 }
0x2a6a   :  { %v3156_v49 = vadd.f32 %v3154_v46, %v3147_v48  ;;  %v3695_v54 = vpop.f32.mrb[69].mxu0 }
0x2a6b   :  { %v3150_v57 = vpop.f32.mrb[70].mxu0 }
0x2a6c   :  { %3977 = vtanh.f32 %v3156_v49  ;;  %v3696_v59 = vpop.f32.mrb[71].mxu0  ;;  %v3342_v63 = vmul.f32 -1.442695, %v3156_v49 }
0x2a6d   :  { %3979 = vpow2.f32 %v3341_v55 }
0x2a6e   :  { %v3976_v61 = vpop.eup %3975  ;;  %3981 = vpow2.f32 %v3342_v63 }
0x2a6f   :  { %3166 = vrot.lane.b32.xlu0 %v3976_v61, %s4000_s4 }
0x2a76   :  { %v3978_v37 = vpop.eup %3977 }
0x2a77   :  { %3190 = vrot.lane.b32.xlu1 %v3978_v37, %s4000_s4  ;;  %v3980_v6 = vpop.eup %3979 }
0x2a78   :  { %v3160_v41 = vadd.f32 1.0, %v3980_v6  ;;  %v3982_v14 = vpop.eup %3981 }
0x2a79   :  { %v3184_v58 = vadd.f32 1.0, %v3982_v14 }
0x2a7a   :  { %3983 = vrcp.f32 %v3160_v41 }
0x2a7b   :  { %3985 = vrcp.f32 %v3184_v58 }
0x2a84   :  { %v3984_v62 = vpop.eup %3983 }
0x2a85   :  { %v3986_v5 = vpop.eup %3985  ;;  %v3164_v1 = vmul.f32 %v3984_v62, %v3027_v15 }
0x2a86   :  { %v3188_v11 = vmul.f32 %v3986_v5, %v3051_v20 }
0x2ae1   :  { %v3167_v32 = vpop.permute.xlu0 %3166 }
0x2ae2   :  { %v3169_v21 = vmul.f32 %v3984_v62, %v3167_v32 }
0x2ae4   :  { %3171 = vrot.lane.b32.xlu0 %v3169_v21, %s4001_s23 }
0x2ae9   :  { %v3191_v50 = vpop.permute.xlu1 %3190 }
0x2aea   :  { %v3193_v24 = vmul.f32 %v3986_v5, %v3191_v50 }
0x2aec   :  { %3195 = vrot.lane.b32.xlu1 %v3193_v24, %s4001_s23 }
0x2b56   :  { %v3172_v60 = vpop.permute.xlu0 %3171 }
0x2b57   :  { %v3174_v25 = vadd.f32 %v3172_v60, %v3164_v1 }
0x2b59   :  { %3987 = vtanh.f32 %v3174_v25  ;;  %v3237_v56 = vrot.slane %v3174_v25, %v4157_v51 }
0x2b5e   :  { %v3196_v38 = vpop.permute.xlu1 %3195 }
0x2b5f   :  { %v3198_v26 = vadd.f32 %v3196_v38, %v3188_v11 }
0x2b61   :  { %3989 = vtanh.f32 %v3198_v26 }
0x2b63   :  { %v3988_v4 = vpop.eup %3987 }
0x2b64   :  { %3177 = vrot.lane.b32.xlu0 %v3988_v4, %s4000_s4 }
0x2b68   :  { %1666 = vrot.lane.b32.xlu0 %v4476_v0, %s4000_s4 }
0x2b6b   :  { %v3990_v53 = vpop.eup %3989 }
0x2b6c   :  { %3201 = vrot.lane.b32.xlu1 %v3990_v53, %s4000_s4 }
0x2b70   :  { %1680 = vrot.lane.b32.xlu1 %v1679_v7, %s4002_s6 }
0x2bd6   :  { %v3178_v8 = vpop.permute.xlu0 %3177 }
0x2bd7   :  { %v3180_v43 = vmul.f32 %v3984_v62, %v3178_v8 }
0x2bd9   :  { %v3212_v10 = vrot.slane %v3180_v43, %v4157_v51 }
0x2bda   :  { %v1667_v28 = vpop.permute.xlu0 %1666 }
0x2bdb   :  { %v1669_v13 = vsel %vm144_vm1, %v4549_v47, %v1667_v28  ;;  %3213 = vrot.lane.b32.xlu0 %v3212_v10, %s4001_s23 }
0x2bdc   :  { %1671 = vst.msk [vmem:[%s4861_s9] sm:$0x3] %vm1670_vm3, %v1669_v13 }
0x2bde   :  { %v3202_v0 = vpop.permute.xlu1 %3201 }
0x2bdf   :  { %v3204_v3 = vmul.f32 %v3986_v5, %v3202_v0  ;;  %3238 = vrot.lane.b32.xlu0 %v3237_v56, %s4002_s6 }
0x2be1   :  { %v3223_v9 = vrot.slane %v3204_v3, %v4157_v51 }
0x2be2   :  { %v1681_v34 = vpop.permute.xlu1 %1680 }
0x2be3   :  { %v1683_v31 = vsel %vm144_vm1, %v1681_v34, %v4418_v52  ;;  %3224 = vrot.lane.b32.xlu1 %v3223_v9, %s4000_s4 }
0x2be4   :  { %1684 = vst.msk [vmem:[%s4862_s10] sm:$0x3] %vm1670_vm3, %v1683_v31 }
0x2c4d   :  { %v3214_v47 = vpop.permute.xlu0 %3213 }
0x2c51   :  { %v3239_v16 = vpop.permute.xlu0 %3238 }
0x2c52   :  { %v3241_v39 = vsel %vm144_vm1, %v3239_v16, %v3198_v26 }
0x2c53   :  { %3344 = vst.msk [vmem:[%s4862_s10 + $0x2] sm:$0x3] %vm1670_vm3, %v3241_v39 }
0x2c55   :  { %v3225_v51 = vpop.permute.xlu1 %3224 }
0x2c56   :  { %v3227_v15 = vsel %vm144_vm1, %v3214_v47, %v3225_v51 }
0x2c57   :  { %3343 = vst.msk [vmem:[%s4861_s9 + $0x2] sm:$0x3] %vm1670_vm3, %v3227_v15 }

</bundles_post_ra>
